<compile_context>
chip_gen: v7x
topology: tpu7x:2x2x1
jax: 0.10.0
libtpu: 0.0.40
codegen_flags: <defaults>
</compile_context>

<pallas_src>
import jax
import jax.numpy as jnp
from jax.experimental import pallas as pl
from jax.experimental.pallas import tpu as pltpu

NUM_CLASSES = 5
IN_FEATURES = 100352  # matches nn.Linear(in_features=100352, out_features=5)
LANES = 128


def fc_kernel(x_ref, w_ref, b_ref, o_ref, acc_ref):
    """One K-tile of y = x @ W^T + b, computed on the VPU.

    x_ref:   (B, TKC, 128)  activation K-tile (lane-dense along K)
    w_ref:   (N, TKC, 128)  weight K-tile (PyTorch (N, K) layout, reshaped)
    b_ref:   (1, N)         bias (resident across the grid)
    o_ref:   (B, N)         output (resident across the reduction grid axis)
    acc_ref: (B, N, 128)    lane-dense f32 partial accumulator
    """
    k = pl.program_id(0)

    @pl.when(k == 0)
    def _():
        acc_ref[...] = jnp.zeros_like(acc_ref)

    n_b = x_ref.shape[0]
    n_n = w_ref.shape[0]
    # VPU multiply-accumulate: per (batch row, class row) pair, elementwise
    # product of (TKC, 128) tiles reduced over the sublane axis only; the
    # cross-lane reduce is deferred to the final grid step.
    for bi in range(n_b):
        xb = x_ref[bi]                                        # (TKC, 128)
        for ni in range(n_n):
            acc_ref[bi, ni, :] += jnp.sum(xb * w_ref[ni], axis=0)

    @pl.when(k == pl.num_programs(0) - 1)
    def _():
        y = jnp.sum(acc_ref[...], axis=-1)                    # (B, N)
        o_ref[...] = (y + b_ref[...]).astype(o_ref.dtype)


def fc_forward(x_flat, w, bias, *, tk=50176):
    """x_flat: (B, K) f32, w: (N, K) f32 (PyTorch layout), bias: (1, N) -> (B, N)."""
    B, K = x_flat.shape
    N, Kw = w.shape
    assert K == Kw, f"feature mismatch: {K} vs {Kw}"
    assert K % LANES == 0
    # tk must divide K and keep the block sublane count a multiple of 8.
    assert K % tk == 0 and tk % (8 * LANES) == 0, f"invalid tk={tk} for K={K}"
    kc = K // LANES            # K in units of 128-lane columns
    tkc = tk // LANES          # K-tile in units of 128-lane columns
    grid = (kc // tkc,)        # (2,) for the default tk

    # Free (contiguous, row-major) reshapes in HBM: no weight copy, no padding.
    x3 = x_flat.reshape(B, kc, LANES)
    w3 = w.reshape(N, kc, LANES)

    bytes_accessed = (x_flat.size + w.size + bias.size + B * N) * 4

    return pl.pallas_call(
        fc_kernel,
        out_shape=jax.ShapeDtypeStruct((B, N), x_flat.dtype),
        grid_spec=pltpu.PrefetchScalarGridSpec(
            num_scalar_prefetch=0,
            grid=grid,
            in_specs=[
                pl.BlockSpec((B, tkc, LANES), lambda k: (0, k, 0)),  # activations
                pl.BlockSpec((N, tkc, LANES), lambda k: (0, k, 0)),  # weights (N,K layout)
                pl.BlockSpec((1, N), lambda k: (0, 0)),              # bias (resident)
            ],
            out_specs=pl.BlockSpec((B, N), lambda k: (0, 0)),
            scratch_shapes=[pltpu.VMEM((B, N, LANES), jnp.float32)],
        ),
        compiler_params=pltpu.CompilerParams(
            dimension_semantics=("arbitrary",),
        ),
        cost_estimate=pl.CostEstimate(
            flops=2 * B * N * K,
            transcendentals=0,
            bytes_accessed=bytes_accessed,
        ),
    )(x3, w3, bias)


def resnet_benchmark_forward(x_nchw, w, b):
    """Forward pass of resnet_benchmark with identity backbone.

    x_nchw: (B, C, H, W) with C*H*W == IN_FEATURES
    w:      (NUM_CLASSES, IN_FEATURES)   (PyTorch nn.Linear weight layout, as-is)
    b:      (NUM_CLASSES,)
    """
    # backbone(x) -> identity (see TODO above)
    B = x_nchw.shape[0]
    x_flat = x_nchw.reshape(B, -1)     # torch.flatten(x, 1)
    bias = b.reshape(1, -1)
    return fc_forward(x_flat, w, bias)


if __name__ == "__main__":
    key = jax.random.PRNGKey(0)
    kx, kw, kb = jax.random.split(key, 3)

    # Backbone output / fc input: (B=2, C=2048, H=7, W=7) -> 100352 features,
    # as dictated by nn.Linear(in_features=100352, ...).
    B, C, H, W = 2, 2048, 7, 7
    assert C * H * W == IN_FEATURES

    x = jax.random.normal(kx, (B, C, H, W), dtype=jnp.float32)
    # Deterministic synthetic fc parameters (nn.Linear(100352, 5) shapes).
    fan_in = IN_FEATURES
    bound = 1.0 / jnp.sqrt(jnp.float32(fan_in))
    w = jax.random.uniform(kw, (NUM_CLASSES, IN_FEATURES), jnp.float32, -bound, bound)
    b = jax.random.uniform(kb, (NUM_CLASSES,), jnp.float32, -bound, bound)

    out = resnet_benchmark_forward(x, w, b)
    out = jax.block_until_ready(out)

    # Cross-check against a full-precision plain-JAX reference.
    ref = jnp.einsum(
        "bk,nk->bn", x.reshape(B, -1), w, precision=jax.lax.Precision.HIGHEST
    ) + b
    assert out.shape == (B, NUM_CLASSES)
    assert jnp.allclose(out, ref, atol=1e-3, rtol=1e-3), (
        f"mismatch: max abs err {jnp.max(jnp.abs(out - ref))}"
    )

    print("KERNEL_OK")
</pallas_src>

<mosaic_0001>
module attributes {stable_mosaic.version = 11 : i64} {
  func.func @fc_kernel(%arg0: i32, %arg1: memref<2x392x128xf32, #tpu.memory_space<vmem>>, %arg2: memref<5x392x128xf32, #tpu.memory_space<vmem>>, %arg3: memref<1x5xf32, #tpu.memory_space<vmem>>, %arg4: memref<2x5xf32, #tpu.memory_space<vmem>>, %arg5: memref<2x5x128xf32, #tpu.memory_space<vmem>>) attributes {dimension_semantics = [#tpu.dimension_semantics<arbitrary>], iteration_bounds = array<i64: 2>, scalar_prefetch = 0 : i64, scratch_operands = 1 : i64, tpu.core_type = #tpu.core_type<tc>, window_params = [{transform_indices = @transform_0, window_bounds = array<i64: 2, 392, 128>}, {transform_indices = @transform_1, window_bounds = array<i64: 5, 392, 128>}, {pipeline_mode = #tpu.pipeline_mode<synchronous>, transform_indices = @transform_2, window_bounds = array<i64: 1, 5>}, {pipeline_mode = #tpu.pipeline_mode<synchronous>, transform_indices = @transform_3, window_bounds = array<i64: 2, 5>}]} {
    %c0_i32 = arith.constant 0 : i32
    %0 = arith.cmpi eq, %arg0, %c0_i32 : i32
    %1 = arith.extui %0 : i1 to i32
    %c0_i32_0 = arith.constant 0 : i32
    %2 = arith.cmpi ne, %1, %c0_i32_0 : i32
    scf.if %2 {
      %cst_102 = arith.constant 0.000000e+00 : f32
      %110 = vector.broadcast %cst_102 : f32 to vector<2x5x128xf32>
      %c0_103 = arith.constant 0 : index
      %c0_104 = arith.constant 0 : index
      %c0_105 = arith.constant 0 : index
      %111 = vector.load %arg5[%c0_103, %c0_104, %c0_105] : memref<2x5x128xf32, #tpu.memory_space<vmem>>, vector<2x5x128xf32>
      tpu.vector_store %arg5[%c0_103, %c0_104, %c0_105], %110 {strides = array<i32>} : memref<2x5x128xf32, #tpu.memory_space<vmem>>, vector<2x5x128xf32>,
    } else {
    }
    %c0 = arith.constant 0 : index
    %c0_1 = arith.constant 0 : index
    %c0_2 = arith.constant 0 : index
    %3 = vector.load %arg1[%c0, %c0_1, %c0_2] : memref<2x392x128xf32, #tpu.memory_space<vmem>>, vector<1x392x128xf32>
    %4 = vector.shape_cast %3 : vector<1x392x128xf32> to vector<392x128xf32>
    %c0_3 = arith.constant 0 : index
    %c0_4 = arith.constant 0 : index
    %c0_5 = arith.constant 0 : index
    %5 = vector.load %arg5[%c0_3, %c0_4, %c0_5] : memref<2x5x128xf32, #tpu.memory_space<vmem>>, vector<1x1x128xf32>
    %6 = vector.shape_cast %5 : vector<1x1x128xf32> to vector<128xf32>
    %c0_6 = arith.constant 0 : index
    %c0_7 = arith.constant 0 : index
    %c0_8 = arith.constant 0 : index
    %7 = vector.load %arg2[%c0_6, %c0_7, %c0_8] : memref<5x392x128xf32, #tpu.memory_space<vmem>>, vector<1x392x128xf32>
    %8 = vector.shape_cast %7 : vector<1x392x128xf32> to vector<392x128xf32>
    %9 = arith.mulf %4, %8 : vector<392x128xf32>
    %cst = arith.constant dense<0.000000e+00> : vector<128xf32>
    %10 = vector.multi_reduction <add>, %9, %cst [0] : vector<392x128xf32> to vector<128xf32>
    %11 = arith.addf %6, %10 : vector<128xf32>
    %c0_9 = arith.constant 0 : index
    %c0_10 = arith.constant 0 : index
    %c0_11 = arith.constant 0 : index
    %12 = vector.load %arg5[%c0_9, %c0_10, %c0_11] : memref<2x5x128xf32, #tpu.memory_space<vmem>>, vector<1x1x128xf32>
    %13 = vector.shape_cast %12 : vector<1x1x128xf32> to vector<128xf32>
    %14 = vector.shape_cast %11 : vector<128xf32> to vector<1x1x128xf32>
    tpu.vector_store %arg5[%c0_9, %c0_10, %c0_11], %14 {strides = array<i32>} : memref<2x5x128xf32, #tpu.memory_space<vmem>>, vector<1x1x128xf32>,
    %c0_12 = arith.constant 0 : index
    %c1 = arith.constant 1 : index
    %c0_13 = arith.constant 0 : index
    %15 = vector.load %arg5[%c0_12, %c1, %c0_13] : memref<2x5x128xf32, #tpu.memory_space<vmem>>, vector<1x1x128xf32>
    %16 = vector.shape_cast %15 : vector<1x1x128xf32> to vector<128xf32>
    %c1_14 = arith.constant 1 : index
    %c0_15 = arith.constant 0 : index
    %c0_16 = arith.constant 0 : index
    %17 = vector.load %arg2[%c1_14, %c0_15, %c0_16] : memref<5x392x128xf32, #tpu.memory_space<vmem>>, vector<1x392x128xf32>
    %18 = vector.shape_cast %17 : vector<1x392x128xf32> to vector<392x128xf32>
    %19 = arith.mulf %4, %18 : vector<392x128xf32>
    %cst_17 = arith.constant dense<0.000000e+00> : vector<128xf32>
    %20 = vector.multi_reduction <add>, %19, %cst_17 [0] : vector<392x128xf32> to vector<128xf32>
    %21 = arith.addf %16, %20 : vector<128xf32>
    %c0_18 = arith.constant 0 : index
    %c1_19 = arith.constant 1 : index
    %c0_20 = arith.constant 0 : index
    %22 = vector.load %arg5[%c0_18, %c1_19, %c0_20] : memref<2x5x128xf32, #tpu.memory_space<vmem>>, vector<1x1x128xf32>
    %23 = vector.shape_cast %22 : vector<1x1x128xf32> to vector<128xf32>
    %24 = vector.shape_cast %21 : vector<128xf32> to vector<1x1x128xf32>
    tpu.vector_store %arg5[%c0_18, %c1_19, %c0_20], %24 {strides = array<i32>} : memref<2x5x128xf32, #tpu.memory_space<vmem>>, vector<1x1x128xf32>,
    %c0_21 = arith.constant 0 : index
    %c2 = arith.constant 2 : index
    %c0_22 = arith.constant 0 : index
    %25 = vector.load %arg5[%c0_21, %c2, %c0_22] : memref<2x5x128xf32, #tpu.memory_space<vmem>>, vector<1x1x128xf32>
    %26 = vector.shape_cast %25 : vector<1x1x128xf32> to vector<128xf32>
    %c2_23 = arith.constant 2 : index
    %c0_24 = arith.constant 0 : index
    %c0_25 = arith.constant 0 : index
    %27 = vector.load %arg2[%c2_23, %c0_24, %c0_25] : memref<5x392x128xf32, #tpu.memory_space<vmem>>, vector<1x392x128xf32>
    %28 = vector.shape_cast %27 : vector<1x392x128xf32> to vector<392x128xf32>
    %29 = arith.mulf %4, %28 : vector<392x128xf32>
    %cst_26 = arith.constant dense<0.000000e+00> : vector<128xf32>
    %30 = vector.multi_reduction <add>, %29, %cst_26 [0] : vector<392x128xf32> to vector<128xf32>
    %31 = arith.addf %26, %30 : vector<128xf32>
    %c0_27 = arith.constant 0 : index
    %c2_28 = arith.constant 2 : index
    %c0_29 = arith.constant 0 : index
    %32 = vector.load %arg5[%c0_27, %c2_28, %c0_29] : memref<2x5x128xf32, #tpu.memory_space<vmem>>, vector<1x1x128xf32>
    %33 = vector.shape_cast %32 : vector<1x1x128xf32> to vector<128xf32>
    %34 = vector.shape_cast %31 : vector<128xf32> to vector<1x1x128xf32>
    tpu.vector_store %arg5[%c0_27, %c2_28, %c0_29], %34 {strides = array<i32>} : memref<2x5x128xf32, #tpu.memory_space<vmem>>, vector<1x1x128xf32>,
    %c0_30 = arith.constant 0 : index
    %c3 = arith.constant 3 : index
    %c0_31 = arith.constant 0 : index
    %35 = vector.load %arg5[%c0_30, %c3, %c0_31] : memref<2x5x128xf32, #tpu.memory_space<vmem>>, vector<1x1x128xf32>
    %36 = vector.shape_cast %35 : vector<1x1x128xf32> to vector<128xf32>
    %c3_32 = arith.constant 3 : index
    %c0_33 = arith.constant 0 : index
    %c0_34 = arith.constant 0 : index
    %37 = vector.load %arg2[%c3_32, %c0_33, %c0_34] : memref<5x392x128xf32, #tpu.memory_space<vmem>>, vector<1x392x128xf32>
    %38 = vector.shape_cast %37 : vector<1x392x128xf32> to vector<392x128xf32>
    %39 = arith.mulf %4, %38 : vector<392x128xf32>
    %cst_35 = arith.constant dense<0.000000e+00> : vector<128xf32>
    %40 = vector.multi_reduction <add>, %39, %cst_35 [0] : vector<392x128xf32> to vector<128xf32>
    %41 = arith.addf %36, %40 : vector<128xf32>
    %c0_36 = arith.constant 0 : index
    %c3_37 = arith.constant 3 : index
    %c0_38 = arith.constant 0 : index
    %42 = vector.load %arg5[%c0_36, %c3_37, %c0_38] : memref<2x5x128xf32, #tpu.memory_space<vmem>>, vector<1x1x128xf32>
    %43 = vector.shape_cast %42 : vector<1x1x128xf32> to vector<128xf32>
    %44 = vector.shape_cast %41 : vector<128xf32> to vector<1x1x128xf32>
    tpu.vector_store %arg5[%c0_36, %c3_37, %c0_38], %44 {strides = array<i32>} : memref<2x5x128xf32, #tpu.memory_space<vmem>>, vector<1x1x128xf32>,
    %c0_39 = arith.constant 0 : index
    %c4 = arith.constant 4 : index
    %c0_40 = arith.constant 0 : index
    %45 = vector.load %arg5[%c0_39, %c4, %c0_40] : memref<2x5x128xf32, #tpu.memory_space<vmem>>, vector<1x1x128xf32>
    %46 = vector.shape_cast %45 : vector<1x1x128xf32> to vector<128xf32>
    %c4_41 = arith.constant 4 : index
    %c0_42 = arith.constant 0 : index
    %c0_43 = arith.constant 0 : index
    %47 = vector.load %arg2[%c4_41, %c0_42, %c0_43] : memref<5x392x128xf32, #tpu.memory_space<vmem>>, vector<1x392x128xf32>
    %48 = vector.shape_cast %47 : vector<1x392x128xf32> to vector<392x128xf32>
    %49 = arith.mulf %4, %48 : vector<392x128xf32>
    %cst_44 = arith.constant dense<0.000000e+00> : vector<128xf32>
    %50 = vector.multi_reduction <add>, %49, %cst_44 [0] : vector<392x128xf32> to vector<128xf32>
    %51 = arith.addf %46, %50 : vector<128xf32>
    %c0_45 = arith.constant 0 : index
    %c4_46 = arith.constant 4 : index
    %c0_47 = arith.constant 0 : index
    %52 = vector.load %arg5[%c0_45, %c4_46, %c0_47] : memref<2x5x128xf32, #tpu.memory_space<vmem>>, vector<1x1x128xf32>
    %53 = vector.shape_cast %52 : vector<1x1x128xf32> to vector<128xf32>
    %54 = vector.shape_cast %51 : vector<128xf32> to vector<1x1x128xf32>
    tpu.vector_store %arg5[%c0_45, %c4_46, %c0_47], %54 {strides = array<i32>} : memref<2x5x128xf32, #tpu.memory_space<vmem>>, vector<1x1x128xf32>,
    %c1_48 = arith.constant 1 : index
    %c0_49 = arith.constant 0 : index
    %c0_50 = arith.constant 0 : index
    %55 = vector.load %arg1[%c1_48, %c0_49, %c0_50] : memref<2x392x128xf32, #tpu.memory_space<vmem>>, vector<1x392x128xf32>
    %56 = vector.shape_cast %55 : vector<1x392x128xf32> to vector<392x128xf32>
    %c1_51 = arith.constant 1 : index
    %c0_52 = arith.constant 0 : index
    %c0_53 = arith.constant 0 : index
    %57 = vector.load %arg5[%c1_51, %c0_52, %c0_53] : memref<2x5x128xf32, #tpu.memory_space<vmem>>, vector<1x1x128xf32>
    %58 = vector.shape_cast %57 : vector<1x1x128xf32> to vector<128xf32>
    %c0_54 = arith.constant 0 : index
    %c0_55 = arith.constant 0 : index
    %c0_56 = arith.constant 0 : index
    %59 = vector.load %arg2[%c0_54, %c0_55, %c0_56] : memref<5x392x128xf32, #tpu.memory_space<vmem>>, vector<1x392x128xf32>
    %60 = vector.shape_cast %59 : vector<1x392x128xf32> to vector<392x128xf32>
    %61 = arith.mulf %56, %60 : vector<392x128xf32>
    %cst_57 = arith.constant dense<0.000000e+00> : vector<128xf32>
    %62 = vector.multi_reduction <add>, %61, %cst_57 [0] : vector<392x128xf32> to vector<128xf32>
    %63 = arith.addf %58, %62 : vector<128xf32>
    %c1_58 = arith.constant 1 : index
    %c0_59 = arith.constant 0 : index
    %c0_60 = arith.constant 0 : index
    %64 = vector.load %arg5[%c1_58, %c0_59, %c0_60] : memref<2x5x128xf32, #tpu.memory_space<vmem>>, vector<1x1x128xf32>
    %65 = vector.shape_cast %64 : vector<1x1x128xf32> to vector<128xf32>
    %66 = vector.shape_cast %63 : vector<128xf32> to vector<1x1x128xf32>
    tpu.vector_store %arg5[%c1_58, %c0_59, %c0_60], %66 {strides = array<i32>} : memref<2x5x128xf32, #tpu.memory_space<vmem>>, vector<1x1x128xf32>,
    %c1_61 = arith.constant 1 : index
    %c1_62 = arith.constant 1 : index
    %c0_63 = arith.constant 0 : index
    %67 = vector.load %arg5[%c1_61, %c1_62, %c0_63] : memref<2x5x128xf32, #tpu.memory_space<vmem>>, vector<1x1x128xf32>
    %68 = vector.shape_cast %67 : vector<1x1x128xf32> to vector<128xf32>
    %c1_64 = arith.constant 1 : index
    %c0_65 = arith.constant 0 : index
    %c0_66 = arith.constant 0 : index
    %69 = vector.load %arg2[%c1_64, %c0_65, %c0_66] : memref<5x392x128xf32, #tpu.memory_space<vmem>>, vector<1x392x128xf32>
    %70 = vector.shape_cast %69 : vector<1x392x128xf32> to vector<392x128xf32>
    %71 = arith.mulf %56, %70 : vector<392x128xf32>
    %cst_67 = arith.constant dense<0.000000e+00> : vector<128xf32>
    %72 = vector.multi_reduction <add>, %71, %cst_67 [0] : vector<392x128xf32> to vector<128xf32>
    %73 = arith.addf %68, %72 : vector<128xf32>
    %c1_68 = arith.constant 1 : index
    %c1_69 = arith.constant 1 : index
    %c0_70 = arith.constant 0 : index
    %74 = vector.load %arg5[%c1_68, %c1_69, %c0_70] : memref<2x5x128xf32, #tpu.memory_space<vmem>>, vector<1x1x128xf32>
    %75 = vector.shape_cast %74 : vector<1x1x128xf32> to vector<128xf32>
    %76 = vector.shape_cast %73 : vector<128xf32> to vector<1x1x128xf32>
    tpu.vector_store %arg5[%c1_68, %c1_69, %c0_70], %76 {strides = array<i32>} : memref<2x5x128xf32, #tpu.memory_space<vmem>>, vector<1x1x128xf32>,
    %c1_71 = arith.constant 1 : index
    %c2_72 = arith.constant 2 : index
    %c0_73 = arith.constant 0 : index
    %77 = vector.load %arg5[%c1_71, %c2_72, %c0_73] : memref<2x5x128xf32, #tpu.memory_space<vmem>>, vector<1x1x128xf32>
    %78 = vector.shape_cast %77 : vector<1x1x128xf32> to vector<128xf32>
    %c2_74 = arith.constant 2 : index
    %c0_75 = arith.constant 0 : index
    %c0_76 = arith.constant 0 : index
    %79 = vector.load %arg2[%c2_74, %c0_75, %c0_76] : memref<5x392x128xf32, #tpu.memory_space<vmem>>, vector<1x392x128xf32>
    %80 = vector.shape_cast %79 : vector<1x392x128xf32> to vector<392x128xf32>
    %81 = arith.mulf %56, %80 : vector<392x128xf32>
    %cst_77 = arith.constant dense<0.000000e+00> : vector<128xf32>
    %82 = vector.multi_reduction <add>, %81, %cst_77 [0] : vector<392x128xf32> to vector<128xf32>
    %83 = arith.addf %78, %82 : vector<128xf32>
    %c1_78 = arith.constant 1 : index
    %c2_79 = arith.constant 2 : index
    %c0_80 = arith.constant 0 : index
    %84 = vector.load %arg5[%c1_78, %c2_79, %c0_80] : memref<2x5x128xf32, #tpu.memory_space<vmem>>, vector<1x1x128xf32>
    %85 = vector.shape_cast %84 : vector<1x1x128xf32> to vector<128xf32>
    %86 = vector.shape_cast %83 : vector<128xf32> to vector<1x1x128xf32>
    tpu.vector_store %arg5[%c1_78, %c2_79, %c0_80], %86 {strides = array<i32>} : memref<2x5x128xf32, #tpu.memory_space<vmem>>, vector<1x1x128xf32>,
    %c1_81 = arith.constant 1 : index
    %c3_82 = arith.constant 3 : index
    %c0_83 = arith.constant 0 : index
    %87 = vector.load %arg5[%c1_81, %c3_82, %c0_83] : memref<2x5x128xf32, #tpu.memory_space<vmem>>, vector<1x1x128xf32>
    %88 = vector.shape_cast %87 : vector<1x1x128xf32> to vector<128xf32>
    %c3_84 = arith.constant 3 : index
    %c0_85 = arith.constant 0 : index
    %c0_86 = arith.constant 0 : index
    %89 = vector.load %arg2[%c3_84, %c0_85, %c0_86] : memref<5x392x128xf32, #tpu.memory_space<vmem>>, vector<1x392x128xf32>
    %90 = vector.shape_cast %89 : vector<1x392x128xf32> to vector<392x128xf32>
    %91 = arith.mulf %56, %90 : vector<392x128xf32>
    %cst_87 = arith.constant dense<0.000000e+00> : vector<128xf32>
    %92 = vector.multi_reduction <add>, %91, %cst_87 [0] : vector<392x128xf32> to vector<128xf32>
    %93 = arith.addf %88, %92 : vector<128xf32>
    %c1_88 = arith.constant 1 : index
    %c3_89 = arith.constant 3 : index
    %c0_90 = arith.constant 0 : index
    %94 = vector.load %arg5[%c1_88, %c3_89, %c0_90] : memref<2x5x128xf32, #tpu.memory_space<vmem>>, vector<1x1x128xf32>
    %95 = vector.shape_cast %94 : vector<1x1x128xf32> to vector<128xf32>
    %96 = vector.shape_cast %93 : vector<128xf32> to vector<1x1x128xf32>
    tpu.vector_store %arg5[%c1_88, %c3_89, %c0_90], %96 {strides = array<i32>} : memref<2x5x128xf32, #tpu.memory_space<vmem>>, vector<1x1x128xf32>,
    %c1_91 = arith.constant 1 : index
    %c4_92 = arith.constant 4 : index
    %c0_93 = arith.constant 0 : index
    %97 = vector.load %arg5[%c1_91, %c4_92, %c0_93] : memref<2x5x128xf32, #tpu.memory_space<vmem>>, vector<1x1x128xf32>
    %98 = vector.shape_cast %97 : vector<1x1x128xf32> to vector<128xf32>
    %c4_94 = arith.constant 4 : index
    %c0_95 = arith.constant 0 : index
    %c0_96 = arith.constant 0 : index
    %99 = vector.load %arg2[%c4_94, %c0_95, %c0_96] : memref<5x392x128xf32, #tpu.memory_space<vmem>>, vector<1x392x128xf32>
    %100 = vector.shape_cast %99 : vector<1x392x128xf32> to vector<392x128xf32>
    %101 = arith.mulf %56, %100 : vector<392x128xf32>
    %cst_97 = arith.constant dense<0.000000e+00> : vector<128xf32>
    %102 = vector.multi_reduction <add>, %101, %cst_97 [0] : vector<392x128xf32> to vector<128xf32>
    %103 = arith.addf %98, %102 : vector<128xf32>
    %c1_98 = arith.constant 1 : index
    %c4_99 = arith.constant 4 : index
    %c0_100 = arith.constant 0 : index
    %104 = vector.load %arg5[%c1_98, %c4_99, %c0_100] : memref<2x5x128xf32, #tpu.memory_space<vmem>>, vector<1x1x128xf32>
    %105 = vector.shape_cast %104 : vector<1x1x128xf32> to vector<128xf32>
    %106 = vector.shape_cast %103 : vector<128xf32> to vector<1x1x128xf32>
    tpu.vector_store %arg5[%c1_98, %c4_99, %c0_100], %106 {strides = array<i32>} : memref<2x5x128xf32, #tpu.memory_space<vmem>>, vector<1x1x128xf32>,
    %c1_i32 = arith.constant 1 : i32
    %107 = arith.cmpi eq, %arg0, %c1_i32 : i32
    %108 = arith.extui %107 : i1 to i32
    %c0_i32_101 = arith.constant 0 : i32
    %109 = arith.cmpi ne, %108, %c0_i32_101 : i32
    scf.if %109 {
      %c0_102 = arith.constant 0 : index
      %c0_103 = arith.constant 0 : index
      %c0_104 = arith.constant 0 : index
      %110 = vector.load %arg5[%c0_102, %c0_103, %c0_104] : memref<2x5x128xf32, #tpu.memory_space<vmem>>, vector<2x5x128xf32>
      %cst_105 = arith.constant dense<0.000000e+00> : vector<2x5xf32>
      %111 = vector.multi_reduction <add>, %110, %cst_105 [2] : vector<2x5x128xf32> to vector<2x5xf32>
      %c0_106 = arith.constant 0 : index
      %c0_107 = arith.constant 0 : index
      %112 = vector.load %arg3[%c0_106, %c0_107] : memref<1x5xf32, #tpu.memory_space<vmem>>, vector<1x5xf32>
      %113 = vector.broadcast %112 : vector<1x5xf32> to vector<2x5xf32>
      %114 = arith.addf %111, %113 : vector<2x5xf32>
      %c0_108 = arith.constant 0 : index
      %c0_109 = arith.constant 0 : index
      %115 = vector.load %arg4[%c0_108, %c0_109] : memref<2x5xf32, #tpu.memory_space<vmem>>, vector<2x5xf32>
      tpu.vector_store %arg4[%c0_108, %c0_109], %114 {strides = array<i32>} : memref<2x5xf32, #tpu.memory_space<vmem>>, vector<2x5xf32>,
    } else {
    }
    return
  }
  func.func @transform_0(%arg0: i32) -> (i32, i32, i32) {
    %c0_i32 = arith.constant 0 : i32
    %c0_i32_0 = arith.constant 0 : i32
    %c0_i32_1 = arith.constant 0 : i32
    return %c0_i32, %arg0, %c0_i32_0 : i32, i32, i32
  }
  func.func @transform_1(%arg0: i32) -> (i32, i32, i32) {
    %c0_i32 = arith.constant 0 : i32
    %c0_i32_0 = arith.constant 0 : i32
    %c0_i32_1 = arith.constant 0 : i32
    return %c0_i32, %arg0, %c0_i32_0 : i32, i32, i32
  }
  func.func @transform_2(%arg0: i32) -> (i32, i32) {
    %c0_i32 = arith.constant 0 : i32
    %c0_i32_0 = arith.constant 0 : i32
    %c0_i32_1 = arith.constant 0 : i32
    return %c0_i32, %c0_i32_0 : i32, i32
  }
  func.func @transform_3(%arg0: i32) -> (i32, i32) {
    %c0_i32 = arith.constant 0 : i32
    %c0_i32_0 = arith.constant 0 : i32
    %c0_i32_1 = arith.constant 0 : i32
    return %c0_i32, %c0_i32_0 : i32, i32
  }
}

</mosaic_0001>

<bundles_post_ra>
// kernel: tpu_custom_call.1
= control target key start
LH: loop header
LB: loop body
LE: loop exit
PB: predicated region body
PF: predicated region fallthrough
CT: control target
= control target key end

     0   :  { %8 = vsyncpa [#allocation4], 0  ;;  %s4493_s0 = inlined_call_operand.hbm [shape: f32[2,784,128], index: 0, kind: input, shape index: {}]   ;;  %s4494_s1 = inlined_call_operand.hbm [shape: f32[5,784,128], index: 1, kind: input, shape index: {}]   ;;  %s4495_s2 = inlined_call_operand.hbm [shape: f32[1,5], index: 2, kind: input, shape index: {}]   ;;  %s4496_s3 = inlined_call_operand.hbm [shape: f32[2,5], index: 3, kind: output, shape index: {}]  }
   0x1   :  { %10 = vsyncpa [#allocation4 + $0x1], 0 }
   0x2   :  { %11 = vsyncpa [#allocation7], 0 }
   0x3   :  { %13 = vsyncpa [#allocation7 + $0x1], 0 }
   0x4   :  { %14 = vsyncpa [#allocation5], 0  ;;  %s2848_s12 = smov 0   ;;  %s2850_s13 = smov 0  }
   0x5   :  { %s2852_s14 = smov 0   ;;  %s2854_s15 = smov 0  }
   0x6 LB: > { %s2867_s16 = sadd.s32 4294967295, %s2810_s15   ;;  %s2870_s17 = sadd.s32 1, %s2810_s15   ;;  %s2810_s15 = sphi %s2854_s15, %s4776_s15   ;;  %s2806_s14 = sphi %s2852_s14, %s4775_s14   ;;  %s2802_s13 = sphi %s2850_s13, %s4774_s13   ;;  %s2798_s12 = sphi %s2848_s12, %s4773_s12  }
   0x7   : > { %s24_s18 = ssub.s32 %s2810_s15, %s2870_s17  ;;  %s27_s19 = sadd.s32 1, %s2806_s14 }
   0x8   : > { %p25_p0 = scmp.eq.s32.totalorder %s24_s18, 0  ;;  %p34_p1 = scmp.ne.s32.totalorder %s2806_s14, %s2802_s13 }
   0x9   : > { %p35_p2 = scmp.eq.s32.totalorder %s2810_s15, 0  ;;  %p40_p3 = scmp.ne.s32.totalorder %s2802_s13, %s2798_s12 }
   0xa   : > { %s2880_s20 = scalar_select %p25_p0, %s2806_s14, %s27_s19  }
   0xb   : > { %p2882_p4 = por %p35_p2, %p34_p1  ;;  %p4497_p5 = scmp.eq.s32.totalorder %s2867_s16, 0 }
   0xc   : > { %p2079_p6 = scmp.ge.s32.totalorder %s2810_s15, 1  ;;  %p119_p7 = scmp.lt.s32.totalorder %s2810_s15, 3 }
   0xd   : > { %s4617_s21 = scalar_select %p2882_p4, 1, 0 }
   0xe   : > { %p2891_p8 = por %p4497_p5, %p40_p3  ;;  %p2896_p10 = pnand %p2079_p6, %p119_p7 }
   0xf   : > { %s2812_s24 = smov [#allocation8]   ;;  %s2710_s29 = scalar_lea.hbm %s4495_s2, 16 }
  0x10   : > { %s4618_s22 = scalar_select %p2891_p8, 1, 0 }
  0x11   : > { %s4619_s23 = scalar_select %p2896_p10, 1, 0 }
  0x12   : > { %s132_s25 = sshll.u32 %s2812_s24, 4  ;;  %p2570_p11 = pneg %p2896_p10  ;;  %s133_s25 = int_to_ptr.vmem [resolvable:$true] %s132_s25 }
  0x13   : > { %p2711_p13 = scmp.ne.s32.totalorder %s4495_s2, %s2710_s29  ;;  %p2717_p3 = scmp.lt.u32.totalorder %s2710_s29, %s4495_s2 }
  0x14   : > { %p2904_p12 = pnand %p2570_p11, %p4497_p5 }
  0x16   : > { %p2712_p0 = pneg %p2904_p12 }
  0x18   : > { %p2713_p1 = pnand %p2712_p0, %p2711_p13 }
  0x1a   : > { %p2714_p2 = pneg %p2713_p1 }
  0x1c   : > { %p2719_p6 = pnand %p2717_p3, %p2714_p2 }
  0x1e   : > { %2722 = shalt.err (!%p2719_p6)
}
  0x1f   : > { %s2723_s7 = scalar_lea.vmem %s133_s25, 16  ;;  %s2730_s8 = scalar_lea.vmem %s133_s25, 32 }
  0x20   : > { %p2724_p7 = scmp.ne.s32.totalorder %s133_s25, %s2723_s7  ;;  %p2731_p5 = scmp.lt.s32.totalorder %s133_s25, %s133_s25 }
  0x21   : > { %p2732_p8 = scmp.lt.s32.totalorder %s2730_s8, %s2723_s7 }
  0x22   : > { %p2726_p11 = pnand %p2724_p7, %p2712_p0 }
  0x23   : > { %p2733_p10 = por %p2732_p8, %p2731_p5 }
  0x24   : > { %p2727_p9 = pneg %p2726_p11 }
  0x26   : > { %p2734_p4 = pnand %p2733_p10, %p2727_p9 }
  0x28   : > { %2737 = shalt.err (!%p2734_p4)
}
  0x29   : > { %2573 = dma.hbm_to_vmem [thread:$0]  (!%p2904_p12), %s4495_s2, 16, %s133_s25, [#allocation7]  }
  0x2a   : > { %p2081_p13 = scmp.ge.s32.totalorder %s2810_s15, 2 }
  0x2c   : > { %139 = sbr.rel (%p2081_p13) target bundleno = 80 (0x50), region = 20 }
  0x33   : > { %s2926_s11 = sand.u32 1, %s2806_s14   ;;  %s2538_s12 = smul.u32 6272, %s2810_s15 }
  0x34   : > { %s2540_s18 = smul.u32 784, %s2926_s11  ;;  %s2813_s19 = smov 12544  }
  0x35   : > { %p4621_p4 = scmp.ne.s32.totalorder %s4617_s21, 0  ;;  %s153_s27 = scalar_lea.hbm %s4493_s0, %s2538_s12 }
  0x36   : > { %s147_s29 = scalar_lea.vmem [#allocation3], %s2540_s18  ;;  %s2814_s4 = smov 6272  }
  0x37   : > { %2547 = sst [smem:[#allocation11]] (%p4621_p4), %s2813_s19  ;;  %s166_s30 = sshll.u32 %s147_s29, 4  ;;  %s167_s30 = int_to_ptr.vmem [resolvable:$true] %s166_s30 }
  0x38   : > { %s2546_s24 = scalar_select %p4621_p4, [#allocation0], [#allocation14] }
  0x39   : > { %2548 = sst [smem:[#allocation11 + $0x1]] (%p4621_p4), %s2814_s4  ;;  %s2815_s5 = smov 49  }
  0x3a   : > { %s158_s28 = sld [smem:[%s2546_s24]]   ;;  %s2816_s6 = smov 128  }
  0x3b   : > { %2549 = sst [smem:[#allocation11 + $0x2]] (%p4621_p4), %s2815_s5  ;;  %s2817_s7 = smov 8  }
  0x3c   : > { %2550 = sst [smem:[#allocation11 + $0x3]] (%p4621_p4), %s2816_s6  ;;  %s144_s10 = scalar_lea.sflag [#allocation4], %s2926_s11 }
  0x3d   : > { %2551 = sst [smem:[#allocation11 + $0x4]] (%p4621_p4), %s2816_s6  ;;  %s2818_s18 = smov [#allocation10]  }
  0x3e   : > { %2552 = sst [smem:[#allocation11 + $0x5]] (%p4621_p4), %s2817_s7 }
  0x40   : > { %s2083_s8 = sshll.u32 %s158_s28, 26 }
  0x41   : > { %s2084_s9 = sadd.s32 134217728, %s2083_s8 }
  0x42   : > { %2553 = dma.general (%p4621_p4), %s153_s27, 12544, %s167_s30, %s144_s10, %s2818_s18, [#allocation11], %s2084_s9, 0  }
  0x43   : > { %s189_s19 = sand.u32 1, %s2810_s15   ;;  %s2541_s24 = smul.u32 1960, %s2926_s11 }
  0x44   : > { %s2554_s25 = scalar_select %p4621_p4, [#allocation0], [#allocation15] }
  0x45   : > { %s199_s28 = scalar_lea.hbm %s4494_s1, %s2538_s12  ;;  %s2819_s4 = smov 12544  }
  0x46   : > { %2555 = sst [smem:[#allocation13]] (%p4621_p4), %s2819_s4  ;;  %s193_s30 = scalar_lea.vmem [#allocation6], %s2541_s24 }
  0x47   : > { %s204_s27 = sld [smem:[%s2554_s25]]   ;;  %s212_s5 = sshll.u32 %s193_s30, 4  ;;  %s213_s5 = int_to_ptr.vmem [resolvable:$true] %s212_s5 }
  0x48   : > { %s2820_s6 = smov 6272   ;;  %s2821_s15 = smov 49  }
  0x49   : > { %2556 = sst [smem:[#allocation13 + $0x1]] (%p4621_p4), %s2820_s6  ;;  %s2822_s11 = smov 128  }
  0x4a   : > { %2557 = sst [smem:[#allocation13 + $0x2]] (%p4621_p4), %s2821_s15  ;;  %s2823_s7 = smov 8  }
  0x4b   : > { %2558 = sst [smem:[#allocation13 + $0x3]] (%p4621_p4), %s2822_s11  ;;  %s190_s9 = scalar_lea.sflag [#allocation7], %s189_s19 }
  0x4c   : > { %2559 = sst [smem:[#allocation13 + $0x4]] (%p4621_p4), %s2822_s11  ;;  %s2824_s10 = smov [#allocation12]  }
  0x4d   : > { %s2086_s12 = sshll.u32 %s204_s27, 26  ;;  %2560 = sst [smem:[#allocation13 + $0x5]] (%p4621_p4), %s2823_s7 }
  0x4e   : > { %s2087_s8 = sadd.s32 134217728, %s2086_s12 }
  0x4f   : > { %2561 = dma.general (%p4621_p4), %s199_s28, 31360, %s213_s5, %s190_s9, %s2824_s10, [#allocation13], %s2087_s8, 0  }
  0x50 PF: > { %p4622_p5 = scmp.ne.s32.totalorder %s4619_s23, 0 }
  0x52   : > { %237 = sbr.rel (%p4622_p5) target bundleno = 766 (0x2fe), region = 32 }
  0x59   : > { %s239_s18 = sand.u32 1, %s2802_s13   ;;  %p4623_p8 = scmp.ne.s32.totalorder %s4618_s22, 0 }
  0x5a   : > { %s2542_s24 = smul.u32 784, %s239_s18  ;;  %s240_s25 = scalar_lea.sflag [#allocation4], %s239_s18 }
  0x5c   : > { %s2974_s26 = scalar_lea.vmem [#allocation3], %s2542_s24 }
  0x5d   : > { %2781 = dma.done.wait (%p4623_p8), %s240_s25, 12544  }
  0x5e   : > { %2783 = vsyncadd (%p4623_p8), %s240_s25, 4294954752  ;;  %s248_s21 = sand.u32 1, %s2867_s16   ;;  %s2543_s19 = smul.u32 1960, %s239_s18 }
  0x5f   : > { %s249_s29 = scalar_lea.sflag [#allocation7], %s248_s21 }
  0x60   : > { %s2981_s28 = scalar_lea.vmem [#allocation6], %s2543_s19 }
  0x61   : > { %2785 = dma.done.wait (%p4623_p8), %s249_s29, 31360  }
  0x62   : > { %2787 = vsyncadd (%p4623_p8), %s249_s29, 4294935936  ;;  %p4624_p9 = scmp.eq.s32.totalorder %s2867_s16, 0 }
  0x64   : > { %2789 = dma.done.wait (%p4624_p9), [#allocation7], 16   ;;  %p4625_p10 = pmov %p4624_p9 }
  0x65   : > { %p4626_p12 = scmp.ne.s32.totalorder %s2867_s16, 0 }
  0x66   : > { %2791 = vsyncadd (%p4625_p10), [#allocation7], 4294967280  ;;  %v2825_v0 = vmov (!%p4626_p12), 0.0  }
  0x67   : > { %284 = sbr.rel (%p4626_p12) target bundleno = 110 (0x6e), region = 48  ;;  %285 = vst [vmem:[#allocation2] sm:$0x1f] (!%p4626_p12), %v2825_v0  ;;  %286 = vst [vmem:[#allocation2 + $0x8] sm:$0x1f] (!%p4626_p12), %v2825_v0 }
  0x6e PF: > { %v2994_v1 = vld [vmem:[%s2974_s26] sm:$0xff]  ;;  %v2997_v2 = vld [vmem:[%s2974_s26 + $0x8] sm:$0xff]  ;;  %v3000_v3 = vld [vmem:[%s2974_s26 + $0x10] sm:$0xff]  ;;  %p2532_p0 = scmp.ne.s32.totalorder %s2867_s16, 1 }
  0x6f   : > { %4627 = vst [vmem:[#allocation20_spill] sm:$0xff] %v2997_v2  ;;  %v3003_v4 = vld [vmem:[%s2974_s26 + $0x18] sm:$0xff]  ;;  %v338_v6 = vld [vmem:[%s2981_s28 + $0x8] sm:$0xff]  ;;  %v339_v7 = vld [vmem:[%s2981_s28 + $0x10] sm:$0xff]  ;;  %vm1947_vm0 = vcmask (!%p2532_p0), 1044480   ;;  %vm1984_vm1 = vcmask (!%p2532_p0), 1041409  }
  0x70   : > { %v337_v5 = vld [vmem:[%s2981_s28] sm:$0xff]  ;;  %v340_v8 = vld [vmem:[%s2981_s28 + $0x18] sm:$0xff]  ;;  %v387_v10 = vmul.f32 %v338_v6, %v2997_v2  ;;  %v388_v11 = vmul.f32 %v339_v7, %v3000_v3  ;;  %v3018_v16 = vld [vmem:[%s2974_s26 + $0x28] sm:$0xff]  ;;  %vm1987_vm2 = vcmask (!%p2532_p0), 33792  }
  0x71   : > { %v386_v9 = vmul.f32 %v337_v5, %v2994_v1  ;;  %v3013_v12 = vld [vmem:[%s2974_s26 + $0x20] sm:$0xff]  ;;  %v389_v14 = vmul.f32 %v340_v8, %v3003_v4  ;;  %4628 = vst [vmem:[#allocation21_spill] sm:$0xff] %v3018_v16  ;;  %v3023_v20 = vld [vmem:[%s2974_s26 + $0x30] sm:$0xff]  ;;  %v3028_v24 = vld [vmem:[%s2974_s26 + $0x38] sm:$0xff] }
  0x72   : > { %v341_v13 = vld [vmem:[%s2981_s28 + $0x20] sm:$0xff]  ;;  %v342_v17 = vld [vmem:[%s2981_s28 + $0x28] sm:$0xff]  ;;  %4629 = vst [vmem:[#allocation22_spill] sm:$0xff] %v3023_v20  ;;  %v343_v21 = vld [vmem:[%s2981_s28 + $0x30] sm:$0xff] }
  0x73   : > { %v435_v15 = vadd.f32 %v387_v10, %v386_v9  ;;  %v390_v18 = vmul.f32 %v341_v13, %v3013_v12  ;;  %v391_v22 = vmul.f32 %v342_v17, %v3018_v16  ;;  %4630 = vst [vmem:[#allocation23_spill] sm:$0xff] %v3028_v24  ;;  %v344_v25 = vld [vmem:[%s2981_s28 + $0x38] sm:$0xff]  ;;  %v392_v26 = vmul.f32 %v343_v21, %v3023_v20  ;;  %v3033_v28 = vld [vmem:[%s2974_s26 + $0x40] sm:$0xff]  ;;  %v3038_v32 = vld [vmem:[%s2974_s26 + $0x48] sm:$0xff] }
  0x74   : > { %4631 = vst [vmem:[#allocation24_spill] sm:$0xff] %v3033_v28  ;;  %v345_v29 = vld [vmem:[%s2981_s28 + $0x40] sm:$0xff]  ;;  %v393_v30 = vmul.f32 %v344_v25, %v3028_v24  ;;  %4632 = vst [vmem:[#allocation25_spill] sm:$0xff] %v3038_v32  ;;  %v346_v33 = vld [vmem:[%s2981_s28 + $0x48] sm:$0xff] }
  0x75   : > { %v436_v19 = vadd.f32 %v435_v15, %v388_v11  ;;  %v394_v34 = vmul.f32 %v345_v29, %v3033_v28  ;;  %v3043_v36 = vld [vmem:[%s2974_s26 + $0x50] sm:$0xff]  ;;  %v3047_v38 = vld [vmem:[%s2974_s26 + $0x58] sm:$0xff]  ;;  %v395_v39 = vmul.f32 %v346_v33, %v3038_v32  ;;  %v2091_v42 = vld [vmem:[%s2981_s28 + $0x188] sm:$0xff] }
  0x76   : > { %v347_v37 = vld [vmem:[%s2981_s28 + $0x50] sm:$0xff]  ;;  %v348_v41 = vld [vmem:[%s2981_s28 + $0x58] sm:$0xff]  ;;  %v2094_v47 = vld [vmem:[%s2981_s28 + $0x1a0] sm:$0xff]  ;;  %v542_v48 = vmul.f32 %v2091_v42, %v2994_v1 }
  0x77   : > { %v437_v23 = vadd.f32 %v436_v19, %v389_v14  ;;  %v2092_v43 = vld [vmem:[%s2981_s28 + $0x190] sm:$0xff]  ;;  %v396_v44 = vmul.f32 %v347_v37, %v3043_v36  ;;  %v2093_v46 = vld [vmem:[%s2981_s28 + $0x198] sm:$0xff]  ;;  %v3059_v50 = vld [vmem:[%s2974_s26 + $0x60] sm:$0xff]  ;;  %v397_v53 = vmul.f32 %v348_v41, %v3047_v38  ;;  %v545_v58 = vmul.f32 %v2094_v47, %v3003_v4 }
  0x78   : > { %v543_v49 = vmul.f32 %v2092_v43, %v2997_v2  ;;  %v349_v51 = vld [vmem:[%s2981_s28 + $0x60] sm:$0xff]  ;;  %v544_v52 = vmul.f32 %v2093_v46, %v3000_v3  ;;  %v2095_v55 = vld [vmem:[%s2981_s28 + $0x1a8] sm:$0xff]  ;;  %v2096_v62 = vld [vmem:[%s2981_s28 + $0x1b0] sm:$0xff] }
  0x79   : > { %v438_v27 = vadd.f32 %v437_v23, %v390_v18  ;;  %v3066_v56 = vld [vmem:[%s2974_s26 + $0x68] sm:$0xff]  ;;  %v398_v60 = vmul.f32 %v349_v51, %v3059_v50  ;;  %v3073_v63 = vld [vmem:[%s2974_s26 + $0x70] sm:$0xff]  ;;  %v546_v5 = vmul.f32 %v2095_v55, %v3013_v12  ;;  %v3080_v10 = vld [vmem:[%s2974_s26 + $0x78] sm:$0xff]  ;;  %v547_v13 = vmul.f32 %v2096_v62, %v3018_v16 }
  0x7a   : > { %v350_v57 = vld [vmem:[%s2981_s28 + $0x68] sm:$0xff]  ;;  %v591_v59 = vadd.f32 %v543_v49, %v542_v48  ;;  %v351_v0 = vld [vmem:[%s2981_s28 + $0x70] sm:$0xff]  ;;  %v2097_v9 = vld [vmem:[%s2981_s28 + $0x1b8] sm:$0xff]  ;;  %4633 = vst [vmem:[#allocation26_spill] sm:$0xff] %v3080_v10 }
  0x7b   : > { %v439_v31 = vadd.f32 %v438_v27, %v391_v22  ;;  %v399_v7 = vmul.f32 %v350_v57, %v3066_v56  ;;  %v352_v11 = vld [vmem:[%s2981_s28 + $0x78] sm:$0xff]  ;;  %v400_v15 = vmul.f32 %v351_v0, %v3073_v63  ;;  %v2098_v18 = vld [vmem:[%s2981_s28 + $0x1c0] sm:$0xff]  ;;  %v548_v22 = vmul.f32 %v2097_v9, %v3023_v20  ;;  %v2099_v27 = vld [vmem:[%s2981_s28 + $0x1c8] sm:$0xff] }
  0x7c   : > { %v592_v6 = vadd.f32 %v591_v59, %v544_v52  ;;  %v3087_v19 = vld [vmem:[%s2974_s26 + $0x80] sm:$0xff]  ;;  %v401_v25 = vmul.f32 %v352_v11, %v3080_v10  ;;  %v3094_v29 = vld [vmem:[%s2974_s26 + $0x88] sm:$0xff]  ;;  %v550_v41 = vmul.f32 %v2099_v27, %v3033_v28  ;;  %v3108_v46 = vld [vmem:[%s2974_s26 + $0x98] sm:$0xff] }
  0x7d   : > { %v440_v35 = vadd.f32 %v439_v31, %v392_v26  ;;  %4634 = vst [vmem:[#allocation27_spill] sm:$0xff] %v3087_v19  ;;  %v353_v21 = vld [vmem:[%s2981_s28 + $0x80] sm:$0xff]  ;;  %4635 = vst [vmem:[#allocation28_spill] sm:$0xff] %v3094_v29  ;;  %v549_v31 = vmul.f32 %v2098_v18, %v3028_v24  ;;  %v2100_v37 = vld [vmem:[%s2981_s28 + $0x1d0] sm:$0xff] }
  0x7e   : > { %v593_v14 = vadd.f32 %v592_v6, %v545_v58  ;;  %4637 = vst [vmem:[#allocation30_spill] sm:$0xff] %v3108_v46  ;;  %v356_v47 = vld [vmem:[%s2981_s28 + $0x98] sm:$0xff]  ;;  %v551_v48 = vmul.f32 %v2100_v37, %v3038_v32  ;;  %v357_v55 = vld [vmem:[%s2981_s28 + $0xa0] sm:$0xff]  ;;  %v3122_v62 = vld [vmem:[%s2974_s26 + $0xa8] sm:$0xff] }
  0x7f   : > { %v441_v40 = vadd.f32 %v440_v35, %v393_v30  ;;  %v354_v30 = vld [vmem:[%s2981_s28 + $0x88] sm:$0xff]  ;;  %v405_v59 = vmul.f32 %v356_v47, %v3108_v46  ;;  %4639 = vst [vmem:[#allocation32_spill] sm:$0xff] %v3122_v62  ;;  %v2104_v9 = vld [vmem:[%s2981_s28 + $0x1f0] sm:$0xff] }
  0x80   : > { %v594_v23 = vadd.f32 %v593_v14, %v546_v5  ;;  %v403_v43 = vmul.f32 %v354_v30, %v3094_v29  ;;  %v358_v0 = vld [vmem:[%s2981_s28 + $0xa8] sm:$0xff]  ;;  %v3129_v11 = vld [vmem:[%s2974_s26 + $0xb0] sm:$0xff] }
  0x81   : > { %v442_v45 = vadd.f32 %v441_v40, %v394_v34  ;;  %v402_v34 = vmul.f32 %v353_v21, %v3087_v19  ;;  %v355_v40 = vld [vmem:[%s2981_s28 + $0x90] sm:$0xff]  ;;  %4640 = vst [vmem:[#allocation33_spill] sm:$0xff] %v3129_v11  ;;  %v2105_v21 = vld [vmem:[%s2981_s28 + $0x1f8] sm:$0xff]  ;;  %v362_v47 = vld [vmem:[%s2981_s28 + $0xc8] sm:$0xff] }
  0x82   : > { %v595_v33 = vadd.f32 %v594_v23, %v547_v13  ;;  %v359_v13 = vld [vmem:[%s2981_s28 + $0xb0] sm:$0xff]  ;;  %v360_v23 = vld [vmem:[%s2981_s28 + $0xb8] sm:$0xff] }
  0x83   : > { %v443_v54 = vadd.f32 %v442_v45, %v395_v39  ;;  %v3101_v39 = vld [vmem:[%s2974_s26 + $0x90] sm:$0xff]  ;;  %v408_v27 = vmul.f32 %v359_v13, %v3129_v11 }
  0x84   : > { %4636 = vst [vmem:[#allocation29_spill] sm:$0xff] %v3101_v39  ;;  %v596_v42 = vadd.f32 %v595_v33, %v548_v22  ;;  %v2101_v45 = vld [vmem:[%s2981_s28 + $0x1d8] sm:$0xff]  ;;  %v404_v51 = vmul.f32 %v355_v40, %v3101_v39  ;;  %v3143_v33 = vld [vmem:[%s2974_s26 + $0xc0] sm:$0xff] }
  0x85   : > { %v444_v61 = vadd.f32 %v443_v54, %v396_v44  ;;  %v3115_v54 = vld [vmem:[%s2974_s26 + $0xa0] sm:$0xff]  ;;  %v552_v57 = vmul.f32 %v2101_v45, %v3043_v36  ;;  %v3136_v22 = vld [vmem:[%s2974_s26 + $0xb8] sm:$0xff]  ;;  %4642 = vst [vmem:[#allocation35_spill] sm:$0xff] %v3143_v33  ;;  %v3152_v45 = vld [vmem:[%s2974_s26 + $0xc8] sm:$0xff] }
  0x86   : > { %v597_v49 = vadd.f32 %v596_v42, %v549_v31  ;;  %4638 = vst [vmem:[#allocation31_spill] sm:$0xff] %v3115_v54  ;;  %4641 = vst [vmem:[#allocation34_spill] sm:$0xff] %v3136_v22  ;;  %v2106_v31 = vld [vmem:[%s2981_s28 + $0x200] sm:$0xff]  ;;  %v409_v40 = vmul.f32 %v360_v23, %v3136_v22  ;;  %v2107_v42 = vld [vmem:[%s2981_s28 + $0x208] sm:$0xff] }
  0x87   : > { %v445_v8 = vadd.f32 %v444_v61, %v397_v53  ;;  %v2102_v53 = vld [vmem:[%s2981_s28 + $0x1e0] sm:$0xff]  ;;  %v2103_v61 = vld [vmem:[%s2981_s28 + $0x1e8] sm:$0xff]  ;;  %4643 = vst [vmem:[#allocation36_spill] sm:$0xff] %v3152_v45  ;;  %v364_v13 = vld [vmem:[%s2981_s28 + $0xd8] sm:$0xff] }
  0x88   : > { %v598_v58 = vadd.f32 %v597_v49, %v550_v41  ;;  %v553_v5 = vmul.f32 %v2102_v53, %v3047_v38  ;;  %v554_v14 = vmul.f32 %v2103_v61, %v3059_v50  ;;  %v2108_v53 = vld [vmem:[%s2981_s28 + $0x210] sm:$0xff] }
  0x89   : > { %v446_v17 = vadd.f32 %v445_v8, %v398_v60 }
  0x8a   : > { %v599_v6 = vadd.f32 %v598_v58, %v551_v48  ;;  %v557_v48 = vmul.f32 %v2106_v31, %v3080_v10  ;;  %v363_v58 = vld [vmem:[%s2981_s28 + $0xd0] sm:$0xff]  ;;  %v365_v31 = vld [vmem:[%s2981_s28 + $0xe0] sm:$0xff] }
  0x8b   : > { %v447_v26 = vadd.f32 %v446_v17, %v399_v7  ;;  %v406_v7 = vmul.f32 %v357_v55, %v3115_v54  ;;  %v407_v17 = vmul.f32 %v358_v0, %v3122_v62  ;;  %v2142_v55 = vld [vmem:[%s2981_s28 + $0x320] sm:$0xff] }
  0x8c   : > { %v2114_v10 = vld [vmem:[%s2981_s28 + $0x240] sm:$0xff] }
  0x8d   : > { %v448_v35 = vadd.f32 %v447_v26, %v400_v15  ;;  %v600_v15 = vadd.f32 %v599_v6, %v552_v57  ;;  %v3160_v57 = vld [vmem:[%s2974_s26 + $0xd0] sm:$0xff] }
  0x8e   : > { %4644 = vst [vmem:[#allocation37_spill] sm:$0xff] %v3160_v57 }
  0x8f   : > { %v449_v44 = vadd.f32 %v448_v35, %v401_v25  ;;  %v555_v25 = vmul.f32 %v2104_v9, %v3066_v56  ;;  %v601_v26 = vadd.f32 %v600_v15, %v553_v5  ;;  %v556_v35 = vmul.f32 %v2105_v21, %v3073_v63  ;;  %v3170_v9 = vld [vmem:[%s2974_s26 + $0xd8] sm:$0xff] }
  0x90   : > { %v411_v5 = vmul.f32 %v362_v47, %v3152_v45  ;;  %4645 = vst [vmem:[#allocation38_spill] sm:$0xff] %v3170_v9  ;;  %v412_v21 = vmul.f32 %v363_v58, %v3160_v57  ;;  %v2145_v47 = vld [vmem:[%s2981_s28 + $0x338] sm:$0xff] }
  0x91   : > { %v450_v52 = vadd.f32 %v449_v44, %v402_v34  ;;  %v361_v34 = vld [vmem:[%s2981_s28 + $0xc0] sm:$0xff]  ;;  %v602_v37 = vadd.f32 %v601_v26, %v554_v14  ;;  %v2141_v44 = vld [vmem:[%s2981_s28 + $0x318] sm:$0xff]  ;;  %v559_v14 = vmul.f32 %v2108_v53, %v3094_v29  ;;  %v2144_v26 = vld [vmem:[%s2981_s28 + $0x330] sm:$0xff] }
  0x92   : > { %v699_v0 = vmul.f32 %v2141_v44, %v2997_v2  ;;  %v2111_v44 = vld [vmem:[%s2981_s28 + $0x228] sm:$0xff]  ;;  %v368_v53 = vld [vmem:[%s2981_s28 + $0xf8] sm:$0xff] }
  0x93   : > { %v451_v60 = vadd.f32 %v450_v52, %v403_v43  ;;  %v2140_v43 = vld [vmem:[%s2981_s28 + $0x310] sm:$0xff]  ;;  %v603_v49 = vadd.f32 %v602_v37, %v555_v25  ;;  %v2110_v25 = vld [vmem:[%s2981_s28 + $0x220] sm:$0xff]  ;;  %v2147_v29 = vld [vmem:[%s2981_s28 + $0x348] sm:$0xff] }
  0x94   : > { %v698_v61 = vmul.f32 %v2140_v43, %v2994_v1 }
  0x95   : > { %v452_v8 = vadd.f32 %v451_v60, %v404_v51  ;;  %v410_v51 = vmul.f32 %v361_v34, %v3143_v33  ;;  %v604_v60 = vadd.f32 %v603_v49, %v556_v35  ;;  %v3200_v49 = vld [vmem:[%s2974_s26 + $0x108] sm:$0xff] }
  0x96   : > { %4651 = vst [vmem:[#allocation44_spill] sm:$0xff] %v3200_v49 }
  0x97   : > { %v453_v18 = vadd.f32 %v452_v8, %v405_v59  ;;  %v558_v59 = vmul.f32 %v2107_v42, %v3087_v19  ;;  %v2143_v8 = vld [vmem:[%s2981_s28 + $0x328] sm:$0xff]  ;;  %v605_v15 = vadd.f32 %v604_v60, %v557_v48  ;;  %v413_v42 = vmul.f32 %v364_v13, %v3170_v9  ;;  %v3233_v19 = vld [vmem:[%s2974_s26 + $0x130] sm:$0xff] }
  0x98   : > { %v701_v37 = vmul.f32 %v2143_v8, %v3003_v4  ;;  %v3197_v48 = vld [vmem:[%s2974_s26 + $0x100] sm:$0xff]  ;;  %v3214_v8 = vld [vmem:[%s2974_s26 + $0x118] sm:$0xff]  ;;  %4656 = vst [vmem:[#allocation49_spill] sm:$0xff] %v3233_v19 }
  0x99   : > { %v454_v30 = vadd.f32 %v453_v18, %v406_v7  ;;  %v2109_v7 = vld [vmem:[%s2981_s28 + $0x218] sm:$0xff]  ;;  %v3176_v18 = vld [vmem:[%s2974_s26 + $0xe0] sm:$0xff]  ;;  %v606_v35 = vadd.f32 %v605_v15, %v558_v59  ;;  %4650 = vst [vmem:[#allocation43_spill] sm:$0xff] %v3197_v48  ;;  %v702_v59 = vmul.f32 %v2144_v26, %v3013_v12  ;;  %4653 = vst [vmem:[#allocation46_spill] sm:$0xff] %v3214_v8 }
  0x9a   : > { %4646 = vst [vmem:[#allocation39_spill] sm:$0xff] %v3176_v18  ;;  %v560_v34 = vmul.f32 %v2109_v7, %v3101_v39  ;;  %v2146_v7 = vld [vmem:[%s2981_s28 + $0x340] sm:$0xff]  ;;  %v370_v15 = vld [vmem:[%s2981_s28 + $0x108] sm:$0xff]  ;;  %v2113_v39 = vld [vmem:[%s2981_s28 + $0x238] sm:$0xff] }
  0x9b   : > { %v455_v41 = vadd.f32 %v454_v30, %v407_v17  ;;  %v700_v17 = vmul.f32 %v2142_v55, %v3000_v3  ;;  %v3185_v30 = vld [vmem:[%s2974_s26 + $0xf0] sm:$0xff]  ;;  %v561_v55 = vmul.f32 %v2110_v25, %v3108_v46  ;;  %v607_v58 = vadd.f32 %v606_v35, %v559_v14  ;;  %v3217_v13 = vld [vmem:[%s2974_s26 + $0x120] sm:$0xff] }
  0x9c   : > { %4648 = vst [vmem:[#allocation41_spill] sm:$0xff] %v3185_v30  ;;  %4654 = vst [vmem:[#allocation47_spill] sm:$0xff] %v3217_v13  ;;  %v369_v14 = vld [vmem:[%s2981_s28 + $0x100] sm:$0xff] }
  0x9d   : > { %v456_v52 = vadd.f32 %v455_v41, %v408_v27  ;;  %v3182_v27 = vld [vmem:[%s2974_s26 + $0xe8] sm:$0xff]  ;;  %v3191_v41 = vld [vmem:[%s2974_s26 + $0xf8] sm:$0xff]  ;;  %v608_v25 = vadd.f32 %v607_v58, %v560_v34  ;;  %v3244_v58 = vld [vmem:[%s2974_s26 + $0x140] sm:$0xff] }
  0x9e   : > { %4647 = vst [vmem:[#allocation40_spill] sm:$0xff] %v3182_v27  ;;  %4649 = vst [vmem:[#allocation42_spill] sm:$0xff] %v3191_v41  ;;  %v3236_v34 = vld [vmem:[%s2974_s26 + $0x138] sm:$0xff] }
  0x9f   : > { %v457_v6 = vadd.f32 %v456_v52, %v409_v40  ;;  %v747_v40 = vadd.f32 %v699_v0, %v698_v61  ;;  %v367_v52 = vld [vmem:[%s2981_s28 + $0xf0] sm:$0xff]  ;;  %v414_v0 = vmul.f32 %v365_v31, %v3176_v18  ;;  %4657 = vst [vmem:[#allocation50_spill] sm:$0xff] %v3236_v34  ;;  %4658 = vst [vmem:[#allocation51_spill] sm:$0xff] %v3244_v58 }
  0xa0   : > { %v3208_v61 = vld [vmem:[%s2974_s26 + $0x110] sm:$0xff]  ;;  %v3225_v31 = vld [vmem:[%s2974_s26 + $0x128] sm:$0xff] }
  0xa1   : > { %v458_v23 = vadd.f32 %v457_v6, %v410_v51  ;;  %v366_v51 = vld [vmem:[%s2981_s28 + $0xe8] sm:$0xff]  ;;  %v748_v60 = vadd.f32 %v747_v40, %v700_v17  ;;  %4652 = vst [vmem:[#allocation45_spill] sm:$0xff] %v3208_v61  ;;  %v2112_v6 = vld [vmem:[%s2981_s28 + $0x230] sm:$0xff]  ;;  %4655 = vst [vmem:[#allocation48_spill] sm:$0xff] %v3225_v31  ;;  %v416_v40 = vmul.f32 %v367_v52, %v3185_v30 }
  0xa2   : > { %v371_v17 = vld [vmem:[%s2981_s28 + $0x110] sm:$0xff]  ;;  %v415_v35 = vmul.f32 %v366_v51, %v3182_v27  ;;  %v563_v51 = vmul.f32 %v2112_v6, %v3122_v62  ;;  %v609_v52 = vadd.f32 %v608_v25, %v561_v55 }
  0xa3   : > { %v459_v43 = vadd.f32 %v458_v23, %v411_v5  ;;  %v562_v23 = vmul.f32 %v2111_v44, %v3115_v54  ;;  %v749_v26 = vadd.f32 %v748_v60, %v701_v37  ;;  %v372_v37 = vld [vmem:[%s2981_s28 + $0x118] sm:$0xff]  ;;  %v373_v44 = vld [vmem:[%s2981_s28 + $0x120] sm:$0xff]  ;;  %v418_v60 = vmul.f32 %v369_v14, %v3197_v48  ;;  %v3256_v55 = vld [vmem:[%s2974_s26 + $0x148] sm:$0xff] }
  0xa4   : > { %v3251_v54 = vmul.f32 %v371_v17, %v3208_v61  ;;  %4659 = vst [vmem:[#allocation52_spill] sm:$0xff] %v3256_v55  ;;  %v375_v6 = vld [vmem:[%s2981_s28 + $0x130] sm:$0xff]  ;;  %v377_v14 = vld [vmem:[%s2981_s28 + $0x140] sm:$0xff]  ;;  %v705_v17 = vmul.f32 %v2147_v29, %v3028_v24  ;;  %v3273_v62 = vmul.f32 %v373_v44, %v3217_v13  ;;  %v378_v29 = vld [vmem:[%s2981_s28 + $0x148] sm:$0xff] }
  0xa5   : > { %v460_v5 = vadd.f32 %v459_v43, %v412_v21  ;;  %v703_v21 = vmul.f32 %v2145_v47, %v3018_v16  ;;  %v417_v43 = vmul.f32 %v368_v53, %v3191_v41  ;;  %v374_v47 = vld [vmem:[%s2981_s28 + $0x128] sm:$0xff]  ;;  %v750_v53 = vadd.f32 %v749_v26, %v702_v59  ;;  %v2148_v41 = vld [vmem:[%s2981_s28 + $0x350] sm:$0xff] }
  0xa6   : > { %v3259_v59 = vld [vmem:[%s2974_s26 + $0x150] sm:$0xff]  ;;  %v610_v25 = vadd.f32 %v609_v52, %v562_v23  ;;  %v3270_v26 = vmul.f32 %v372_v37, %v3214_v8  ;;  %v3276_v61 = vmul.f32 %v374_v47, %v3225_v31  ;;  %v565_v37 = vmul.f32 %v2114_v10, %v3136_v22  ;;  %v3286_v47 = vld [vmem:[%s2974_s26 + $0x160] sm:$0xff] }
  0xa7   : > { %v461_v46 = vadd.f32 %v460_v5, %v413_v42  ;;  %v704_v42 = vmul.f32 %v2146_v7, %v3023_v20  ;;  %v3248_v5 = vmul.f32 %v370_v15, %v3200_v49  ;;  %4660 = vst [vmem:[#allocation53_spill] sm:$0xff] %v3259_v59  ;;  %v376_v7 = vld [vmem:[%s2981_s28 + $0x138] sm:$0xff]  ;;  %v564_v15 = vmul.f32 %v2113_v39, %v3129_v11  ;;  %v2115_v39 = vld [vmem:[%s2981_s28 + $0x248] sm:$0xff]  ;;  %v2116_v10 = vld [vmem:[%s2981_s28 + $0x250] sm:$0xff] }
  0xa8   : > { %v2149_v23 = vld [vmem:[%s2981_s28 + $0x358] sm:$0xff]  ;;  %v706_v44 = vmul.f32 %v2148_v41, %v3033_v28  ;;  %v3295_v31 = vmul.f32 %v377_v14, %v3244_v58  ;;  %v3300_v41 = vld [vmem:[%s2974_s26 + $0x168] sm:$0xff] }
  0xa9   : > { %v462_v16 = vadd.f32 %v461_v46, %v414_v0  ;;  %v751_v46 = vadd.f32 %v750_v53, %v703_v21  ;;  %v3267_v0 = vld [vmem:[%s2974_s26 + $0x158] sm:$0xff]  ;;  %v379_v21 = vld [vmem:[%s2981_s28 + $0x150] sm:$0xff]  ;;  %v611_v53 = vadd.f32 %v610_v25, %v563_v51  ;;  %v707_v22 = vmul.f32 %v2149_v23, %v3038_v32  ;;  %v382_v23 = vld [vmem:[%s2981_s28 + $0x168] sm:$0xff] }
  0xaa   : > { %4661 = vst [vmem:[#allocation54_spill] sm:$0xff] %v3267_v0  ;;  %v380_v52 = vld [vmem:[%s2981_s28 + $0x158] sm:$0xff]  ;;  %v2150_v51 = vld [vmem:[%s2981_s28 + $0x360] sm:$0xff]  ;;  %v3314_v58 = vmul.f32 %v379_v21, %v3259_v59 }
  0xab   : > { %v463_v20 = vadd.f32 %v462_v16, %v415_v35  ;;  %v752_v11 = vadd.f32 %v751_v46, %v704_v42  ;;  %v3289_v16 = vmul.f32 %v375_v6, %v3233_v19  ;;  %v3292_v35 = vmul.f32 %v376_v7, %v3236_v34  ;;  %v381_v42 = vld [vmem:[%s2981_s28 + $0x160] sm:$0xff]  ;;  %v2117_v25 = vld [vmem:[%s2981_s28 + $0x258] sm:$0xff]  ;;  %v2151_v7 = vld [vmem:[%s2981_s28 + $0x368] sm:$0xff] }
  0xac   : > { %v566_v6 = vmul.f32 %v2115_v39, %v3143_v33  ;;  %v612_v46 = vadd.f32 %v611_v53, %v564_v15  ;;  %v3317_v34 = vmul.f32 %v380_v52, %v3267_v0  ;;  %v2189_v15 = vld [vmem:[%s2981_s28 + $0x498] sm:$0xff]  ;;  %v2190_v39 = vld [vmem:[%s2981_s28 + $0x4a0] sm:$0xff]  ;;  %v708_v21 = vmul.f32 %v2150_v51, %v3043_v36  ;;  %v2119_v51 = vld [vmem:[%s2981_s28 + $0x268] sm:$0xff] }
  0xad   : > { %v464_v13 = vadd.f32 %v463_v20, %v416_v40  ;;  %v753_v14 = vadd.f32 %v752_v11, %v705_v17  ;;  %v3308_v20 = vld [vmem:[%s2974_s26 + $0x170] sm:$0xff]  ;;  %v3311_v40 = vmul.f32 %v378_v29, %v3256_v55  ;;  %v2118_v17 = vld [vmem:[%s2981_s28 + $0x260] sm:$0xff]  ;;  %v567_v29 = vmul.f32 %v2116_v10, %v3152_v45  ;;  %v2191_v10 = vld [vmem:[%s2981_s28 + $0x4a8] sm:$0xff] }
  0xae   : > { %4662 = vst [vmem:[#allocation55_spill] sm:$0xff] %v3308_v20  ;;  %4663 = vst [vmem:[#allocation56_spill] sm:$0xff] %v3317_v34  ;;  %v383_v11 = vld [vmem:[%s2981_s28 + $0x170] sm:$0xff]  ;;  %v613_v53 = vadd.f32 %v612_v46, %v565_v37  ;;  %v3327_v59 = vld [vmem:[%s2974_s26 + $0x178] sm:$0xff]  ;;  %v568_v52 = vmul.f32 %v2117_v25, %v3160_v57  ;;  %v709_v0 = vmul.f32 %v2151_v7, %v3047_v38 }
  0xaf   : > { %v465_v19 = vadd.f32 %v464_v13, %v417_v43  ;;  %v754_v33 = vadd.f32 %v753_v14, %v706_v44  ;;  %4664 = vst [vmem:[#allocation57_spill] sm:$0xff] %v3327_v59  ;;  %v3330_v13 = vmul.f32 %v381_v42, %v3286_v47  ;;  %v2152_v34 = vld [vmem:[%s2981_s28 + $0x370] sm:$0xff]  ;;  %v384_v37 = vld [vmem:[%s2981_s28 + $0x178] sm:$0xff]  ;;  %v854_v45 = vmul.f32 %v2189_v15, %v2994_v1 }
  0xb0   : > { %v614_v46 = vadd.f32 %v613_v53, %v566_v6  ;;  %v2153_v44 = vld [vmem:[%s2981_s28 + $0x378] sm:$0xff]  ;;  %v855_v42 = vmul.f32 %v2190_v39, %v2997_v2  ;;  %v3348_v25 = vmul.f32 %v383_v11, %v3308_v20  ;;  %v569_v6 = vmul.f32 %v2118_v17, %v3170_v9  ;;  %v2120_v15 = vld [vmem:[%s2981_s28 + $0x270] sm:$0xff]  ;;  %v2154_v53 = vld [vmem:[%s2981_s28 + $0x380] sm:$0xff] }
  0xb1   : > { %v466_v43 = vadd.f32 %v465_v19, %v418_v60  ;;  %v755_v14 = vadd.f32 %v754_v33, %v707_v22  ;;  %v3342_v19 = vld [vmem:[%s2974_s26 + $0x180] sm:$0xff]  ;;  %v3345_v60 = vmul.f32 %v382_v23, %v3300_v41  ;;  %v2192_v22 = vld [vmem:[%s2981_s28 + $0x4b0] sm:$0xff]  ;;  %v710_v57 = vmul.f32 %v2152_v34, %v3059_v50  ;;  %v2193_v9 = vld [vmem:[%s2981_s28 + $0x4b8] sm:$0xff] }
  0xb2   : > { %v385_v33 = vld [vmem:[%s2981_s28 + $0x180] sm:$0xff]  ;;  %v615_v39 = vadd.f32 %v614_v46, %v567_v29  ;;  %v856_v2 = vmul.f32 %v2191_v10, %v3000_v3  ;;  %v3359_v11 = vmul.f32 %v384_v37, %v3327_v59  ;;  %v570_v17 = vmul.f32 %v2119_v51, %v3176_v18  ;;  %v2121_v29 = vld [vmem:[%s2981_s28 + $0x278] sm:$0xff]  ;;  %v2195_v18 = vld [vmem:[%s2981_s28 + $0x4c8] sm:$0xff] }
  0xb3   : > { %v467_v7 = vadd.f32 %v466_v43, %v3248_v5  ;;  %v756_v23 = vadd.f32 %v755_v14, %v708_v21  ;;  %v711_v43 = vmul.f32 %v2153_v44, %v3066_v56  ;;  %v2122_v46 = vld [vmem:[%s2981_s28 + $0x280] sm:$0xff]  ;;  %v2155_v21 = vld [vmem:[%s2981_s28 + $0x388] sm:$0xff]  ;;  %v857_v10 = vmul.f32 %v2192_v22, %v3003_v4 }
  0xb4   : > { %4665 = vst [vmem:[#allocation58_spill] sm:$0xff] %v3359_v11  ;;  %v616_v34 = vadd.f32 %v615_v39, %v568_v52  ;;  %v903_v37 = vadd.f32 %v855_v42, %v854_v45  ;;  %v3370_v11 = vmul.f32 %v385_v33, %v3342_v19  ;;  %v571_v51 = vmul.f32 %v2120_v15, %v3182_v27  ;;  %v2123_v52 = vld [vmem:[%s2981_s28 + $0x288] sm:$0xff]  ;;  %v2124_v39 = vld [vmem:[%s2981_s28 + $0x290] sm:$0xff] }
  0xb5   : > { %v468_v5 = vadd.f32 %v467_v7, %v3251_v54  ;;  %v757_v14 = vadd.f32 %v756_v23, %v709_v0  ;;  %v712_v44 = vmul.f32 %v2154_v53, %v3073_v63  ;;  %v2194_v7 = vld [vmem:[%s2981_s28 + $0x4c0] sm:$0xff]  ;;  %v2156_v23 = vld [vmem:[%s2981_s28 + $0x390] sm:$0xff]  ;;  %v858_v45 = vmul.f32 %v2193_v9, %v3013_v12 }
  0xb6   : > { %4666 = vst [vmem:[#allocation59_spill] sm:$0xff] %v3370_v11  ;;  %v617_v0 = vadd.f32 %v616_v34, %v569_v6  ;;  %v904_v42 = vadd.f32 %v903_v37, %v856_v2  ;;  %v4668_v27 = vld [vmem:[#allocation26_spill] sm:$0xff]  ;;  %v4669_v9 = vld [vmem:[#allocation21_spill] sm:$0xff] }
  0xb7   : > { %v469_v54 = vadd.f32 %v468_v5, %v3270_v26  ;;  %v758_v22 = vadd.f32 %v757_v14, %v710_v57  ;;  %v572_v26 = vmul.f32 %v2121_v29, %v3185_v30  ;;  %v4667_v5 = vld [vmem:[#allocation42_spill] sm:$0xff]  ;;  %v713_v53 = vmul.f32 %v2155_v21, %v4668_v27 }
  0xb8   : > { %v573_v15 = vmul.f32 %v2122_v46, %v4667_v5  ;;  %v2125_v11 = vld [vmem:[%s2981_s28 + $0x298] sm:$0xff]  ;;  %v2126_v6 = vld [vmem:[%s2981_s28 + $0x2a0] sm:$0xff]  ;;  %v618_v34 = vadd.f32 %v617_v0, %v570_v17  ;;  %v859_v2 = vmul.f32 %v2194_v7, %v4669_v9  ;;  %v905_v37 = vadd.f32 %v904_v42, %v857_v10  ;;  %v2196_v5 = vld [vmem:[%s2981_s28 + $0x4d0] sm:$0xff] }
  0xb9   : > { %v470_v33 = vadd.f32 %v469_v54, %v3273_v62  ;;  %v2157_v57 = vld [vmem:[%s2981_s28 + $0x398] sm:$0xff]  ;;  %v759_v14 = vadd.f32 %v758_v22, %v711_v43  ;;  %v574_v29 = vmul.f32 %v2123_v52, %v3197_v48  ;;  %v575_v46 = vmul.f32 %v2124_v39, %v3200_v49  ;;  %v4670_v54 = vld [vmem:[#allocation27_spill] sm:$0xff] }
  0xba   : > { %v714_v21 = vmul.f32 %v2156_v23, %v4670_v54  ;;  %v2127_v30 = vld [vmem:[%s2981_s28 + $0x2a8] sm:$0xff]  ;;  %v2128_v17 = vld [vmem:[%s2981_s28 + $0x2b0] sm:$0xff]  ;;  %v619_v0 = vadd.f32 %v618_v34, %v571_v51  ;;  %v2158_v43 = vld [vmem:[%s2981_s28 + $0x3a0] sm:$0xff]  ;;  %v906_v42 = vadd.f32 %v905_v37, %v858_v45  ;;  %v3401_v39 = vmul.f32 %v2126_v6, %v3214_v8 }
  0xbb   : > { %v471_v62 = vadd.f32 %v470_v33, %v3276_v61  ;;  %v760_v22 = vadd.f32 %v759_v14, %v712_v44  ;;  %v4671_v7 = vld [vmem:[#allocation22_spill] sm:$0xff]  ;;  %v4672_v33 = vld [vmem:[#allocation45_spill] sm:$0xff]  ;;  %v4673_v23 = vld [vmem:[#allocation28_spill] sm:$0xff]  ;;  %v861_v45 = vmul.f32 %v2196_v5, %v3028_v24 }
  0xbc   : > { %v860_v10 = vmul.f32 %v2195_v18, %v4671_v7  ;;  %v576_v52 = vmul.f32 %v2125_v11, %v4672_v33  ;;  %v715_v49 = vmul.f32 %v2157_v57, %v4673_v23  ;;  %v2197_v48 = vld [vmem:[%s2981_s28 + $0x4d8] sm:$0xff]  ;;  %v2130_v34 = vld [vmem:[%s2981_s28 + $0x2c0] sm:$0xff]  ;;  %v620_v44 = vadd.f32 %v619_v0, %v572_v26  ;;  %v2159_v14 = vld [vmem:[%s2981_s28 + $0x3a8] sm:$0xff] }
  0xbd   : > { %v472_v61 = vadd.f32 %v471_v62, %v3289_v16  ;;  %v2129_v51 = vld [vmem:[%s2981_s28 + $0x2b8] sm:$0xff]  ;;  %v761_v18 = vadd.f32 %v760_v22, %v713_v53  ;;  %v907_v16 = vadd.f32 %v906_v42, %v859_v2  ;;  %v4674_v11 = vld [vmem:[#allocation47_spill] sm:$0xff] }
  0xbe   : > { %v3411_v62 = vmul.f32 %v2127_v30, %v4674_v11  ;;  %v4675_v6 = vld [vmem:[#allocation48_spill] sm:$0xff]  ;;  %v4676_v57 = vld [vmem:[#allocation29_spill] sm:$0xff]  ;;  %v621_v0 = vadd.f32 %v620_v44, %v573_v15 }
  0xbf   : > { %v473_v37 = vadd.f32 %v472_v61, %v3292_v35  ;;  %v3414_v8 = vmul.f32 %v2128_v17, %v4675_v6  ;;  %v716_v33 = vmul.f32 %v2158_v43, %v4676_v57  ;;  %v2198_v7 = vld [vmem:[%s2981_s28 + $0x4e0] sm:$0xff]  ;;  %v2131_v26 = vld [vmem:[%s2981_s28 + $0x2c8] sm:$0xff]  ;;  %v2132_v53 = vld [vmem:[%s2981_s28 + $0x2d0] sm:$0xff]  ;;  %v762_v2 = vadd.f32 %v761_v18, %v714_v21 }
  0xc0   : > { %v2160_v5 = vld [vmem:[%s2981_s28 + $0x3b0] sm:$0xff]  ;;  %v862_v35 = vmul.f32 %v2197_v48, %v3033_v28  ;;  %v908_v22 = vadd.f32 %v907_v16, %v860_v10  ;;  %v4678_v17 = vld [vmem:[#allocation50_spill] sm:$0xff]  ;;  %v622_v44 = vadd.f32 %v621_v0, %v574_v29 }
  0xc1   : > { %v474_v30 = vadd.f32 %v473_v37, %v3295_v31  ;;  %v4677_v42 = vld [vmem:[#allocation49_spill] sm:$0xff]  ;;  %v3427_v6 = vmul.f32 %v2130_v34, %v4678_v17  ;;  %v4679_v43 = vld [vmem:[#allocation30_spill] sm:$0xff]  ;;  %v763_v10 = vadd.f32 %v762_v2, %v715_v49  ;;  %v863_v31 = vmul.f32 %v2198_v7, %v3038_v32  ;;  %v4680_v16 = vld [vmem:[#allocation51_spill] sm:$0xff] }
  0xc2   : > { %v3424_v61 = vmul.f32 %v2129_v51, %v4677_v42  ;;  %v717_v11 = vmul.f32 %v2159_v14, %v4679_v43  ;;  %v2199_v24 = vld [vmem:[%s2981_s28 + $0x4e8] sm:$0xff]  ;;  %v2133_v15 = vld [vmem:[%s2981_s28 + $0x2d8] sm:$0xff]  ;;  %v2134_v21 = vld [vmem:[%s2981_s28 + $0x2e0] sm:$0xff]  ;;  %v909_v18 = vadd.f32 %v908_v22, %v861_v45  ;;  %v3437_v37 = vmul.f32 %v2131_v26, %v4680_v16 }
  0xc3   : > { %v2161_v48 = vld [vmem:[%s2981_s28 + $0x3b8] sm:$0xff]  ;;  %v475_v51 = vadd.f32 %v474_v30, %v3311_v40  ;;  %v3440_v34 = vmul.f32 %v2132_v53, %v3256_v55  ;;  %v4681_v14 = vld [vmem:[#allocation31_spill] sm:$0xff]  ;;  %v623_v0 = vadd.f32 %v622_v44, %v575_v46  ;;  %v764_v45 = vadd.f32 %v763_v10, %v716_v33 }
  0xc4   : > { %v718_v17 = vmul.f32 %v2160_v5, %v4681_v14  ;;  %v2200_v42 = vld [vmem:[%s2981_s28 + $0x4f0] sm:$0xff]  ;;  %v2135_v29 = vld [vmem:[%s2981_s28 + $0x2e8] sm:$0xff]  ;;  %v2162_v7 = vld [vmem:[%s2981_s28 + $0x3c0] sm:$0xff]  ;;  %v864_v40 = vmul.f32 %v2199_v24, %v3043_v36  ;;  %v910_v2 = vadd.f32 %v909_v18, %v862_v35 }
  0xc5   : > { %v2136_v49 = vld [vmem:[%s2981_s28 + $0x2f0] sm:$0xff]  ;;  %v476_v26 = vadd.f32 %v475_v51, %v3314_v58  ;;  %v4683_v53 = vld [vmem:[#allocation54_spill] sm:$0xff]  ;;  %v624_v33 = vadd.f32 %v623_v0, %v576_v52  ;;  %v765_v35 = vadd.f32 %v764_v45, %v717_v11  ;;  %v865_v58 = vmul.f32 %v2200_v42, %v3047_v38 }
  0xc6   : > { %v4682_v22 = vld [vmem:[#allocation53_spill] sm:$0xff]  ;;  %v3453_v55 = vmul.f32 %v2134_v21, %v4683_v53  ;;  %v4684_v5 = vld [vmem:[#allocation32_spill] sm:$0xff]  ;;  %v911_v44 = vadd.f32 %v910_v2, %v863_v31  ;;  %v3463_v21 = vmul.f32 %v2135_v29, %v3286_v47 }
  0xc7   : > { %v3450_v30 = vmul.f32 %v2133_v15, %v4682_v22  ;;  %v719_v16 = vmul.f32 %v2161_v48, %v4684_v5  ;;  %v2201_v32 = vld [vmem:[%s2981_s28 + $0x4f8] sm:$0xff]  ;;  %v2138_v46 = vld [vmem:[%s2981_s28 + $0x300] sm:$0xff]  ;;  %v2163_v24 = vld [vmem:[%s2981_s28 + $0x3c8] sm:$0xff]  ;;  %v3466_v48 = vmul.f32 %v2136_v49, %v3300_v41  ;;  %v625_v0 = vadd.f32 %v624_v33, %v3401_v39 }
  0xc8   : > { %v2137_v28 = vld [vmem:[%s2981_s28 + $0x2f8] sm:$0xff]  ;;  %v2202_v52 = vld [vmem:[%s2981_s28 + $0x500] sm:$0xff]  ;;  %v2164_v11 = vld [vmem:[%s2981_s28 + $0x3d0] sm:$0xff]  ;;  %v766_v45 = vadd.f32 %v765_v35, %v718_v17  ;;  %v866_v38 = vmul.f32 %v2201_v32, %v3059_v50  ;;  %v912_v42 = vadd.f32 %v911_v44, %v864_v40 }
  0xc9   : > { %v4685_v10 = vld [vmem:[#allocation56_spill] sm:$0xff]  ;;  %v4686_v18 = vld [vmem:[#allocation33_spill] sm:$0xff]  ;;  %v3477_v49 = vmul.f32 %v2137_v28, %v3308_v20  ;;  %v626_v35 = vadd.f32 %v625_v0, %v3411_v62  ;;  %v867_v40 = vmul.f32 %v2202_v52, %v3066_v56 }
  0xca   : > { %v477_v15 = vadd.f32 %v476_v26, %v4685_v10  ;;  %v720_v51 = vmul.f32 %v2162_v7, %v4686_v18  ;;  %v2238_v31 = vld [vmem:[%s2981_s28 + $0x620] sm:$0xff]  ;;  %v2239_v29 = vld [vmem:[%s2981_s28 + $0x628] sm:$0xff]  ;;  %v3480_v7 = vmul.f32 %v2138_v46, %v3327_v59  ;;  %v2165_v32 = vld [vmem:[%s2981_s28 + $0x3d8] sm:$0xff]  ;;  %v767_v50 = vadd.f32 %v766_v45, %v719_v16 }
  0xcb   : > { %v4687_v26 = vld [vmem:[#allocation34_spill] sm:$0xff]  ;;  %v913_v44 = vadd.f32 %v912_v42, %v865_v58  ;;  %v4688_v10 = vld [vmem:[#allocation35_spill] sm:$0xff]  ;;  %v4689_v59 = vld [vmem:[#allocation20_spill] sm:$0xff]  ;;  %v627_v62 = vadd.f32 %v626_v35, %v3414_v8 }
  0xcc   : > { %v478_v2 = vadd.f32 %v477_v15, %v3330_v13  ;;  %v721_v39 = vmul.f32 %v2163_v24, %v4687_v26  ;;  %v2203_v33 = vld [vmem:[%s2981_s28 + $0x508] sm:$0xff]  ;;  %v2240_v13 = vld [vmem:[%s2981_s28 + $0x630] sm:$0xff]  ;;  %v722_v46 = vmul.f32 %v2164_v11, %v4688_v10  ;;  %v1010_v24 = vmul.f32 %v2238_v31, %v2994_v1  ;;  %v2166_v0 = vld [vmem:[%s2981_s28 + $0x3e0] sm:$0xff] }
  0xcd   : > { %v2139_v17 = vld [vmem:[%s2981_s28 + $0x308] sm:$0xff]  ;;  %v2204_v15 = vld [vmem:[%s2981_s28 + $0x510] sm:$0xff]  ;;  %v1011_v20 = vmul.f32 %v2239_v29, %v4689_v59  ;;  %v768_v16 = vadd.f32 %v767_v50, %v720_v51  ;;  %v868_v56 = vmul.f32 %v2203_v33, %v3073_v63  ;;  %v914_v58 = vadd.f32 %v913_v44, %v866_v38  ;;  %v2241_v52 = vld [vmem:[%s2981_s28 + $0x638] sm:$0xff] }
  0xce   : > { %v479_v28 = vadd.f32 %v478_v2, %v3345_v60  ;;  %v3500_v11 = vmul.f32 %v2139_v17, %v3342_v19  ;;  %v4690_v45 = vld [vmem:[#allocation36_spill] sm:$0xff]  ;;  %v1012_v59 = vmul.f32 %v2240_v13, %v3000_v3  ;;  %v628_v8 = vadd.f32 %v627_v62, %v3424_v61  ;;  %v2242_v29 = vld [vmem:[%s2981_s28 + $0x640] sm:$0xff] }
  0xcf   : > { %v723_v1 = vmul.f32 %v2165_v32, %v4690_v45  ;;  %v2205_v42 = vld [vmem:[%s2981_s28 + $0x518] sm:$0xff]  ;;  %v2167_v51 = vld [vmem:[%s2981_s28 + $0x3e8] sm:$0xff]  ;;  %v769_v31 = vadd.f32 %v768_v16, %v721_v39  ;;  %v869_v63 = vmul.f32 %v2204_v15, %v4668_v27  ;;  %v915_v38 = vadd.f32 %v914_v58, %v867_v40  ;;  %v2206_v35 = vld [vmem:[%s2981_s28 + $0x520] sm:$0xff] }
  0xd0   : > { %v480_v60 = vadd.f32 %v479_v28, %v3348_v25  ;;  %v4691_v25 = vld [vmem:[#allocation58_spill] sm:$0xff]  ;;  %v4692_v33 = vld [vmem:[#allocation37_spill] sm:$0xff]  ;;  %v1013_v32 = vmul.f32 %v2241_v52, %v3003_v4  ;;  %v1059_v50 = vadd.f32 %v1011_v20, %v1010_v24  ;;  %v629_v3 = vadd.f32 %v628_v8, %v3427_v6  ;;  %v4693_v13 = vld [vmem:[#allocation59_spill] sm:$0xff] }
  0xd1   : > { %v724_v17 = vmul.f32 %v2166_v0, %v4692_v33  ;;  %v2168_v61 = vld [vmem:[%s2981_s28 + $0x3f0] sm:$0xff]  ;;  %v770_v44 = vadd.f32 %v769_v31, %v722_v46  ;;  %v870_v39 = vmul.f32 %v2205_v42, %v4670_v54  ;;  %v916_v27 = vadd.f32 %v915_v38, %v868_v56  ;;  %v2243_v40 = vld [vmem:[%s2981_s28 + $0x648] sm:$0xff]  ;;  %v2169_v6 = vld [vmem:[%s2981_s28 + $0x3f8] sm:$0xff] }
  0xd2   : > { %v481_v2 = vadd.f32 %v480_v60, %v4691_v25  ;;  %v4694_v15 = vld [vmem:[#allocation38_spill] sm:$0xff]  ;;  %v1014_v16 = vmul.f32 %v2242_v29, %v3013_v12  ;;  %v1060_v4 = vadd.f32 %v1059_v50, %v1012_v59  ;;  %v630_v20 = vadd.f32 %v629_v3, %v3437_v37  ;;  %v2244_v56 = vld [vmem:[%s2981_s28 + $0x650] sm:$0xff] }
  0xd3   : > { %v725_v62 = vmul.f32 %v2167_v51, %v4694_v15  ;;  %v2207_v0 = vld [vmem:[%s2981_s28 + $0x528] sm:$0xff]  ;;  %v771_v24 = vadd.f32 %v770_v44, %v723_v1  ;;  %v871_v46 = vmul.f32 %v2206_v35, %v4673_v23  ;;  %v917_v54 = vadd.f32 %v916_v27, %v869_v63  ;;  %v2208_v42 = vld [vmem:[%s2981_s28 + $0x530] sm:$0xff]  ;;  %v2170_v37 = vld [vmem:[%s2981_s28 + $0x400] sm:$0xff] }
  0xd4   : > { %v482_v28 = vadd.f32 %v481_v2, %v4693_v13  ;;  %v4695_v52 = vld [vmem:[#allocation39_spill] sm:$0xff]  ;;  %v1015_v8 = vmul.f32 %v2243_v40, %v4669_v9  ;;  %v1061_v51 = vadd.f32 %v1060_v4, %v1013_v32  ;;  %v631_v12 = vadd.f32 %v630_v20, %v3440_v34  ;;  %v2245_v31 = vld [vmem:[%s2981_s28 + $0x658] sm:$0xff] }
  0xd5   : > { %v726_v60 = vmul.f32 %v2168_v61, %v4695_v52  ;;  %v772_v59 = vadd.f32 %v771_v24, %v724_v17  ;;  %v872_v1 = vmul.f32 %v2207_v0, %v4676_v57  ;;  %v918_v23 = vadd.f32 %v917_v54, %v870_v39  ;;  %v4696_v38 = vld [vmem:[#allocation40_spill] sm:$0xff]  ;;  %v4697_v2 = vld [vmem:[#allocation22_spill] sm:$0xff]  ;;  %v4698_v44 = vld [vmem:[#allocation41_spill] sm:$0xff] }
  0xd6   : > { %v483_v58 = vrot.slane %v482_v28, 4  ;;  %v727_v29 = vmul.f32 %v2169_v6, %v4696_v38  ;;  %v2209_v25 = vld [vmem:[%s2981_s28 + $0x538] sm:$0xff]  ;;  %v1016_v35 = vmul.f32 %v2244_v56, %v4697_v2  ;;  %v1062_v50 = vadd.f32 %v1061_v51, %v1014_v16  ;;  %v2171_v34 = vld [vmem:[%s2981_s28 + $0x408] sm:$0xff]  ;;  %v2246_v3 = vld [vmem:[%s2981_s28 + $0x660] sm:$0xff] }
  0xd7   : > { %v632_v9 = vadd.f32 %v631_v12, %v3450_v30  ;;  %v773_v32 = vadd.f32 %v772_v59, %v725_v62  ;;  %v873_v17 = vmul.f32 %v2208_v42, %v4679_v43  ;;  %v919_v57 = vadd.f32 %v918_v23, %v871_v46  ;;  %v2210_v27 = vld [vmem:[%s2981_s28 + $0x540] sm:$0xff]  ;;  %v2172_v30 = vld [vmem:[%s2981_s28 + $0x410] sm:$0xff]  ;;  %v2247_v4 = vld [vmem:[%s2981_s28 + $0x668] sm:$0xff] }
  0xd8   : > { %v484_v63 = vadd.f32 %v483_v58, %v482_v28  ;;  %v728_v39 = vmul.f32 %v2170_v37, %v4698_v44  ;;  %v4699_v40 = vld [vmem:[#allocation23_spill] sm:$0xff]  ;;  %v1063_v28 = vadd.f32 %v1062_v50, %v1015_v8  ;;  %v874_v62 = vmul.f32 %v2209_v25, %v4681_v14  ;;  %v4700_v6 = vld [vmem:[#allocation42_spill] sm:$0xff]  ;;  %v4701_v54 = vld [vmem:[#allocation24_spill] sm:$0xff] }
  0xd9   : > { %v1017_v13 = vmul.f32 %v2245_v31, %v4699_v40  ;;  %v633_v0 = vadd.f32 %v632_v9, %v3453_v55  ;;  %v774_v16 = vadd.f32 %v773_v32, %v726_v60  ;;  %v920_v43 = vadd.f32 %v919_v57, %v872_v1  ;;  %v2211_v46 = vld [vmem:[%s2981_s28 + $0x548] sm:$0xff]  ;;  %v2173_v8 = vld [vmem:[%s2981_s28 + $0x418] sm:$0xff]  ;;  %v2248_v14 = vld [vmem:[%s2981_s28 + $0x670] sm:$0xff] }
  0xda   : > { %v485_v61 = vrot.slane %v484_v63, 2  ;;  %v729_v24 = vmul.f32 %v2171_v34, %v4700_v6  ;;  %v1018_v56 = vmul.f32 %v2246_v3, %v4701_v54  ;;  %v1064_v58 = vadd.f32 %v1063_v28, %v1016_v35  ;;  %v4702_v37 = vld [vmem:[#allocation43_spill] sm:$0xff]  ;;  %v4703_v23 = vld [vmem:[#allocation25_spill] sm:$0xff]  ;;  %v4704_v34 = vld [vmem:[#allocation44_spill] sm:$0xff] }
  0xdb   : > { %v634_v42 = vadd.f32 %v633_v0, %v3463_v21  ;;  %v775_v55 = vadd.f32 %v774_v16, %v727_v29  ;;  %v875_v60 = vmul.f32 %v2210_v27, %v4684_v5  ;;  %v921_v51 = vadd.f32 %v920_v43, %v873_v17  ;;  %v2212_v1 = vld [vmem:[%s2981_s28 + $0x550] sm:$0xff]  ;;  %v2174_v21 = vld [vmem:[%s2981_s28 + $0x420] sm:$0xff]  ;;  %v2249_v50 = vld [vmem:[%s2981_s28 + $0x678] sm:$0xff] }
  0xdc   : > { %v486_v20 = vadd.f32 %v485_v61, %v484_v63  ;;  %v730_v59 = vmul.f32 %v2172_v30, %v4702_v37  ;;  %v1019_v31 = vmul.f32 %v2247_v4, %v4703_v23  ;;  %v1065_v63 = vadd.f32 %v1064_v58, %v1017_v13  ;;  %v336_v25 = vld [vmem:[#allocation2] sm:$0x1]  ;;  %v2213_v17 = vld [vmem:[%s2981_s28 + $0x558] sm:$0xff]  ;;  %v2250_v40 = vld [vmem:[%s2981_s28 + $0x680] sm:$0xff] }
  0xdd   : > { %v635_v2 = vadd.f32 %v634_v42, %v3466_v48  ;;  %v776_v35 = vadd.f32 %v775_v55, %v728_v39  ;;  %v876_v29 = vmul.f32 %v2211_v46, %v4686_v18  ;;  %v922_v5 = vadd.f32 %v921_v51, %v874_v62  ;;  %v2175_v61 = vld [vmem:[%s2981_s28 + $0x428] sm:$0xff]  ;;  %v4705_v28 = vld [vmem:[#allocation45_spill] sm:$0xff] }
  0xde   : > { %v487_v12 = vrot.slane %v486_v20, 1  ;;  %v731_v32 = vmul.f32 %v2173_v8, %v4704_v34  ;;  %v1020_v57 = vmul.f32 %v2248_v14, %v3043_v36  ;;  %v1066_v3 = vadd.f32 %v1065_v63, %v1018_v56  ;;  %v2214_v30 = vld [vmem:[%s2981_s28 + $0x560] sm:$0xff]  ;;  %v2176_v43 = vld [vmem:[%s2981_s28 + $0x430] sm:$0xff]  ;;  %v2177_v4 = vld [vmem:[%s2981_s28 + $0x438] sm:$0xff] }
  0xdf   : > { %v636_v48 = vadd.f32 %v635_v2, %v3477_v49  ;;  %v777_v27 = vadd.f32 %v776_v35, %v729_v24  ;;  %v877_v18 = vmul.f32 %v2212_v1, %v4687_v26  ;;  %v923_v39 = vadd.f32 %v922_v5, %v875_v60  ;;  %v2626_v16 = vld [vmem:[%s2974_s26 + $0x58] sm:$0xff]  ;;  %v2251_v46 = vld [vmem:[%s2981_s28 + $0x688] sm:$0xff] }
  0xe0   : > { %v488_v9 = vadd.f32 %v487_v12, %v486_v20  ;;  %v732_v0 = vmul.f32 %v2174_v21, %v4705_v28  ;;  %v1021_v62 = vmul.f32 %v2626_v16, %v2249_v50  ;;  %v1067_v36 = vadd.f32 %v1066_v3, %v1019_v31  ;;  %v4706_v54 = vld [vmem:[#allocation46_spill] sm:$0xff]  ;;  %v4707_v1 = vld [vmem:[#allocation47_spill] sm:$0xff]  ;;  %v4708_v31 = vld [vmem:[#allocation48_spill] sm:$0xff] }
  0xe1   : > { %v637_v49 = vadd.f32 %v636_v48, %v3480_v7  ;;  %v778_v20 = vadd.f32 %v777_v27, %v730_v59  ;;  %v878_v26 = vmul.f32 %v2213_v17, %v4688_v10  ;;  %v924_v24 = vadd.f32 %v923_v39, %v876_v29  ;;  %v2215_v58 = vld [vmem:[%s2981_s28 + $0x568] sm:$0xff]  ;;  %v2178_v60 = vld [vmem:[%s2981_s28 + $0x440] sm:$0xff]  ;;  %v2252_v59 = vld [vmem:[%s2981_s28 + $0x690] sm:$0xff] }
  0xe2   : > { %v489_v13 = vadd.f32 %v488_v9, %v336_v25  ;;  %v733_v56 = vmul.f32 %v2175_v61, %v4706_v54  ;;  %v2627_v42 = vld [vmem:[%s2974_s26 + $0x60] sm:$0xff]  ;;  %v1068_v55 = vadd.f32 %v1067_v36, %v1020_v57  ;;  %v879_v10 = vmul.f32 %v2214_v30, %v4690_v45  ;;  %v2216_v25 = vld [vmem:[%s2981_s28 + $0x570] sm:$0xff]  ;;  %v2181_v5 = vld [vmem:[%s2981_s28 + $0x458] sm:$0xff] }
  0xe3   : > { %v1022_v8 = vmul.f32 %v2627_v42, %v2250_v40  ;;  %v638_v7 = vadd.f32 %v637_v49, %v3500_v11  ;;  %v2179_v51 = vld [vmem:[%s2981_s28 + $0x448] sm:$0xff]  ;;  %v779_v14 = vadd.f32 %v778_v20, %v731_v32  ;;  %v925_v12 = vadd.f32 %v924_v24, %v877_v18  ;;  %v2180_v29 = vld [vmem:[%s2981_s28 + $0x450] sm:$0xff]  ;;  %v2253_v32 = vld [vmem:[%s2981_s28 + $0x698] sm:$0xff] }
  0xe4   : > { %490 = vst [vmem:[#allocation2] sm:$0x1] %v489_v13  ;;  %v734_v23 = vmul.f32 %v2176_v43, %v4707_v1  ;;  %v735_v63 = vmul.f32 %v2177_v4, %v4708_v31  ;;  %v2628_v2 = vld [vmem:[%s2974_s26 + $0x68] sm:$0xff]  ;;  %v1069_v35 = vadd.f32 %v1068_v55, %v1021_v62  ;;  %v880_v45 = vmul.f32 %v2215_v58, %v4692_v33  ;;  %v2217_v61 = vld [vmem:[%s2981_s28 + $0x578] sm:$0xff]  ;;  %v2182_v13 = vld [vmem:[%s2981_s28 + $0x460] sm:$0xff] }
  0xe5   : > { %v1023_v21 = vmul.f32 %v2628_v2, %v2251_v46  ;;  %v639_v11 = vrot.slane %v638_v7, 4  ;;  %v780_v50 = vadd.f32 %v779_v14, %v732_v0  ;;  %v926_v9 = vadd.f32 %v925_v12, %v878_v26  ;;  %v4709_v17 = vld [vmem:[#allocation49_spill] sm:$0xff]  ;;  %v4710_v3 = vld [vmem:[#allocation50_spill] sm:$0xff]  ;;  %v4711_v36 = vld [vmem:[#allocation51_spill] sm:$0xff] }
  0xe6   : > { %v736_v57 = vmul.f32 %v2178_v60, %v4709_v17  ;;  %v737_v48 = vmul.f32 %v2179_v51, %v4710_v3  ;;  %v2629_v27 = vld [vmem:[%s2974_s26 + $0x70] sm:$0xff]  ;;  %v1070_v39 = vadd.f32 %v1069_v35, %v1022_v8  ;;  %v2183_v0 = vld [vmem:[%s2981_s28 + $0x468] sm:$0xff]  ;;  %v881_v33 = vmul.f32 %v2216_v25, %v4694_v15  ;;  %v2254_v62 = vld [vmem:[%s2981_s28 + $0x6a0] sm:$0xff] }
  0xe7   : > { %v1024_v18 = vmul.f32 %v2629_v27, %v2252_v59  ;;  %v640_v40 = vadd.f32 %v639_v11, %v638_v7  ;;  %v781_v30 = vadd.f32 %v780_v50, %v733_v56  ;;  %v927_v16 = vadd.f32 %v926_v9, %v879_v10  ;;  %v4712_v43 = vld [vmem:[#allocation52_spill] sm:$0xff]  ;;  %v2218_v20 = vld [vmem:[%s2981_s28 + $0x580] sm:$0xff] }
  0xe8   : > { %v3600_v49 = vmul.f32 %v2180_v29, %v4711_v36  ;;  %v3603_v4 = vmul.f32 %v2181_v5, %v4712_v43  ;;  %v2255_v26 = vld [vmem:[%s2981_s28 + $0x6a8] sm:$0xff]  ;;  %v2630_v24 = vld [vmem:[%s2974_s26 + $0x78] sm:$0xff]  ;;  %v1071_v56 = vadd.f32 %v1070_v39, %v1023_v21  ;;  %v882_v8 = vmul.f32 %v2217_v61, %v4695_v52  ;;  %v3613_v7 = vld [vmem:[%s2974_s26 + $0x190] sm:$0xff] }
  0xe9   : > { %v1025_v46 = vmul.f32 %v2630_v24, %v2253_v32  ;;  %v3609_v58 = vld [vmem:[%s2974_s26 + $0x188] sm:$0xff]  ;;  %v641_v15 = vrot.slane %v640_v40, 2  ;;  %v782_v42 = vadd.f32 %v781_v30, %v734_v23  ;;  %v928_v55 = vadd.f32 %v927_v16, %v880_v45  ;;  %v1167_v60 = vld [vmem:[%s2981_s28] sm:$0xff]  ;;  %v2257_v3 = vld [vmem:[%s2981_s28 + $0x6b8] sm:$0xff] }
  0xea   : > { %v1168_v51 = vld [vmem:[%s2981_s28 + $0x8] sm:$0xff]  ;;  %v2184_v14 = vld [vmem:[%s2981_s28 + $0x470] sm:$0xff]  ;;  %v3619_v10 = vmul.f32 %v2182_v13, %v4682_v22  ;;  %v3622_v12 = vmul.f32 %v2183_v0, %v4683_v53  ;;  %v1072_v23 = vadd.f32 %v1071_v56, %v1024_v18  ;;  %v883_v2 = vmul.f32 %v2218_v20, %v4696_v38  ;;  %v3629_v11 = vld [vmem:[%s2974_s26 + $0x198] sm:$0xff] }
  0xeb   : > { %v2219_v59 = vld [vmem:[%s2981_s28 + $0x588] sm:$0xff]  ;;  %v642_v31 = vadd.f32 %v641_v15, %v640_v40  ;;  %v783_v25 = vadd.f32 %v782_v42, %v735_v63  ;;  %v929_v21 = vadd.f32 %v928_v55, %v881_v33  ;;  %v2256_v35 = vld [vmem:[%s2981_s28 + $0x6b0] sm:$0xff]  ;;  %4713 = vst [vmem:[#allocation26_spill] sm:$0xff] %v3629_v11  ;;  %v1216_v45 = vmul.f32 %v3609_v58, %v1167_v60  ;;  %v1170_v27 = vld [vmem:[%s2981_s28 + $0x18] sm:$0xff] }
  0xec   : > { %v2631_v1 = vld [vmem:[%s2974_s26 + $0x80] sm:$0xff]  ;;  %v1169_v22 = vld [vmem:[%s2981_s28 + $0x10] sm:$0xff]  ;;  %v1073_v50 = vadd.f32 %v1072_v23, %v1025_v46  ;;  %v1217_v63 = vmul.f32 %v3613_v7, %v1168_v51  ;;  %v884_v38 = vmul.f32 %v2219_v59, %v4698_v44  ;;  %v3643_v39 = vmul.f32 %v2184_v14, %v3286_v47  ;;  %v2221_v40 = vld [vmem:[%s2981_s28 + $0x598] sm:$0xff] }
  0xed   : > { %v1026_v52 = vmul.f32 %v2631_v1, %v2254_v62  ;;  %v2220_v29 = vld [vmem:[%s2981_s28 + $0x590] sm:$0xff]  ;;  %v643_v9 = vrot.slane %v642_v31, 1  ;;  %v784_v32 = vadd.f32 %v783_v25, %v736_v57  ;;  %v930_v17 = vadd.f32 %v929_v21, %v882_v8  ;;  %v3639_v61 = vld [vmem:[%s2974_s26 + $0x1a0] sm:$0xff]  ;;  %v2185_v20 = vld [vmem:[%s2981_s28 + $0x478] sm:$0xff] }
  0xee   : > { %v2632_v53 = vld [vmem:[%s2974_s26 + $0x88] sm:$0xff]  ;;  %4714 = vst [vmem:[#allocation21_spill] sm:$0xff] %v3639_v61  ;;  %v491_v18 = vld [vmem:[#allocation2 + $0x1] sm:$0x1]  ;;  %v1218_v44 = vmul.f32 %v3629_v11, %v1169_v22  ;;  %v885_v16 = vmul.f32 %v2220_v29, %v4700_v6  ;;  %v2258_v36 = vld [vmem:[%s2981_s28 + $0x6c0] sm:$0xff]  ;;  %v1265_v15 = vadd.f32 %v1217_v63, %v1216_v45  ;;  %v886_v8 = vmul.f32 %v2221_v40, %v4702_v37 }
  0xef   : > { %v1027_v5 = vmul.f32 %v2632_v53, %v2255_v26  ;;  %v2633_v13 = vld [vmem:[%s2974_s26 + $0x90] sm:$0xff]  ;;  %v1074_v0 = vadd.f32 %v1073_v50, %v1026_v52  ;;  %v644_v30 = vadd.f32 %v643_v9, %v642_v31  ;;  %v785_v33 = vadd.f32 %v784_v32, %v737_v48  ;;  %v3651_v43 = vld [vmem:[%s2974_s26 + $0x1a8] sm:$0xff]  ;;  %v1171_v47 = vld [vmem:[%s2981_s28 + $0x20] sm:$0xff] }
  0xf0   : > { %v1028_v57 = vmul.f32 %v2633_v13, %v2256_v35  ;;  %v931_v62 = vadd.f32 %v930_v17, %v883_v2  ;;  %v2222_v26 = vld [vmem:[%s2981_s28 + $0x5a0] sm:$0xff]  ;;  %v1219_v48 = vmul.f32 %v3639_v61, %v1170_v27  ;;  %v2259_v60 = vld [vmem:[%s2981_s28 + $0x6c8] sm:$0xff]  ;;  %v3662_v51 = vld [vmem:[%s2974_s26 + $0x1b0] sm:$0xff]  ;;  %v1266_v25 = vadd.f32 %v1265_v15, %v1218_v44 }
  0xf1   : > { %v2634_v24 = vld [vmem:[%s2974_s26 + $0x98] sm:$0xff]  ;;  %v1075_v56 = vadd.f32 %v1074_v0, %v1027_v5  ;;  %v645_v6 = vadd.f32 %v644_v30, %v491_v18  ;;  %v786_v42 = vadd.f32 %v785_v33, %v3600_v49  ;;  %v1172_v14 = vld [vmem:[%s2981_s28 + $0x28] sm:$0xff]  ;;  %v1220_v49 = vmul.f32 %v3651_v43, %v1171_v47  ;;  %v2260_v22 = vld [vmem:[%s2981_s28 + $0x6d0] sm:$0xff] }
  0xf2   : > { %v1029_v46 = vmul.f32 %v2634_v24, %v2257_v3  ;;  %v932_v55 = vadd.f32 %v931_v62, %v884_v38  ;;  %v2186_v59 = vld [vmem:[%s2981_s28 + $0x480] sm:$0xff]  ;;  %v2223_v1 = vld [vmem:[%s2981_s28 + $0x5a8] sm:$0xff]  ;;  %v743_v37 = vmul.f32 %v2185_v20, %v3300_v41  ;;  %v887_v21 = vmul.f32 %v2222_v26, %v4704_v34  ;;  %v1173_v53 = vld [vmem:[%s2981_s28 + $0x30] sm:$0xff] }
  0xf3   : > { %v2635_v52 = vld [vmem:[%s2974_s26 + $0xa0] sm:$0xff]  ;;  %v1076_v31 = vadd.f32 %v1075_v56, %v1028_v57  ;;  %646 = vst [vmem:[#allocation2 + $0x1] sm:$0x1] %v645_v6  ;;  %v787_v2 = vadd.f32 %v786_v42, %v3603_v4  ;;  %v3674_v29 = vld [vmem:[%s2974_s26 + $0x1b8] sm:$0xff]  ;;  %v2224_v50 = vld [vmem:[%s2981_s28 + $0x5b0] sm:$0xff]  ;;  %v1221_v4 = vmul.f32 %v3662_v51, %v1172_v14  ;;  %v1267_v9 = vadd.f32 %v1266_v25, %v1219_v48 }
  0xf4   : > { %v1030_v23 = vmul.f32 %v2635_v52, %v2258_v36  ;;  %v933_v35 = vadd.f32 %v932_v55, %v885_v16  ;;  %v2187_v5 = vld [vmem:[%s2981_s28 + $0x488] sm:$0xff]  ;;  %v888_v17 = vmul.f32 %v2223_v1, %v4705_v28  ;;  %v2261_v27 = vld [vmem:[%s2981_s28 + $0x6d8] sm:$0xff]  ;;  %v2188_v13 = vld [vmem:[%s2981_s28 + $0x490] sm:$0xff]  ;;  %v889_v36 = vmul.f32 %v2224_v50, %v4706_v54 }
  0xf5   : > { %v2636_v45 = vld [vmem:[%s2974_s26 + $0xa8] sm:$0xff]  ;;  %v1077_v41 = vadd.f32 %v1076_v31, %v1029_v46  ;;  %v788_v38 = vadd.f32 %v787_v2, %v3619_v10  ;;  %v3686_v18 = vld [vmem:[%s2974_s26 + $0x1c0] sm:$0xff]  ;;  %v1174_v40 = vld [vmem:[%s2981_s28 + $0x38] sm:$0xff]  ;;  %v1222_v10 = vmul.f32 %v3674_v29, %v1173_v53  ;;  %v1268_v33 = vadd.f32 %v1267_v9, %v1220_v49 }
  0xf6   : > { %v1031_v63 = vmul.f32 %v2636_v45, %v2259_v60  ;;  %v4715_v34 = vld [vmem:[#allocation55_spill] sm:$0xff]  ;;  %v934_v3 = vadd.f32 %v933_v35, %v886_v8  ;;  %v2225_v57 = vld [vmem:[%s2981_s28 + $0x5b8] sm:$0xff]  ;;  %v3706_v54 = vmul.f32 %v2188_v13, %v3342_v19 }
  0xf7   : > { %v744_v32 = vmul.f32 %v2186_v59, %v4715_v34  ;;  %v2637_v0 = vld [vmem:[%s2974_s26 + $0xb0] sm:$0xff]  ;;  %v1078_v30 = vadd.f32 %v1077_v41, %v1030_v23  ;;  %v789_v62 = vadd.f32 %v788_v38, %v3622_v12  ;;  %v2262_v20 = vld [vmem:[%s2981_s28 + $0x6e0] sm:$0xff]  ;;  %v3698_v26 = vld [vmem:[%s2974_s26 + $0x1c8] sm:$0xff]  ;;  %v1223_v12 = vmul.f32 %v3686_v18, %v1174_v40 }
  0xf8   : > { %v1032_v44 = vmul.f32 %v2637_v0, %v2260_v22  ;;  %v4716_v28 = vld [vmem:[#allocation57_spill] sm:$0xff]  ;;  %v935_v47 = vadd.f32 %v934_v3, %v887_v21  ;;  %4717 = vst [vmem:[#allocation27_spill] sm:$0xff] %v3698_v26  ;;  %v2227_v56 = vld [vmem:[%s2981_s28 + $0x5c8] sm:$0xff]  ;;  %v1269_v42 = vadd.f32 %v1268_v33, %v1221_v4 }
  0xf9   : > { %v745_v16 = vmul.f32 %v2187_v5, %v4716_v28  ;;  %v1175_v24 = vld [vmem:[%s2981_s28 + $0x40] sm:$0xff]  ;;  %v1079_v6 = vadd.f32 %v1078_v30, %v1031_v63  ;;  %v790_v8 = vadd.f32 %v789_v62, %v3643_v39  ;;  %v2263_v59 = vld [vmem:[%s2981_s28 + $0x6e8] sm:$0xff]  ;;  %v3715_v1 = vld [vmem:[%s2974_s26 + $0x1d0] sm:$0xff] }
  0xfa   : > { %v2226_v46 = vld [vmem:[%s2981_s28 + $0x5c0] sm:$0xff]  ;;  %v936_v14 = vadd.f32 %v935_v47, %v888_v17  ;;  %4718 = vst [vmem:[#allocation28_spill] sm:$0xff] %v3715_v1  ;;  %v1176_v52 = vld [vmem:[%s2981_s28 + $0x48] sm:$0xff]  ;;  %v2228_v23 = vld [vmem:[%s2981_s28 + $0x5d0] sm:$0xff]  ;;  %v1224_v25 = vmul.f32 %v3698_v26, %v1175_v24  ;;  %v1270_v2 = vadd.f32 %v1269_v42, %v1222_v10 }
  0xfb   : > { %v2638_v48 = vld [vmem:[%s2974_s26 + $0xb8] sm:$0xff]  ;;  %v3710_v55 = vld [vmem:[%s2974_s26 + $0x120] sm:$0xff]  ;;  %v1080_v49 = vadd.f32 %v1079_v6, %v1032_v44  ;;  %v791_v21 = vadd.f32 %v790_v8, %v743_v37  ;;  %v3723_v35 = vld [vmem:[%s2974_s26 + $0x128] sm:$0xff]  ;;  %v1225_v3 = vmul.f32 %v3715_v1, %v1176_v52 }
  0xfc   : > { %v1033_v15 = vmul.f32 %v2638_v48, %v2261_v27  ;;  %v890_v60 = vmul.f32 %v3710_v55, %v2225_v57  ;;  %v2229_v19 = vld [vmem:[%s2981_s28 + $0x5d8] sm:$0xff]  ;;  %v2640_v31 = vld [vmem:[%s2974_s26 + $0xc0] sm:$0xff]  ;;  %v891_v22 = vmul.f32 %v3723_v35, %v2226_v46  ;;  %v937_v50 = vadd.f32 %v936_v14, %v889_v36  ;;  %v2264_v45 = vld [vmem:[%s2981_s28 + $0x6f0] sm:$0xff] }
  0xfd   : > { %v1034_v39 = vmul.f32 %v2640_v31, %v2262_v20  ;;  %v3727_v53 = vld [vmem:[%s2974_s26 + $0x130] sm:$0xff]  ;;  %v3732_v63 = vld [vmem:[%s2974_s26 + $0x1d8] sm:$0xff]  ;;  %v2231_v37 = vld [vmem:[%s2981_s28 + $0x5e8] sm:$0xff]  ;;  %v1271_v27 = vadd.f32 %v1270_v2, %v1223_v12  ;;  %v792_v40 = vadd.f32 %v791_v21, %v744_v32 }
  0xfe   : > { %v892_v5 = vmul.f32 %v3727_v53, %v2227_v56  ;;  %4719 = vst [vmem:[#allocation29_spill] sm:$0xff] %v3732_v63  ;;  %v1177_v41 = vld [vmem:[%s2981_s28 + $0x50] sm:$0xff]  ;;  %v2230_v4 = vld [vmem:[%s2981_s28 + $0x5e0] sm:$0xff]  ;;  %v1081_v17 = vadd.f32 %v1080_v49, %v1033_v15  ;;  %v938_v30 = vadd.f32 %v937_v50, %v890_v60  ;;  %v2265_v10 = vld [vmem:[%s2981_s28 + $0x6f8] sm:$0xff] }
  0xff   : > { %v2643_v9 = vld [vmem:[%s2974_s26 + $0xc8] sm:$0xff]  ;;  %v3740_v13 = vld [vmem:[%s2974_s26 + $0x138] sm:$0xff]  ;;  %v3744_v0 = vld [vmem:[%s2974_s26 + $0x140] sm:$0xff]  ;;  %v1226_v24 = vmul.f32 %v3732_v63, %v1177_v41  ;;  %v1272_v46 = vadd.f32 %v1271_v27, %v1224_v25  ;;  %v793_v56 = vadd.f32 %v792_v40, %v745_v16 }
 0x100   : > { %v1035_v38 = vmul.f32 %v2643_v9, %v2263_v59  ;;  %v893_v57 = vmul.f32 %v3740_v13, %v2228_v23  ;;  %v894_v44 = vmul.f32 %v3744_v0, %v2229_v19  ;;  %v3749_v33 = vld [vmem:[%s2974_s26 + $0x1e0] sm:$0xff]  ;;  %v1178_v28 = vld [vmem:[%s2981_s28 + $0x58] sm:$0xff]  ;;  %v2232_v62 = vld [vmem:[%s2981_s28 + $0x5f0] sm:$0xff]  ;;  %v1082_v20 = vadd.f32 %v1081_v17, %v1034_v39 }
 0x101   : > { %4720 = vst [vmem:[#allocation30_spill] sm:$0xff] %v3749_v33  ;;  %v2233_v32 = vld [vmem:[%s2981_s28 + $0x5f8] sm:$0xff]  ;;  %v3757_v48 = vld [vmem:[%s2974_s26 + $0x148] sm:$0xff]  ;;  %v939_v42 = vadd.f32 %v938_v30, %v891_v22  ;;  %v2266_v8 = vld [vmem:[%s2981_s28 + $0x700] sm:$0xff]  ;;  %v1227_v31 = vmul.f32 %v3749_v33, %v1178_v28  ;;  %v1273_v39 = vadd.f32 %v1272_v46, %v1225_v3  ;;  %v794_v49 = vadd.f32 %v793_v56, %v3706_v54 }
 0x102   : > { %v2646_v36 = vld [vmem:[%s2974_s26 + $0xd0] sm:$0xff]  ;;  %v3760_v15 = vmul.f32 %v3757_v48, %v2230_v4  ;;  %v3770_v60 = vld [vmem:[%s2974_s26 + $0x1e8] sm:$0xff]  ;;  %v1179_v14 = vld [vmem:[%s2981_s28 + $0x60] sm:$0xff]  ;;  %v1083_v19 = vadd.f32 %v1082_v20, %v1035_v38 }
 0x103   : > { %v1036_v47 = vmul.f32 %v2646_v36, %v2264_v45  ;;  %v3763_v6 = vld [vmem:[%s2974_s26 + $0x150] sm:$0xff]  ;;  %4721 = vst [vmem:[#allocation31_spill] sm:$0xff] %v3770_v60  ;;  %v2234_v16 = vld [vmem:[%s2981_s28 + $0x600] sm:$0xff]  ;;  %v2235_v59 = vld [vmem:[%s2981_s28 + $0x608] sm:$0xff]  ;;  %v940_v50 = vadd.f32 %v939_v42, %v892_v5  ;;  %v1228_v27 = vmul.f32 %v3770_v60, %v1179_v14  ;;  %v1274_v40 = vadd.f32 %v1273_v39, %v1226_v24 }
 0x104   : > { %v3766_v12 = vmul.f32 %v3763_v6, %v2231_v37  ;;  %v2649_v52 = vld [vmem:[%s2974_s26 + $0xd8] sm:$0xff]  ;;  %v3785_v21 = vld [vmem:[%s2974_s26 + $0x160] sm:$0xff]  ;;  %v3792_v41 = vld [vmem:[%s2974_s26 + $0x1f0] sm:$0xff]  ;;  %v795_v5 = vrot.slane %v794_v49, 4  ;;  %v3809_v28 = vmul.f32 %v2235_v59, %v4715_v34 }
 0x105   : > { %v1037_v23 = vmul.f32 %v2649_v52, %v2265_v10  ;;  %v3779_v25 = vld [vmem:[%s2974_s26 + $0x158] sm:$0xff]  ;;  %v3788_v22 = vmul.f32 %v3785_v21, %v2233_v32  ;;  %v2267_v45 = vld [vmem:[%s2981_s28 + $0x708] sm:$0xff]  ;;  %4722 = vst [vmem:[#allocation53_spill] sm:$0xff] %v3792_v41  ;;  %v2268_v54 = vld [vmem:[%s2981_s28 + $0x710] sm:$0xff]  ;;  %v1084_v38 = vadd.f32 %v1083_v19, %v1036_v47 }
 0x106   : > { %v3782_v2 = vmul.f32 %v3779_v25, %v2232_v62  ;;  %v1180_v4 = vld [vmem:[%s2981_s28 + $0x68] sm:$0xff]  ;;  %v3798_v17 = vld [vmem:[%s2974_s26 + $0x1f8] sm:$0xff]  ;;  %v1181_v3 = vld [vmem:[%s2981_s28 + $0x70] sm:$0xff]  ;;  %v941_v62 = vadd.f32 %v940_v50, %v893_v57  ;;  %v796_v14 = vadd.f32 %v795_v5, %v794_v49 }
 0x107   : > { %v2652_v37 = vld [vmem:[%s2974_s26 + $0xe0] sm:$0xff]  ;;  %4723 = vst [vmem:[#allocation54_spill] sm:$0xff] %v3798_v17  ;;  %v3803_v30 = vld [vmem:[%s2974_s26 + $0x168] sm:$0xff]  ;;  %v2269_v20 = vld [vmem:[%s2981_s28 + $0x718] sm:$0xff]  ;;  %v1085_v56 = vadd.f32 %v1084_v38, %v1037_v23  ;;  %v1229_v42 = vmul.f32 %v3792_v41, %v1180_v4  ;;  %v1230_v19 = vmul.f32 %v3798_v17, %v1181_v3 }
 0x108   : > { %v1038_v9 = vmul.f32 %v2652_v37, %v2266_v8  ;;  %v3806_v10 = vmul.f32 %v3803_v30, %v2234_v16  ;;  %v2336_v32 = vld [vmem:[%s2981_s28 + $0x188] sm:$0xff]  ;;  %v2337_v36 = vld [vmem:[%s2981_s28 + $0x190] sm:$0xff]  ;;  %v1275_v8 = vadd.f32 %v1274_v40, %v1227_v31  ;;  %v942_v34 = vadd.f32 %v941_v62, %v894_v44  ;;  %v1182_v52 = vld [vmem:[%s2981_s28 + $0x78] sm:$0xff] }
 0x109   : > { %v2236_v47 = vld [vmem:[%s2981_s28 + $0x610] sm:$0xff]  ;;  %v3819_v57 = vld [vmem:[%s2974_s26 + $0x200] sm:$0xff]  ;;  %v2338_v39 = vld [vmem:[%s2981_s28 + $0x198] sm:$0xff]  ;;  %v1371_v44 = vmul.f32 %v2336_v32, %v3609_v58  ;;  %v1372_v4 = vmul.f32 %v2337_v36, %v3613_v7 }
 0x10a   : > { %v2654_v24 = vld [vmem:[%s2974_s26 + $0xe8] sm:$0xff]  ;;  %v2655_v16 = vld [vmem:[%s2974_s26 + $0xf0] sm:$0xff]  ;;  %4724 = vst [vmem:[#allocation32_spill] sm:$0xff] %v3819_v57  ;;  %v2270_v50 = vld [vmem:[%s2981_s28 + $0x720] sm:$0xff]  ;;  %v1086_v23 = vadd.f32 %v1085_v56, %v1038_v9  ;;  %v1276_v49 = vadd.f32 %v1275_v8, %v1228_v27  ;;  %v943_v3 = vadd.f32 %v942_v34, %v3760_v15 }
 0x10b   : > { %v1039_v46 = vmul.f32 %v2654_v24, %v2267_v45  ;;  %v1040_v59 = vmul.f32 %v2655_v16, %v2268_v54  ;;  %v3826_v45 = vld [vmem:[%s2974_s26 + $0x208] sm:$0xff]  ;;  %v1183_v31 = vld [vmem:[%s2981_s28 + $0x80] sm:$0xff]  ;;  %v797_v54 = vrot.slane %v796_v14, 2  ;;  %v3842_v32 = vld [vmem:[%s2974_s26 + $0x210] sm:$0xff]  ;;  %v1231_v24 = vmul.f32 %v3819_v57, %v1182_v52 }
 0x10c   : > { %4725 = vst [vmem:[#allocation56_spill] sm:$0xff] %v3826_v45  ;;  %v3832_v37 = vld [vmem:[%s2974_s26 + $0x178] sm:$0xff]  ;;  %v2271_v27 = vld [vmem:[%s2981_s28 + $0x728] sm:$0xff]  ;;  %4727 = vst [vmem:[#allocation34_spill] sm:$0xff] %v3842_v32  ;;  %v1277_v56 = vadd.f32 %v1276_v49, %v1229_v42  ;;  %v944_v15 = vadd.f32 %v943_v3, %v3766_v12 }
 0x10d   : > { %4726 = vst [vmem:[#allocation33_spill] sm:$0xff] %v3832_v37  ;;  %v3835_v38 = vmul.f32 %v3832_v37, %v2236_v47  ;;  %v2657_v9 = vld [vmem:[%s2974_s26 + $0xf8] sm:$0xff]  ;;  %v1087_v62 = vadd.f32 %v1086_v23, %v1039_v46  ;;  %v1184_v36 = vld [vmem:[%s2981_s28 + $0x88] sm:$0xff]  ;;  %v1373_v47 = vmul.f32 %v2338_v39, %v3629_v11  ;;  %v798_v8 = vadd.f32 %v797_v54, %v796_v14  ;;  %v2272_v46 = vld [vmem:[%s2981_s28 + $0x730] sm:$0xff] }
 0x10e   : > { %v1041_v40 = vmul.f32 %v2657_v9, %v2269_v20  ;;  %v2339_v5 = vld [vmem:[%s2981_s28 + $0x1a0] sm:$0xff]  ;;  %v1232_v20 = vmul.f32 %v3826_v45, %v1183_v31  ;;  %v2340_v9 = vld [vmem:[%s2981_s28 + $0x1a8] sm:$0xff]  ;;  %v1185_v42 = vld [vmem:[%s2981_s28 + $0x90] sm:$0xff]  ;;  %v1278_v52 = vadd.f32 %v1277_v56, %v1230_v19  ;;  %v1420_v39 = vadd.f32 %v1372_v4, %v1371_v44 }
 0x10f   : > { %v2658_v34 = vld [vmem:[%s2974_s26 + $0x100] sm:$0xff]  ;;  %v1088_v23 = vadd.f32 %v1087_v62, %v1040_v59  ;;  %v3853_v37 = vld [vmem:[%s2974_s26 + $0x218] sm:$0xff]  ;;  %v1374_v14 = vmul.f32 %v2339_v5, %v3639_v61  ;;  %v799_v49 = vrot.slane %v798_v8, 1  ;;  %v2659_v31 = vld [vmem:[%s2974_s26 + $0x108] sm:$0xff]  ;;  %v1233_v3 = vmul.f32 %v3842_v32, %v1184_v36 }
 0x110   : > { %v1042_v16 = vmul.f32 %v2658_v34, %v2270_v50  ;;  %v647_v12 = vld [vmem:[#allocation2 + $0x2] sm:$0x1]  ;;  %v945_v50 = vadd.f32 %v944_v15, %v3782_v2  ;;  %v1043_v54 = vmul.f32 %v2659_v31, %v2271_v27  ;;  %v2273_v62 = vld [vmem:[%s2981_s28 + $0x738] sm:$0xff]  ;;  %v1279_v4 = vadd.f32 %v1278_v52, %v1231_v24  ;;  %v3874_v24 = vld [vmem:[%s2974_s26 + $0x228] sm:$0xff] }
 0x111   : > { %v2341_v59 = vld [vmem:[%s2981_s28 + $0x1b0] sm:$0xff]  ;;  %v1089_v34 = vadd.f32 %v1088_v23, %v1041_v40  ;;  %v3863_v19 = vld [vmem:[%s2974_s26 + $0x220] sm:$0xff]  ;;  %v1186_v44 = vld [vmem:[%s2981_s28 + $0x98] sm:$0xff]  ;;  %v1375_v5 = vmul.f32 %v2340_v9, %v3651_v43  ;;  %v1421_v56 = vadd.f32 %v1420_v39, %v1373_v47  ;;  %v800_v61 = vadd.f32 %v799_v49, %v798_v8 }
 0x112   : > { %v2237_v2 = vld [vmem:[%s2981_s28 + $0x618] sm:$0xff]  ;;  %v946_v27 = vadd.f32 %v945_v50, %v3788_v22  ;;  %v1234_v31 = vmul.f32 %v3853_v37, %v1185_v42  ;;  %v2274_v23 = vld [vmem:[%s2981_s28 + $0x740] sm:$0xff]  ;;  %v1280_v47 = vadd.f32 %v1279_v4, %v1232_v20  ;;  %v1376_v8 = vmul.f32 %v2341_v59, %v3662_v51  ;;  %v1188_v20 = vld [vmem:[%s2981_s28 + $0xa8] sm:$0xff] }
 0x113   : > { %v2660_v15 = vld [vmem:[%s2974_s26 + $0x110] sm:$0xff]  ;;  %v1090_v32 = vadd.f32 %v1089_v34, %v1042_v16  ;;  %v1187_v9 = vld [vmem:[%s2981_s28 + $0xa0] sm:$0xff]  ;;  %v1422_v52 = vadd.f32 %v1421_v56, %v1374_v14  ;;  %v801_v22 = vadd.f32 %v800_v61, %v647_v12  ;;  %v1235_v42 = vmul.f32 %v3863_v19, %v1186_v44 }
 0x114   : > { %v1044_v36 = vmul.f32 %v2660_v15, %v2272_v46  ;;  %v2342_v40 = vld [vmem:[%s2981_s28 + $0x1b8] sm:$0xff]  ;;  %v947_v39 = vadd.f32 %v946_v27, %v3806_v10  ;;  %v2343_v50 = vld [vmem:[%s2981_s28 + $0x1c0] sm:$0xff]  ;;  %v2275_v15 = vld [vmem:[%s2981_s28 + $0x748] sm:$0xff]  ;;  %v1281_v59 = vadd.f32 %v1280_v47, %v1233_v3  ;;  %v1046_v44 = vmul.f32 %v3710_v55, %v2274_v23 }
 0x115   : > { %v2661_v46 = vld [vmem:[%s2974_s26 + $0x118] sm:$0xff]  ;;  %v1091_v16 = vadd.f32 %v1090_v32, %v1043_v54  ;;  %v3884_v34 = vld [vmem:[%s2974_s26 + $0x230] sm:$0xff]  ;;  %v1377_v14 = vmul.f32 %v2342_v40, %v3674_v29  ;;  %v1423_v61 = vadd.f32 %v1422_v52, %v1375_v5  ;;  %802 = vst [vmem:[#allocation2 + $0x2] sm:$0x1] %v801_v22  ;;  %v3889_v10 = vld [vmem:[%s2974_s26 + $0x180] sm:$0xff]  ;;  %v1236_v32 = vmul.f32 %v3874_v24, %v1187_v9 }
 0x116   : > { %v1045_v49 = vmul.f32 %v2661_v46, %v2273_v62  ;;  %4728 = vst [vmem:[#allocation35_spill] sm:$0xff] %v3884_v34  ;;  %v902_v12 = vmul.f32 %v3889_v10, %v2237_v2  ;;  %v948_v62 = vadd.f32 %v947_v39, %v3809_v28  ;;  %v2344_v54 = vld [vmem:[%s2981_s28 + $0x1c8] sm:$0xff]  ;;  %v2276_v3 = vld [vmem:[%s2981_s28 + $0x750] sm:$0xff]  ;;  %v3898_v56 = vld [vmem:[%s2974_s26 + $0x238] sm:$0xff]  ;;  %v1282_v27 = vadd.f32 %v1281_v59, %v1234_v31 }
 0x117   : > { %v1092_v4 = vadd.f32 %v1091_v16, %v1044_v36  ;;  %4729 = vst [vmem:[#allocation20_spill] sm:$0xff] %v3898_v56  ;;  %v1189_v5 = vld [vmem:[%s2981_s28 + $0xb0] sm:$0xff]  ;;  %v1378_v40 = vmul.f32 %v2343_v50, %v3686_v18  ;;  %v1424_v2 = vadd.f32 %v1423_v61, %v1376_v8  ;;  %v1047_v55 = vmul.f32 %v3723_v35, %v2275_v15  ;;  %v2277_v47 = vld [vmem:[%s2981_s28 + $0x758] sm:$0xff]  ;;  %v3908_v52 = vld [vmem:[%s2974_s26 + $0x240] sm:$0xff] }
 0x118   : > { %v949_v28 = vadd.f32 %v948_v62, %v3835_v38  ;;  %v1237_v23 = vmul.f32 %v3884_v34, %v1188_v20  ;;  %v2345_v9 = vld [vmem:[%s2981_s28 + $0x1d0] sm:$0xff]  ;;  %4730 = vst [vmem:[#allocation36_spill] sm:$0xff] %v3908_v52  ;;  %v1190_v22 = vld [vmem:[%s2981_s28 + $0xb8] sm:$0xff]  ;;  %v1283_v31 = vadd.f32 %v1282_v27, %v1235_v42  ;;  %v1379_v39 = vmul.f32 %v2344_v54, %v3698_v26  ;;  %v2278_v15 = vld [vmem:[%s2981_s28 + $0x760] sm:$0xff] }
 0x119   : > { %v1093_v36 = vadd.f32 %v1092_v4, %v1045_v49  ;;  %v1425_v8 = vadd.f32 %v1424_v2, %v1377_v14  ;;  %v1048_v35 = vmul.f32 %v3727_v53, %v2276_v3  ;;  %v1238_v38 = vmul.f32 %v3898_v56, %v1189_v5  ;;  %v2346_v50 = vld [vmem:[%s2981_s28 + $0x1d8] sm:$0xff]  ;;  %v3917_v16 = vld [vmem:[%s2974_s26 + $0x248] sm:$0xff]  ;;  %v1191_v20 = vld [vmem:[%s2981_s28 + $0xc0] sm:$0xff] }
 0x11a   : > { %v950_v46 = vadd.f32 %v949_v28, %v902_v12  ;;  %4731 = vst [vmem:[#allocation58_spill] sm:$0xff] %v3917_v16  ;;  %v1284_v59 = vadd.f32 %v1283_v31, %v1236_v32  ;;  %v1380_v42 = vmul.f32 %v2345_v9, %v3715_v1  ;;  %v2279_v12 = vld [vmem:[%s2981_s28 + $0x768] sm:$0xff]  ;;  %v1049_v53 = vmul.f32 %v3740_v13, %v2277_v47  ;;  %v2347_v54 = vld [vmem:[%s2981_s28 + $0x1e0] sm:$0xff]  ;;  %v3927_v4 = vld [vmem:[%s2974_s26 + $0x250] sm:$0xff] }
 0x11b   : > { %v1094_v49 = vadd.f32 %v1093_v36, %v1046_v44  ;;  %v1426_v14 = vadd.f32 %v1425_v8, %v1378_v40  ;;  %v1239_v62 = vmul.f32 %v3908_v52, %v1190_v22  ;;  %v2280_v44 = vld [vmem:[%s2981_s28 + $0x770] sm:$0xff]  ;;  %4732 = vst [vmem:[#allocation37_spill] sm:$0xff] %v3927_v4  ;;  %v1192_v32 = vld [vmem:[%s2981_s28 + $0xc8] sm:$0xff]  ;;  %v1381_v27 = vmul.f32 %v2346_v50, %v3732_v63  ;;  %v2281_v28 = vld [vmem:[%s2981_s28 + $0x778] sm:$0xff] }
 0x11c   : > { %v951_v61 = vrot.slane %v950_v46, 4  ;;  %v1285_v5 = vadd.f32 %v1284_v59, %v1237_v23  ;;  %v1050_v13 = vmul.f32 %v3744_v0, %v2278_v15  ;;  %v1240_v9 = vmul.f32 %v3917_v16, %v1191_v20  ;;  %v2348_v47 = vld [vmem:[%s2981_s28 + $0x1e8] sm:$0xff]  ;;  %v2282_v36 = vld [vmem:[%s2981_s28 + $0x780] sm:$0xff]  ;;  %v1193_v31 = vld [vmem:[%s2981_s28 + $0xd0] sm:$0xff] }
 0x11d   : > { %v1095_v3 = vadd.f32 %v1094_v49, %v1047_v55  ;;  %v1427_v40 = vadd.f32 %v1426_v14, %v1379_v39  ;;  %v3937_v22 = vld [vmem:[%s2974_s26 + $0x258] sm:$0xff]  ;;  %v1382_v39 = vmul.f32 %v2347_v54, %v3749_v33  ;;  %v1051_v50 = vmul.f32 %v3757_v48, %v2279_v12  ;;  %v3944_v15 = vld [vmem:[%s2974_s26 + $0x260] sm:$0xff]  ;;  %v2385_v54 = vld [vmem:[%s2981_s28 + $0x310] sm:$0xff] }
 0x11e   : > { %v952_v2 = vadd.f32 %v951_v61, %v950_v46  ;;  %4733 = vst [vmem:[#allocation59_spill] sm:$0xff] %v3937_v22  ;;  %v1286_v23 = vadd.f32 %v1285_v5, %v1238_v38  ;;  %v1052_v0 = vmul.f32 %v3763_v6, %v2280_v44  ;;  %4734 = vst [vmem:[#allocation38_spill] sm:$0xff] %v3944_v15  ;;  %v1194_v59 = vld [vmem:[%s2981_s28 + $0xd8] sm:$0xff]  ;;  %v2283_v6 = vld [vmem:[%s2981_s28 + $0x788] sm:$0xff] }
 0x11f   : > { %v1096_v55 = vadd.f32 %v1095_v3, %v1048_v35  ;;  %v1428_v8 = vadd.f32 %v1427_v40, %v1380_v42  ;;  %v1241_v49 = vmul.f32 %v3927_v4, %v1192_v32  ;;  %v2349_v35 = vld [vmem:[%s2981_s28 + $0x1f0] sm:$0xff]  ;;  %v2350_v14 = vld [vmem:[%s2981_s28 + $0x1f8] sm:$0xff]  ;;  %v1383_v42 = vmul.f32 %v2348_v47, %v3770_v60 }
 0x120   : > { %v953_v46 = vrot.slane %v952_v2, 2  ;;  %v1287_v38 = vadd.f32 %v1286_v23, %v1239_v62  ;;  %v1053_v12 = vmul.f32 %v3779_v25, %v2281_v28  ;;  %v1054_v44 = vmul.f32 %v3785_v21, %v2282_v36  ;;  %v2386_v32 = vld [vmem:[%s2981_s28 + $0x318] sm:$0xff]  ;;  %v3958_v5 = vld [vmem:[%s2974_s26 + $0x268] sm:$0xff]  ;;  %v1195_v62 = vld [vmem:[%s2981_s28 + $0xe0] sm:$0xff] }
 0x121   : > { %v1097_v20 = vadd.f32 %v1096_v55, %v1049_v53  ;;  %v1429_v61 = vadd.f32 %v1428_v8, %v1381_v27  ;;  %v1242_v3 = vmul.f32 %v3937_v22, %v1193_v31  ;;  %v2351_v27 = vld [vmem:[%s2981_s28 + $0x200] sm:$0xff]  ;;  %v803_v25 = vld [vmem:[#allocation2 + $0x3] sm:$0x1]  ;;  %v1243_v36 = vmul.f32 %v3944_v15, %v1194_v59 }
 0x122   : > { %v954_v48 = vadd.f32 %v953_v46, %v952_v2  ;;  %v1288_v40 = vadd.f32 %v1287_v38, %v1240_v9  ;;  %v1384_v2 = vmul.f32 %v2349_v35, %v3792_v41  ;;  %v3964_v21 = vld [vmem:[%s2974_s26 + $0x270] sm:$0xff]  ;;  %v2387_v55 = vld [vmem:[%s2981_s28 + $0x320] sm:$0xff]  ;;  %v1526_v31 = vmul.f32 %v2385_v54, %v3609_v58  ;;  %v1196_v23 = vld [vmem:[%s2981_s28 + $0xe8] sm:$0xff] }
 0x123   : > { %v1098_v53 = vadd.f32 %v1097_v20, %v1050_v13  ;;  %v1430_v47 = vadd.f32 %v1429_v61, %v1382_v39  ;;  %v1385_v13 = vmul.f32 %v2350_v14, %v3798_v17  ;;  %v2352_v39 = vld [vmem:[%s2981_s28 + $0x208] sm:$0xff]  ;;  %v1527_v20 = vmul.f32 %v2386_v32, %v3613_v7  ;;  %v2284_v59 = vld [vmem:[%s2981_s28 + $0x790] sm:$0xff]  ;;  %v3977_v61 = vld [vmem:[%s2974_s26 + $0x278] sm:$0xff] }
 0x124   : > { %v955_v28 = vrot.slane %v954_v48, 1  ;;  %v1289_v8 = vadd.f32 %v1288_v40, %v1241_v49  ;;  %v2388_v35 = vld [vmem:[%s2981_s28 + $0x328] sm:$0xff]  ;;  %v1055_v14 = vmul.f32 %v3803_v30, %v2283_v6  ;;  %v1244_v58 = vmul.f32 %v3958_v5, %v1195_v62  ;;  %v1197_v54 = vld [vmem:[%s2981_s28 + $0xf0] sm:$0xff]  ;;  %v2285_v6 = vld [vmem:[%s2981_s28 + $0x798] sm:$0xff] }
 0x125   : > { %v1099_v9 = vadd.f32 %v1098_v53, %v1051_v50  ;;  %v1431_v46 = vadd.f32 %v1430_v47, %v1383_v42  ;;  %v1386_v50 = vmul.f32 %v2351_v27, %v3819_v57  ;;  %v2353_v53 = vld [vmem:[%s2981_s28 + $0x210] sm:$0xff]  ;;  %v3987_v47 = vld [vmem:[%s2974_s26 + $0x280] sm:$0xff]  ;;  %v1245_v62 = vmul.f32 %v3964_v21, %v1196_v23 }
 0x126   : > { %v956_v38 = vadd.f32 %v955_v28, %v954_v48  ;;  %v1290_v42 = vadd.f32 %v1289_v8, %v1242_v3  ;;  %v2389_v32 = vld [vmem:[%s2981_s28 + $0x330] sm:$0xff]  ;;  %v1528_v48 = vmul.f32 %v2387_v55, %v3629_v11  ;;  %v2354_v8 = vld [vmem:[%s2981_s28 + $0x218] sm:$0xff] }
 0x127   : > { %v1100_v49 = vadd.f32 %v1099_v9, %v1052_v0  ;;  %v1432_v40 = vadd.f32 %v1431_v46, %v1384_v2  ;;  %v1387_v0 = vmul.f32 %v2352_v39, %v3826_v45  ;;  %v4735_v27 = vld [vmem:[#allocation21_spill] sm:$0xff]  ;;  %v1246_v39 = vmul.f32 %v3977_v61, %v1197_v54 }
 0x128   : > { %v957_v30 = vadd.f32 %v956_v38, %v803_v25  ;;  %v1529_v28 = vmul.f32 %v2388_v35, %v4735_v27  ;;  %v1198_v9 = vld [vmem:[%s2981_s28 + $0xf8] sm:$0xff]  ;;  %v1291_v2 = vadd.f32 %v1290_v42, %v1243_v36  ;;  %v1575_v25 = vadd.f32 %v1527_v20, %v1526_v31  ;;  %v2286_v38 = vld [vmem:[%s2981_s28 + $0x7a0] sm:$0xff]  ;;  %v3998_v23 = vld [vmem:[%s2974_s26 + $0x288] sm:$0xff] }
 0x129   : > { %v1101_v3 = vadd.f32 %v1100_v49, %v1053_v12  ;;  %v1433_v46 = vadd.f32 %v1432_v40, %v1385_v13  ;;  %v2390_v55 = vld [vmem:[%s2981_s28 + $0x338] sm:$0xff]  ;;  %v1530_v36 = vmul.f32 %v2389_v32, %v3651_v43  ;;  %v1199_v13 = vld [vmem:[%s2981_s28 + $0x100] sm:$0xff]  ;;  %v1247_v54 = vmul.f32 %v3987_v47, %v1198_v9 }
 0x12a   : > { %958 = vst [vmem:[#allocation2 + $0x3] sm:$0x1] %v957_v30  ;;  %v2663_v11 = vld [vmem:[%s2974_s26 + $0x170] sm:$0xff]  ;;  %v1292_v42 = vadd.f32 %v1291_v2, %v1244_v58  ;;  %v2355_v31 = vld [vmem:[%s2981_s28 + $0x220] sm:$0xff]  ;;  %v1576_v30 = vadd.f32 %v1575_v25, %v1528_v48  ;;  %v1531_v32 = vmul.f32 %v2390_v55, %v3662_v51  ;;  %v2392_v48 = vld [vmem:[%s2981_s28 + $0x348] sm:$0xff]  ;;  %v1248_v9 = vmul.f32 %v3998_v23, %v1199_v13 }
 0x12b   : > { %v1056_v57 = vmul.f32 %v2663_v11, %v2284_v59  ;;  %v4736_v35 = vld [vmem:[#allocation34_spill] sm:$0xff]  ;;  %v1102_v49 = vadd.f32 %v1101_v3, %v1054_v44  ;;  %v1434_v20 = vadd.f32 %v1433_v46, %v1386_v50  ;;  %v4737_v11 = vld [vmem:[#allocation33_spill] sm:$0xff] }
 0x12c   : > { %v1388_v12 = vmul.f32 %v2353_v53, %v4736_v35  ;;  %v2391_v40 = vld [vmem:[%s2981_s28 + $0x340] sm:$0xff]  ;;  %v1057_v59 = vmul.f32 %v4737_v11, %v2285_v6  ;;  %v4008_v45 = vld [vmem:[%s2974_s26 + $0x290] sm:$0xff]  ;;  %v1389_v53 = vmul.f32 %v2354_v8, %v3853_v37  ;;  %v1200_v3 = vld [vmem:[%s2981_s28 + $0x108] sm:$0xff]  ;;  %v1293_v58 = vadd.f32 %v1292_v42, %v1245_v62 }
 0x12d   : > { %v1103_v44 = vadd.f32 %v1102_v49, %v1055_v14  ;;  %v2356_v50 = vld [vmem:[%s2981_s28 + $0x228] sm:$0xff]  ;;  %v1435_v2 = vadd.f32 %v1434_v20, %v1387_v0  ;;  %v1577_v46 = vadd.f32 %v1576_v30, %v1529_v28  ;;  %v1058_v6 = vmul.f32 %v3889_v10, %v2286_v38  ;;  %v4018_v25 = vld [vmem:[%s2974_s26 + $0x298] sm:$0xff]  ;;  %v1201_v62 = vld [vmem:[%s2981_s28 + $0x110] sm:$0xff] }
 0x12e   : > { %v1390_v8 = vmul.f32 %v2355_v31, %v3863_v19  ;;  %v1532_v14 = vmul.f32 %v2391_v40, %v3674_v29  ;;  %v1294_v49 = vadd.f32 %v1293_v58, %v1246_v39  ;;  %v2357_v0 = vld [vmem:[%s2981_s28 + $0x230] sm:$0xff]  ;;  %v4027_v10 = vld [vmem:[%s2974_s26 + $0x2a0] sm:$0xff]  ;;  %v1249_v38 = vmul.f32 %v4008_v45, %v1200_v3  ;;  %v2358_v39 = vld [vmem:[%s2981_s28 + $0x238] sm:$0xff] }
 0x12f   : > { %v1104_v55 = vadd.f32 %v1103_v44, %v1056_v57  ;;  %v1436_v42 = vadd.f32 %v1435_v2, %v1388_v12  ;;  %v2393_v28 = vld [vmem:[%s2981_s28 + $0x350] sm:$0xff]  ;;  %v1578_v20 = vadd.f32 %v1577_v46, %v1530_v36  ;;  %v1391_v13 = vmul.f32 %v2356_v50, %v3874_v24  ;;  %v1202_v57 = vld [vmem:[%s2981_s28 + $0x118] sm:$0xff]  ;;  %v1203_v2 = vld [vmem:[%s2981_s28 + $0x120] sm:$0xff] }
 0x130   : > { %v1533_v31 = vmul.f32 %v2392_v48, %v3686_v18  ;;  %v1295_v30 = vadd.f32 %v1294_v49, %v1247_v54  ;;  %v2394_v36 = vld [vmem:[%s2981_s28 + $0x358] sm:$0xff]  ;;  %v4036_v44 = vld [vmem:[%s2974_s26 + $0x2a8] sm:$0xff]  ;;  %v1250_v3 = vmul.f32 %v4018_v25, %v1201_v62  ;;  %v1392_v58 = vmul.f32 %v2357_v0, %v3884_v34  ;;  %v2359_v48 = vld [vmem:[%s2981_s28 + $0x240] sm:$0xff] }
 0x131   : > { %v1105_v40 = vadd.f32 %v1104_v55, %v1057_v59  ;;  %v1437_v12 = vadd.f32 %v1436_v42, %v1389_v53  ;;  %v1579_v11 = vadd.f32 %v1578_v20, %v1531_v32  ;;  %v1534_v50 = vmul.f32 %v2393_v28, %v3698_v26  ;;  %v2395_v53 = vld [vmem:[%s2981_s28 + $0x360] sm:$0xff]  ;;  %v4045_v55 = vld [vmem:[%s2974_s26 + $0x2b0] sm:$0xff]  ;;  %v1204_v49 = vld [vmem:[%s2981_s28 + $0x128] sm:$0xff] }
 0x132   : > { %v1296_v54 = vadd.f32 %v1295_v30, %v1248_v9  ;;  %v4048_v62 = vld [vmem:[%s2974_s26 + $0x2b8] sm:$0xff]  ;;  %v1251_v0 = vmul.f32 %v4027_v10, %v1202_v57  ;;  %v1535_v9 = vmul.f32 %v2394_v36, %v3715_v1  ;;  %v2360_v20 = vld [vmem:[%s2981_s28 + $0x248] sm:$0xff]  ;;  %v1394_v36 = vmul.f32 %v2359_v48, %v3908_v52  ;;  %v4071_v34 = vld [vmem:[%s2974_s26 + $0x2d0] sm:$0xff] }
 0x133   : > { %v1106_v59 = vadd.f32 %v1105_v40, %v1058_v6  ;;  %v1438_v46 = vadd.f32 %v1437_v12, %v1390_v8  ;;  %v1580_v32 = vadd.f32 %v1579_v11, %v1532_v14  ;;  %4738 = vst [vmem:[#allocation39_spill] sm:$0xff] %v4048_v62  ;;  %v1393_v6 = vmul.f32 %v2358_v39, %v3898_v56  ;;  %v1205_v8 = vld [vmem:[%s2981_s28 + $0x130] sm:$0xff]  ;;  %v2396_v40 = vld [vmem:[%s2981_s28 + $0x368] sm:$0xff]  ;;  %v1206_v39 = vld [vmem:[%s2981_s28 + $0x138] sm:$0xff] }
 0x134   : > { %v1297_v28 = vadd.f32 %v1296_v54, %v1249_v38  ;;  %v4058_v12 = vld [vmem:[%s2974_s26 + $0x2c0] sm:$0xff]  ;;  %v4061_v57 = vld [vmem:[%s2974_s26 + $0x2c8] sm:$0xff]  ;;  %v1252_v11 = vmul.f32 %v4036_v44, %v1203_v2  ;;  %v1536_v56 = vmul.f32 %v2395_v53, %v3732_v63  ;;  %4741 = vst [vmem:[#allocation41_spill] sm:$0xff] %v4071_v34  ;;  %v4074_v26 = vld [vmem:[%s2974_s26 + $0x2d8] sm:$0xff]  ;;  %v1253_v48 = vmul.f32 %v4045_v55, %v1204_v49 }
 0x135   : > { %v1107_v42 = vrot.slane %v1106_v59, 4  ;;  %v1439_v14 = vadd.f32 %v1438_v46, %v1391_v13  ;;  %v1581_v30 = vadd.f32 %v1580_v32, %v1533_v31  ;;  %4739 = vst [vmem:[#allocation40_spill] sm:$0xff] %v4058_v12  ;;  %4740 = vst [vmem:[#allocation22_spill] sm:$0xff] %v4061_v57  ;;  %v1207_v54 = vld [vmem:[%s2981_s28 + $0x140] sm:$0xff]  ;;  %v2361_v46 = vld [vmem:[%s2981_s28 + $0x250] sm:$0xff]  ;;  %v1254_v53 = vmul.f32 %v4048_v62, %v1205_v8 }
 0x136   : > { %v1298_v13 = vadd.f32 %v1297_v28, %v1250_v3  ;;  %v2397_v32 = vld [vmem:[%s2981_s28 + $0x370] sm:$0xff]  ;;  %4742 = vst [vmem:[#allocation23_spill] sm:$0xff] %v4074_v26  ;;  %v1208_v2 = vld [vmem:[%s2981_s28 + $0x148] sm:$0xff]  ;;  %v1255_v49 = vmul.f32 %v4058_v12, %v1206_v39  ;;  %v1256_v8 = vmul.f32 %v4061_v57, %v1207_v54  ;;  %v2363_v63 = vld [vmem:[%s2981_s28 + $0x260] sm:$0xff] }
 0x137   : > { %v1108_v38 = vadd.f32 %v1107_v42, %v1106_v59  ;;  %v1440_v31 = vadd.f32 %v1439_v14, %v1392_v58  ;;  %v1582_v1 = vadd.f32 %v1581_v30, %v1534_v50  ;;  %v1395_v59 = vmul.f32 %v2360_v20, %v3917_v16  ;;  %v1209_v28 = vld [vmem:[%s2981_s28 + $0x150] sm:$0xff]  ;;  %v2362_v50 = vld [vmem:[%s2981_s28 + $0x258] sm:$0xff] }
 0x138   : > { %v1537_v42 = vmul.f32 %v2396_v40, %v3749_v33  ;;  %v1299_v58 = vadd.f32 %v1298_v13, %v1251_v0  ;;  %v2398_v30 = vld [vmem:[%s2981_s28 + $0x378] sm:$0xff]  ;;  %v1396_v20 = vmul.f32 %v2361_v46, %v3927_v4  ;;  %v1538_v40 = vmul.f32 %v2397_v32, %v3770_v60  ;;  %v2399_v13 = vld [vmem:[%s2981_s28 + $0x380] sm:$0xff]  ;;  %v959_v4 = vld [vmem:[#allocation2 + $0x4] sm:$0x1] }
 0x139   : > { %v1109_v3 = vrot.slane %v1108_v38, 2  ;;  %v1441_v14 = vadd.f32 %v1440_v31, %v1393_v6  ;;  %v1583_v52 = vadd.f32 %v1582_v1, %v1535_v9  ;;  %v2434_v31 = vld [vmem:[%s2981_s28 + $0x498] sm:$0xff]  ;;  %v2435_v1 = vld [vmem:[%s2981_s28 + $0x4a0] sm:$0xff]  ;;  %v1257_v54 = vmul.f32 %v4071_v34, %v1208_v2  ;;  %v4106_v2 = vld [vmem:[%s2974_s26 + $0x2e8] sm:$0xff] }
 0x13a   : > { %v1300_v33 = vadd.f32 %v1299_v58, %v1252_v11  ;;  %v4093_v9 = vld [vmem:[%s2974_s26 + $0x2e0] sm:$0xff]  ;;  %v1210_v39 = vld [vmem:[%s2981_s28 + $0x158] sm:$0xff]  ;;  %v4098_v46 = vmul.f32 %v4074_v26, %v1209_v28  ;;  %v1539_v11 = vmul.f32 %v2398_v30, %v3792_v41  ;;  %4744 = vst [vmem:[#allocation24_spill] sm:$0xff] %v4106_v2  ;;  %v1398_v28 = vmul.f32 %v2363_v63, %v3944_v15  ;;  %v4111_v30 = vld [vmem:[%s2974_s26 + $0x188] sm:$0xff] }
 0x13b   : > { %v1110_v16 = vadd.f32 %v1109_v3, %v1108_v38  ;;  %v1442_v0 = vadd.f32 %v1441_v14, %v1394_v36  ;;  %v1584_v6 = vadd.f32 %v1583_v52, %v1536_v56  ;;  %4743 = vst [vmem:[#allocation42_spill] sm:$0xff] %v4093_v9  ;;  %v1397_v38 = vmul.f32 %v2362_v50, %v3937_v22  ;;  %v2364_v56 = vld [vmem:[%s2981_s28 + $0x268] sm:$0xff]  ;;  %v2437_v60 = vld [vmem:[%s2981_s28 + $0x4b0] sm:$0xff] }
 0x13c   : > { %v1301_v32 = vadd.f32 %v1300_v33, %v1253_v48  ;;  %v2400_v3 = vld [vmem:[%s2981_s28 + $0x388] sm:$0xff]  ;;  %v1540_v50 = vmul.f32 %v2399_v13, %v3798_v17  ;;  %4745 = vst [vmem:[#allocation43_spill] sm:$0xff] %v4111_v30  ;;  %v1681_v33 = vmul.f32 %v4111_v30, %v2434_v31  ;;  %v1682_v48 = vmul.f32 %v2435_v1, %v3613_v7  ;;  %v4119_v63 = vld [vmem:[%s2974_s26 + $0x2f0] sm:$0xff]  ;;  %v4130_v30 = vld [vmem:[%s2974_s26 + $0x2f8] sm:$0xff] }
 0x13d   : > { %v1111_v36 = vrot.slane %v1110_v16, 1  ;;  %v1443_v52 = vadd.f32 %v1442_v0, %v1395_v59  ;;  %v1585_v58 = vadd.f32 %v1584_v6, %v1537_v42  ;;  %v2436_v14 = vld [vmem:[%s2981_s28 + $0x4a8] sm:$0xff]  ;;  %v1211_v42 = vld [vmem:[%s2981_s28 + $0x160] sm:$0xff]  ;;  %v2365_v6 = vld [vmem:[%s2981_s28 + $0x270] sm:$0xff]  ;;  %4746 = vst [vmem:[#allocation25_spill] sm:$0xff] %v4119_v63  ;;  %v1259_v13 = vmul.f32 %v4093_v9, %v1210_v39 }
 0x13e   : > { %v1302_v0 = vadd.f32 %v1301_v32, %v1254_v53  ;;  %v1399_v31 = vmul.f32 %v2364_v56, %v3958_v5  ;;  %v2401_v15 = vld [vmem:[%s2981_s28 + $0x390] sm:$0xff]  ;;  %v2366_v32 = vld [vmem:[%s2981_s28 + $0x278] sm:$0xff]  ;;  %v1260_v39 = vmul.f32 %v4106_v2, %v1211_v42  ;;  %v1400_v56 = vmul.f32 %v2365_v6, %v3964_v21  ;;  %v2439_v42 = vld [vmem:[%s2981_s28 + $0x4c0] sm:$0xff] }
 0x13f   : > { %v1112_v59 = vadd.f32 %v1111_v36, %v1110_v16  ;;  %v1444_v22 = vadd.f32 %v1443_v52, %v1396_v20  ;;  %v1586_v41 = vadd.f32 %v1585_v58, %v1538_v40  ;;  %v4747_v17 = vld [vmem:[#allocation32_spill] sm:$0xff]  ;;  %v4748_v16 = vld [vmem:[#allocation26_spill] sm:$0xff] }
 0x140   : > { %v1541_v7 = vmul.f32 %v2400_v3, %v4747_v17  ;;  %v1683_v1 = vmul.f32 %v2436_v14, %v4748_v16  ;;  %v1212_v36 = vld [vmem:[%s2981_s28 + $0x168] sm:$0xff]  ;;  %v1303_v20 = vadd.f32 %v1302_v0, %v1255_v49  ;;  %v2438_v58 = vld [vmem:[%s2981_s28 + $0x4b8] sm:$0xff]  ;;  %v1684_v14 = vmul.f32 %v2437_v60, %v4735_v27  ;;  %v1213_v49 = vld [vmem:[%s2981_s28 + $0x170] sm:$0xff] }
 0x141   : > { %v1113_v53 = vadd.f32 %v1112_v59, %v959_v4  ;;  %v1445_v40 = vadd.f32 %v1444_v22, %v1397_v38  ;;  %v1587_v52 = vadd.f32 %v1586_v41, %v1539_v11  ;;  %v2402_v3 = vld [vmem:[%s2981_s28 + $0x398] sm:$0xff]  ;;  %v1730_v4 = vadd.f32 %v1682_v48, %v1681_v33  ;;  %v2367_v38 = vld [vmem:[%s2981_s28 + $0x280] sm:$0xff] }
 0x142   : > { %v1304_v22 = vadd.f32 %v1303_v20, %v1256_v8  ;;  %v4749_v11 = vld [vmem:[#allocation56_spill] sm:$0xff]  ;;  %v1261_v6 = vmul.f32 %v4119_v63, %v1212_v36  ;;  %v1401_v60 = vmul.f32 %v2366_v32, %v3977_v61  ;;  %v2403_v27 = vld [vmem:[%s2981_s28 + $0x3a0] sm:$0xff]  ;;  %v1685_v33 = vmul.f32 %v2438_v58, %v3651_v43 }
 0x143   : > { %1114 = vst [vmem:[#allocation2 + $0x4] sm:$0x1] %v1113_v53  ;;  %v1446_v41 = vadd.f32 %v1445_v40, %v1398_v28  ;;  %v1542_v59 = vmul.f32 %v2401_v15, %v4749_v11  ;;  %v1588_v0 = vadd.f32 %v1587_v52, %v1540_v50  ;;  %v4141_v16 = vld [vmem:[%s2974_s26 + $0x300] sm:$0xff]  ;;  %v1731_v8 = vadd.f32 %v1730_v4, %v1683_v1  ;;  %v1214_v28 = vld [vmem:[%s2981_s28 + $0x178] sm:$0xff]  ;;  %v4152_v52 = vld [vmem:[%s2974_s26 + $0x308] sm:$0xff] }
 0x144   : > { %v1305_v48 = vadd.f32 %v1304_v22, %v1257_v54  ;;  %v2368_v53 = vld [vmem:[%s2981_s28 + $0x288] sm:$0xff]  ;;  %v1543_v50 = vmul.f32 %v2402_v3, %v4736_v35  ;;  %v1262_v36 = vmul.f32 %v4130_v30, %v1213_v49  ;;  %v1402_v32 = vmul.f32 %v2367_v38, %v3987_v47  ;;  %v1215_v1 = vld [vmem:[%s2981_s28 + $0x180] sm:$0xff]  ;;  %v2369_v58 = vld [vmem:[%s2981_s28 + $0x290] sm:$0xff] }
 0x145   : > { %v1447_v15 = vadd.f32 %v1446_v41, %v1399_v31  ;;  %v1589_v20 = vadd.f32 %v1588_v0, %v1541_v7  ;;  %v2440_v40 = vld [vmem:[%s2981_s28 + $0x4c8] sm:$0xff]  ;;  %v1686_v43 = vmul.f32 %v2439_v42, %v3662_v51  ;;  %v1732_v54 = vadd.f32 %v1731_v8, %v1684_v14  ;;  %v2441_v22 = vld [vmem:[%s2981_s28 + $0x4d0] sm:$0xff]  ;;  %v2371_v42 = vld [vmem:[%s2981_s28 + $0x2a0] sm:$0xff] }
 0x146   : > { %v2404_v63 = vld [vmem:[%s2981_s28 + $0x3a8] sm:$0xff]  ;;  %v1306_v31 = vadd.f32 %v1305_v48, %v4098_v46  ;;  %v1544_v3 = vmul.f32 %v2403_v27, %v3853_v37  ;;  %v1263_v49 = vmul.f32 %v4141_v16, %v1214_v28  ;;  %v1403_v38 = vmul.f32 %v2368_v53, %v3998_v23  ;;  %v2405_v41 = vld [vmem:[%s2981_s28 + $0x3b0] sm:$0xff]  ;;  %v2370_v46 = vld [vmem:[%s2981_s28 + $0x298] sm:$0xff] }
 0x147   : > { %v1448_v7 = vadd.f32 %v1447_v15, %v1400_v56  ;;  %v1590_v4 = vadd.f32 %v1589_v20, %v1542_v59  ;;  %v1687_v51 = vmul.f32 %v2440_v40, %v3674_v29  ;;  %v1733_v14 = vadd.f32 %v1732_v54, %v1685_v33  ;;  %v2442_v8 = vld [vmem:[%s2981_s28 + $0x4d8] sm:$0xff]  ;;  %v2372_v15 = vld [vmem:[%s2981_s28 + $0x2a8] sm:$0xff]  ;;  %v2373_v20 = vld [vmem:[%s2981_s28 + $0x2b0] sm:$0xff] }
 0x148   : > { %v1307_v0 = vadd.f32 %v1306_v31, %v1259_v13  ;;  %v1545_v27 = vmul.f32 %v2404_v63, %v3863_v19  ;;  %v1264_v28 = vmul.f32 %v4152_v52, %v1215_v1  ;;  %v1404_v48 = vmul.f32 %v2369_v58, %v4008_v45  ;;  %v2406_v53 = vld [vmem:[%s2981_s28 + $0x3b8] sm:$0xff]  ;;  %v2443_v40 = vld [vmem:[%s2981_s28 + $0x4e0] sm:$0xff] }
 0x149   : > { %v1449_v56 = vadd.f32 %v1448_v7, %v1401_v60  ;;  %v1591_v59 = vadd.f32 %v1590_v4, %v1543_v50  ;;  %v1688_v29 = vmul.f32 %v2441_v22, %v3686_v18  ;;  %v1734_v33 = vadd.f32 %v1733_v14, %v1686_v43  ;;  %v2407_v31 = vld [vmem:[%s2981_s28 + $0x3c0] sm:$0xff]  ;;  %v2374_v7 = vld [vmem:[%s2981_s28 + $0x2b8] sm:$0xff]  ;;  %v2444_v14 = vld [vmem:[%s2981_s28 + $0x4e8] sm:$0xff] }
 0x14a   : > { %v1308_v13 = vadd.f32 %v1307_v0, %v1260_v39  ;;  %v1546_v63 = vmul.f32 %v2405_v41, %v3874_v24  ;;  %v1405_v54 = vmul.f32 %v2370_v46, %v4018_v25  ;;  %v1406_v1 = vmul.f32 %v2371_v42, %v4027_v10  ;;  %v4750_v58 = vld [vmem:[#allocation27_spill] sm:$0xff] }
 0x14b   : > { %v1450_v60 = vadd.f32 %v1449_v56, %v1402_v32  ;;  %v1592_v50 = vadd.f32 %v1591_v59, %v1544_v3  ;;  %v1689_v18 = vmul.f32 %v2442_v8, %v4750_v58  ;;  %v1735_v43 = vadd.f32 %v1734_v33, %v1687_v51  ;;  %v2375_v4 = vld [vmem:[%s2981_s28 + $0x2c0] sm:$0xff]  ;;  %v2408_v42 = vld [vmem:[%s2981_s28 + $0x3c8] sm:$0xff]  ;;  %v2377_v33 = vld [vmem:[%s2981_s28 + $0x2d0] sm:$0xff] }
 0x14c   : > { %v1309_v39 = vadd.f32 %v1308_v13, %v1261_v6  ;;  %v4751_v22 = vld [vmem:[#allocation35_spill] sm:$0xff]  ;;  %v1407_v0 = vmul.f32 %v2372_v15, %v4036_v44  ;;  %v1408_v46 = vmul.f32 %v2373_v20, %v4045_v55  ;;  %v4752_v56 = vld [vmem:[#allocation28_spill] sm:$0xff]  ;;  %v1409_v15 = vmul.f32 %v2374_v7, %v4048_v62  ;;  %v4754_v58 = vld [vmem:[#allocation29_spill] sm:$0xff] }
 0x14d   : > { %v1451_v32 = vadd.f32 %v1450_v60, %v1403_v38  ;;  %v1547_v41 = vmul.f32 %v2406_v53, %v4751_v22  ;;  %v1593_v3 = vadd.f32 %v1592_v50, %v1545_v27  ;;  %v1690_v59 = vmul.f32 %v2443_v40, %v4752_v56  ;;  %v2376_v8 = vld [vmem:[%s2981_s28 + $0x2c8] sm:$0xff]  ;;  %v2445_v60 = vld [vmem:[%s2981_s28 + $0x4f0] sm:$0xff] }
 0x14e   : > { %v1736_v51 = vadd.f32 %v1735_v43, %v1688_v29  ;;  %v1310_v6 = vadd.f32 %v1309_v39, %v1262_v36  ;;  %v4753_v13 = vld [vmem:[#allocation20_spill] sm:$0xff]  ;;  %v4197_v20 = vmul.f32 %v2375_v4, %v4058_v12  ;;  %v1691_v40 = vmul.f32 %v2444_v14, %v4754_v58  ;;  %v2379_v43 = vld [vmem:[%s2981_s28 + $0x2e0] sm:$0xff] }
 0x14f   : > { %v1452_v38 = vadd.f32 %v1451_v32, %v1404_v48  ;;  %v1548_v53 = vmul.f32 %v2407_v31, %v4753_v13  ;;  %v1594_v27 = vadd.f32 %v1593_v3, %v1546_v63  ;;  %v2409_v50 = vld [vmem:[%s2981_s28 + $0x3d0] sm:$0xff]  ;;  %v2378_v36 = vld [vmem:[%s2981_s28 + $0x2d8] sm:$0xff]  ;;  %v4206_v7 = vmul.f32 %v2376_v8, %v4061_v57  ;;  %v2484_v8 = vld [vmem:[%s2981_s28 + $0x628] sm:$0xff] }
 0x150   : > { %v1737_v56 = vadd.f32 %v1736_v51, %v1689_v18  ;;  %v1311_v29 = vadd.f32 %v1310_v6, %v1263_v49  ;;  %v4755_v31 = vld [vmem:[#allocation36_spill] sm:$0xff]  ;;  %v4209_v4 = vmul.f32 %v2377_v33, %v4071_v34  ;;  %v4756_v18 = vld [vmem:[#allocation30_spill] sm:$0xff]  ;;  %v4221_v33 = vmul.f32 %v2379_v43, %v4093_v9  ;;  %v4760_v34 = vld [vmem:[#allocation53_spill] sm:$0xff] }
 0x151   : > { %v1453_v48 = vadd.f32 %v1452_v38, %v1405_v54  ;;  %v1549_v63 = vmul.f32 %v2408_v42, %v4755_v31  ;;  %v1595_v39 = vadd.f32 %v1594_v27, %v1547_v41  ;;  %v2446_v32 = vld [vmem:[%s2981_s28 + $0x4f8] sm:$0xff]  ;;  %v1692_v49 = vmul.f32 %v2445_v60, %v4756_v18  ;;  %v2447_v42 = vld [vmem:[%s2981_s28 + $0x500] sm:$0xff]  ;;  %v2448_v18 = vld [vmem:[%s2981_s28 + $0x508] sm:$0xff] }
 0x152   : > { %v2410_v3 = vld [vmem:[%s2981_s28 + $0x3d8] sm:$0xff]  ;;  %v1738_v14 = vadd.f32 %v1737_v56, %v1690_v59  ;;  %v1312_v51 = vadd.f32 %v1311_v29, %v1264_v28  ;;  %v2483_v38 = vld [vmem:[%s2981_s28 + $0x620] sm:$0xff]  ;;  %v4218_v27 = vmul.f32 %v2378_v36, %v4074_v26  ;;  %v2380_v29 = vld [vmem:[%s2981_s28 + $0x2e8] sm:$0xff]  ;;  %v1694_v43 = vmul.f32 %v2447_v42, %v4760_v34 }
 0x153   : > { %v1454_v6 = vadd.f32 %v1453_v48, %v1406_v1  ;;  %v4757_v58 = vld [vmem:[#allocation58_spill] sm:$0xff]  ;;  %v1596_v41 = vadd.f32 %v1595_v39, %v1548_v53  ;;  %v4758_v59 = vld [vmem:[#allocation31_spill] sm:$0xff]  ;;  %v4759_v53 = vld [vmem:[#allocation37_spill] sm:$0xff]  ;;  %v4237_v62 = vmul.f32 %v2380_v29, %v4106_v2 }
 0x154   : > { %v1550_v54 = vmul.f32 %v2409_v50, %v4757_v58  ;;  %v2411_v60 = vld [vmem:[%s2981_s28 + $0x3e0] sm:$0xff]  ;;  %v1693_v28 = vmul.f32 %v2446_v32, %v4758_v59  ;;  %v1739_v1 = vadd.f32 %v1738_v14, %v1691_v40  ;;  %v1313_v56 = vrot.slane %v1312_v51, 4  ;;  %v2485_v36 = vld [vmem:[%s2981_s28 + $0x630] sm:$0xff]  ;;  %v2412_v26 = vld [vmem:[%s2981_s28 + $0x3e8] sm:$0xff] }
 0x155   : > { %v1455_v50 = vadd.f32 %v1454_v6, %v1407_v0  ;;  %v1551_v48 = vmul.f32 %v2410_v3, %v4759_v53  ;;  %v1597_v39 = vadd.f32 %v1596_v41, %v1549_v63  ;;  %v4761_v57 = vld [vmem:[#allocation43_spill] sm:$0xff]  ;;  %v2486_v41 = vld [vmem:[%s2981_s28 + $0x638] sm:$0xff] }
 0x156   : > { %v1740_v9 = vadd.f32 %v1739_v1, %v1692_v49  ;;  %v1836_v12 = vmul.f32 %v4761_v57, %v2483_v38  ;;  %v2665_v32 = vld [vmem:[%s2974_s26 + $0x190] sm:$0xff]  ;;  %v1314_v14 = vadd.f32 %v1313_v56, %v1312_v51  ;;  %v2666_v38 = vld [vmem:[%s2974_s26 + $0x198] sm:$0xff]  ;;  %v2667_v2 = vld [vmem:[%s2974_s26 + $0x1a0] sm:$0xff] }
 0x157   : > { %v1837_v40 = vmul.f32 %v2665_v32, %v2484_v8  ;;  %v1456_v59 = vadd.f32 %v1455_v50, %v1408_v46  ;;  %v4762_v0 = vld [vmem:[#allocation59_spill] sm:$0xff]  ;;  %v1598_v63 = vadd.f32 %v1597_v39, %v1550_v54  ;;  %v4763_v49 = vld [vmem:[#allocation54_spill] sm:$0xff]  ;;  %v1838_v8 = vmul.f32 %v2666_v38, %v2485_v36 }
 0x158   : > { %v1552_v6 = vmul.f32 %v2411_v60, %v4762_v0  ;;  %v2449_v3 = vld [vmem:[%s2981_s28 + $0x510] sm:$0xff]  ;;  %v1695_v42 = vmul.f32 %v2448_v18, %v4763_v49  ;;  %v1741_v57 = vadd.f32 %v1740_v9, %v1693_v28  ;;  %v1315_v51 = vrot.slane %v1314_v14, 2  ;;  %v4764_v1 = vld [vmem:[#allocation38_spill] sm:$0xff] }
 0x159   : > { %v2413_v34 = vld [vmem:[%s2981_s28 + $0x3f0] sm:$0xff]  ;;  %v1457_v46 = vadd.f32 %v1456_v59, %v1409_v15  ;;  %v1553_v60 = vmul.f32 %v2412_v26, %v4764_v1  ;;  %v1599_v54 = vadd.f32 %v1598_v63, %v1551_v48  ;;  %v2450_v56 = vld [vmem:[%s2981_s28 + $0x518] sm:$0xff]  ;;  %v2487_v50 = vld [vmem:[%s2981_s28 + $0x640] sm:$0xff]  ;;  %v1696_v29 = vmul.f32 %v2449_v3, %v4747_v17 }
 0x15a   : > { %v2414_v39 = vld [vmem:[%s2981_s28 + $0x3f8] sm:$0xff]  ;;  %v1742_v32 = vadd.f32 %v1741_v57, %v1694_v43  ;;  %v1839_v18 = vmul.f32 %v2667_v2, %v2486_v41  ;;  %v1885_v9 = vadd.f32 %v1837_v40, %v1836_v12  ;;  %v1316_v28 = vadd.f32 %v1315_v51, %v1314_v14  ;;  %v2451_v48 = vld [vmem:[%s2981_s28 + $0x520] sm:$0xff]  ;;  %v2488_v59 = vld [vmem:[%s2981_s28 + $0x648] sm:$0xff] }
 0x15b   : > { %v1458_v36 = vadd.f32 %v1457_v46, %v4197_v20  ;;  %v1554_v15 = vmul.f32 %v2413_v34, %v3958_v5  ;;  %v1600_v26 = vadd.f32 %v1599_v54, %v1552_v6  ;;  %v2415_v63 = vld [vmem:[%s2981_s28 + $0x400] sm:$0xff]  ;;  %v1697_v49 = vmul.f32 %v2450_v56, %v4749_v11  ;;  %v2668_v43 = vld [vmem:[%s2974_s26 + $0x1a8] sm:$0xff]  ;;  %v2669_v38 = vld [vmem:[%s2974_s26 + $0x1b0] sm:$0xff] }
 0x15c   : > { %v1743_v17 = vadd.f32 %v1742_v32, %v1695_v42  ;;  %v1840_v3 = vmul.f32 %v2668_v43, %v2487_v50  ;;  %v1886_v2 = vadd.f32 %v1885_v9, %v1838_v8  ;;  %v1317_v12 = vrot.slane %v1316_v28, 1  ;;  %v2452_v6 = vld [vmem:[%s2981_s28 + $0x528] sm:$0xff]  ;;  %v2489_v41 = vld [vmem:[%s2981_s28 + $0x650] sm:$0xff]  ;;  %v2490_v50 = vld [vmem:[%s2981_s28 + $0x658] sm:$0xff] }
 0x15d   : > { %v1459_v40 = vadd.f32 %v1458_v36, %v4206_v7  ;;  %v1555_v20 = vmul.f32 %v2414_v39, %v3964_v21  ;;  %v1601_v14 = vadd.f32 %v1600_v26, %v1553_v60  ;;  %v1166_v34 = vld [vmem:[#allocation2 + $0x8] sm:$0x1]  ;;  %v2416_v57 = vld [vmem:[%s2981_s28 + $0x408] sm:$0xff]  ;;  %v1698_v11 = vmul.f32 %v2451_v48, %v4736_v35 }
 0x15e   : > { %v1744_v42 = vadd.f32 %v1743_v17, %v1696_v29  ;;  %v1841_v8 = vmul.f32 %v2669_v38, %v2488_v59  ;;  %v1887_v51 = vadd.f32 %v1886_v2, %v1839_v18  ;;  %v1318_v46 = vadd.f32 %v1317_v12, %v1316_v28  ;;  %v2453_v56 = vld [vmem:[%s2981_s28 + $0x530] sm:$0xff]  ;;  %v2670_v9 = vld [vmem:[%s2974_s26 + $0x1b8] sm:$0xff]  ;;  %v2671_v43 = vld [vmem:[%s2974_s26 + $0x1c0] sm:$0xff] }
 0x15f   : > { %v1460_v7 = vadd.f32 %v1459_v40, %v4209_v4  ;;  %v1556_v54 = vmul.f32 %v2415_v63, %v3977_v61  ;;  %v1602_v60 = vadd.f32 %v1601_v14, %v1554_v15  ;;  %v2381_v39 = vld [vmem:[%s2981_s28 + $0x2f0] sm:$0xff]  ;;  %v1699_v35 = vmul.f32 %v2452_v6, %v3853_v37  ;;  %v2454_v48 = vld [vmem:[%s2981_s28 + $0x538] sm:$0xff]  ;;  %v2491_v59 = vld [vmem:[%s2981_s28 + $0x660] sm:$0xff] }
 0x160   : > { %v2417_v32 = vld [vmem:[%s2981_s28 + $0x410] sm:$0xff]  ;;  %v1745_v29 = vadd.f32 %v1744_v42, %v1697_v49  ;;  %v1842_v18 = vmul.f32 %v2670_v9, %v2489_v41  ;;  %v1888_v28 = vadd.f32 %v1887_v51, %v1840_v3  ;;  %v1319_v36 = vadd.f32 %v1318_v46, %v1166_v34  ;;  %v2382_v63 = vld [vmem:[%s2981_s28 + $0x2f8] sm:$0xff]  ;;  %v2455_v6 = vld [vmem:[%s2981_s28 + $0x540] sm:$0xff] }
 0x161   : > { %v1461_v4 = vadd.f32 %v1460_v7, %v4218_v27  ;;  %v1557_v26 = vmul.f32 %v2416_v57, %v3987_v47  ;;  %v1603_v15 = vadd.f32 %v1602_v60, %v1555_v20  ;;  %v2418_v17 = vld [vmem:[%s2981_s28 + $0x418] sm:$0xff]  ;;  %v1700_v37 = vmul.f32 %v2453_v56, %v3863_v19  ;;  %v2492_v41 = vld [vmem:[%s2981_s28 + $0x668] sm:$0xff]  ;;  %v2383_v19 = vld [vmem:[%s2981_s28 + $0x300] sm:$0xff] }
 0x162   : > { %v1746_v49 = vadd.f32 %v1745_v29, %v1698_v11  ;;  %v1843_v3 = vmul.f32 %v2671_v43, %v2490_v50  ;;  %v1889_v2 = vadd.f32 %v1888_v28, %v1841_v8  ;;  %1320 = vst [vmem:[#allocation2 + $0x8] sm:$0x1] %v1319_v36  ;;  %v4765_v27 = vld [vmem:[#allocation25_spill] sm:$0xff]  ;;  %v1558_v20 = vmul.f32 %v2417_v32, %v3998_v23  ;;  %v2384_v56 = vld [vmem:[%s2981_s28 + $0x308] sm:$0xff] }
 0x163   : > { %v1416_v12 = vmul.f32 %v2381_v39, %v4765_v27  ;;  %v1462_v40 = vadd.f32 %v1461_v4, %v4221_v33  ;;  %v1604_v14 = vadd.f32 %v1603_v15, %v1556_v54  ;;  %v2419_v34 = vld [vmem:[%s2981_s28 + $0x420] sm:$0xff]  ;;  %v1701_v57 = vmul.f32 %v2454_v48, %v3874_v24  ;;  %v2672_v42 = vld [vmem:[%s2974_s26 + $0x1c8] sm:$0xff]  ;;  %v2673_v32 = vld [vmem:[%s2974_s26 + $0x1d0] sm:$0xff] }
 0x164   : > { %v1747_v11 = vadd.f32 %v1746_v49, %v1699_v35  ;;  %v1844_v38 = vmul.f32 %v2672_v42, %v2491_v59  ;;  %v1890_v8 = vadd.f32 %v1889_v2, %v1842_v18  ;;  %v1417_v33 = vmul.f32 %v2382_v63, %v4130_v30  ;;  %v2456_v54 = vld [vmem:[%s2981_s28 + $0x548] sm:$0xff]  ;;  %v2493_v60 = vld [vmem:[%s2981_s28 + $0x670] sm:$0xff]  ;;  %v2494_v4 = vld [vmem:[%s2981_s28 + $0x678] sm:$0xff] }
 0x165   : > { %v1463_v51 = vadd.f32 %v1462_v40, %v4237_v62  ;;  %v1559_v46 = vmul.f32 %v2418_v17, %v4008_v45  ;;  %v1605_v7 = vadd.f32 %v1604_v14, %v1557_v26  ;;  %v2420_v50 = vld [vmem:[%s2981_s28 + $0x428] sm:$0xff]  ;;  %v1702_v24 = vmul.f32 %v2455_v6, %v4751_v22  ;;  %v2457_v36 = vld [vmem:[%s2981_s28 + $0x550] sm:$0xff]  ;;  %v2674_v48 = vld [vmem:[%s2974_s26 + $0x1d8] sm:$0xff] }
 0x166   : > { %v1748_v39 = vadd.f32 %v1747_v11, %v1700_v37  ;;  %v1845_v35 = vmul.f32 %v2673_v32, %v2492_v41  ;;  %v1891_v29 = vadd.f32 %v1890_v8, %v1843_v3  ;;  %v1418_v9 = vmul.f32 %v2383_v19, %v4141_v16  ;;  %v2421_v26 = vld [vmem:[%s2981_s28 + $0x430] sm:$0xff]  ;;  %v2458_v3 = vld [vmem:[%s2981_s28 + $0x558] sm:$0xff]  ;;  %v2495_v2 = vld [vmem:[%s2981_s28 + $0x680] sm:$0xff] }
 0x167   : > { %v1464_v62 = vadd.f32 %v1463_v51, %v1416_v12  ;;  %v1560_v18 = vmul.f32 %v2419_v34, %v4018_v25  ;;  %v1606_v28 = vadd.f32 %v1605_v7, %v1558_v20  ;;  %v1703_v15 = vmul.f32 %v2456_v54, %v4753_v13  ;;  %v2422_v12 = vld [vmem:[%s2981_s28 + $0x438] sm:$0xff]  ;;  %v2675_v20 = vld [vmem:[%s2974_s26 + $0x1e0] sm:$0xff] }
 0x168   : > { %v1749_v22 = vadd.f32 %v1748_v39, %v1701_v57  ;;  %v1846_v59 = vmul.f32 %v2674_v48, %v2493_v60  ;;  %v1892_v63 = vadd.f32 %v1891_v29, %v1844_v38  ;;  %v1419_v17 = vmul.f32 %v2384_v56, %v4152_v52  ;;  %v2459_v57 = vld [vmem:[%s2981_s28 + $0x560] sm:$0xff]  ;;  %v2496_v11 = vld [vmem:[%s2981_s28 + $0x688] sm:$0xff]  ;;  %v2497_v56 = vld [vmem:[%s2981_s28 + $0x690] sm:$0xff] }
 0x169   : > { %v1465_v37 = vadd.f32 %v1464_v62, %v1417_v33  ;;  %v1561_v49 = vmul.f32 %v2420_v50, %v4027_v10  ;;  %v1607_v43 = vadd.f32 %v1606_v28, %v1559_v46  ;;  %v1704_v40 = vmul.f32 %v2457_v36, %v4755_v31  ;;  %v2423_v42 = vld [vmem:[%s2981_s28 + $0x440] sm:$0xff]  ;;  %v2676_v33 = vld [vmem:[%s2974_s26 + $0x1e8] sm:$0xff]  ;;  %v2677_v32 = vld [vmem:[%s2974_s26 + $0x1f0] sm:$0xff] }
 0x16a   : > { %v1750_v13 = vadd.f32 %v1749_v22, %v1702_v24  ;;  %v1847_v14 = vmul.f32 %v2675_v20, %v2494_v4  ;;  %v1893_v6 = vadd.f32 %v1892_v63, %v1845_v35  ;;  %v1562_v19 = vmul.f32 %v2421_v26, %v4036_v44  ;;  %v2460_v60 = vld [vmem:[%s2981_s28 + $0x568] sm:$0xff]  ;;  %v2461_v28 = vld [vmem:[%s2981_s28 + $0x570] sm:$0xff]  ;;  %v2498_v36 = vld [vmem:[%s2981_s28 + $0x698] sm:$0xff] }
 0x16b   : > { %v1466_v41 = vadd.f32 %v1465_v37, %v1418_v9  ;;  %v1608_v34 = vadd.f32 %v1607_v43, %v1560_v18  ;;  %v1705_v38 = vmul.f32 %v2458_v3, %v4757_v58  ;;  %v1848_v31 = vmul.f32 %v2676_v33, %v2495_v2  ;;  %v2424_v50 = vld [vmem:[%s2981_s28 + $0x448] sm:$0xff]  ;;  %v2425_v4 = vld [vmem:[%s2981_s28 + $0x450] sm:$0xff]  ;;  %v2678_v22 = vld [vmem:[%s2974_s26 + $0x1f8] sm:$0xff] }
 0x16c   : > { %v1751_v8 = vadd.f32 %v1750_v13, %v1703_v15  ;;  %v1894_v51 = vadd.f32 %v1893_v6, %v1846_v59  ;;  %v1563_v7 = vmul.f32 %v2422_v12, %v4045_v55  ;;  %v1706_v24 = vmul.f32 %v2459_v57, %v4759_v53  ;;  %v4766_v9 = vld [vmem:[#allocation39_spill] sm:$0xff]  ;;  %v4767_v63 = vld [vmem:[#allocation40_spill] sm:$0xff] }
 0x16d   : > { %v1467_v46 = vadd.f32 %v1466_v41, %v1419_v17  ;;  %v1609_v54 = vadd.f32 %v1608_v34, %v1561_v49  ;;  %v1849_v58 = vmul.f32 %v2677_v32, %v2496_v11  ;;  %v1564_v62 = vmul.f32 %v2423_v42, %v4766_v9  ;;  %v2462_v49 = vld [vmem:[%s2981_s28 + $0x578] sm:$0xff]  ;;  %v2499_v43 = vld [vmem:[%s2981_s28 + $0x6a0] sm:$0xff]  ;;  %v2500_v34 = vld [vmem:[%s2981_s28 + $0x6a8] sm:$0xff] }
 0x16e   : > { %v1752_v39 = vadd.f32 %v1751_v8, %v1704_v40  ;;  %v1895_v35 = vadd.f32 %v1894_v51, %v1847_v14  ;;  %v1707_v26 = vmul.f32 %v2460_v60, %v4762_v0  ;;  %v1850_v53 = vmul.f32 %v2678_v22, %v2497_v56  ;;  %v2426_v3 = vld [vmem:[%s2981_s28 + $0x458] sm:$0xff]  ;;  %v2679_v40 = vld [vmem:[%s2974_s26 + $0x200] sm:$0xff] }
 0x16f   : > { %v1468_v29 = vrot.slane %v1467_v46, 4  ;;  %v1610_v18 = vadd.f32 %v1609_v54, %v1562_v19  ;;  %v1565_v17 = vmul.f32 %v2424_v50, %v4767_v63  ;;  %v1708_v2 = vmul.f32 %v2461_v28, %v4764_v1  ;;  %v4768_v14 = vld [vmem:[#allocation22_spill] sm:$0xff]  ;;  %v2501_v54 = vld [vmem:[%s2981_s28 + $0x6b0] sm:$0xff] }
 0x170   : > { %v1753_v15 = vadd.f32 %v1752_v39, %v1705_v38  ;;  %v1896_v48 = vadd.f32 %v1895_v35, %v1848_v31  ;;  %v1851_v0 = vmul.f32 %v2679_v40, %v2498_v36  ;;  %v1566_v6 = vmul.f32 %v2425_v4, %v4768_v14  ;;  %v2463_v19 = vld [vmem:[%s2981_s28 + $0x580] sm:$0xff]  ;;  %v2680_v38 = vld [vmem:[%s2974_s26 + $0x208] sm:$0xff] }
 0x171   : > { %v1469_v59 = vadd.f32 %v1468_v29, %v1467_v46  ;;  %v1611_v37 = vadd.f32 %v1610_v18, %v1563_v7  ;;  %v2427_v57 = vld [vmem:[%s2981_s28 + $0x460] sm:$0xff]  ;;  %v1709_v11 = vmul.f32 %v2462_v49, %v3958_v5  ;;  %v1852_v1 = vmul.f32 %v2680_v38, %v2499_v43  ;;  %v2464_v7 = vld [vmem:[%s2981_s28 + $0x588] sm:$0xff]  ;;  %v2502_v18 = vld [vmem:[%s2981_s28 + $0x6b8] sm:$0xff] }
 0x172   : > { %v1754_v12 = vadd.f32 %v1753_v15, %v1706_v24  ;;  %v1897_v13 = vadd.f32 %v1896_v48, %v1849_v58  ;;  %v4769_v31 = vld [vmem:[#allocation41_spill] sm:$0xff]  ;;  %v2428_v60 = vld [vmem:[%s2981_s28 + $0x468] sm:$0xff]  ;;  %v1710_v56 = vmul.f32 %v2463_v19, %v3964_v21  ;;  %v1321_v28 = vld [vmem:[#allocation2 + $0x9] sm:$0x1]  ;;  %v1711_v4 = vmul.f32 %v2464_v7, %v3977_v61 }
 0x173   : > { %v1470_v20 = vrot.slane %v1469_v59, 2  ;;  %v1612_v41 = vadd.f32 %v1611_v37, %v1564_v62  ;;  %v1567_v51 = vmul.f32 %v2426_v3, %v4769_v31  ;;  %v2681_v24 = vld [vmem:[%s2974_s26 + $0x210] sm:$0xff]  ;;  %v2682_v21 = vld [vmem:[%s2974_s26 + $0x218] sm:$0xff]  ;;  %v2504_v19 = vld [vmem:[%s2981_s28 + $0x6c8] sm:$0xff] }
 0x174   : > { %v1755_v42 = vadd.f32 %v1754_v12, %v1707_v26  ;;  %v1898_v8 = vadd.f32 %v1897_v13, %v1850_v53  ;;  %v1853_v5 = vmul.f32 %v2681_v24, %v2500_v34  ;;  %v4770_v58 = vld [vmem:[#allocation23_spill] sm:$0xff]  ;;  %v1854_v15 = vmul.f32 %v2682_v21, %v2501_v54  ;;  %v4771_v48 = vld [vmem:[#allocation42_spill] sm:$0xff]  ;;  %v4772_v13 = vld [vmem:[#allocation24_spill] sm:$0xff] }
 0x175   : > { %v1471_v33 = vadd.f32 %v1470_v20, %v1469_v59  ;;  %v1613_v46 = vadd.f32 %v1612_v41, %v1565_v17  ;;  %v1568_v35 = vmul.f32 %v2427_v57, %v4770_v58  ;;  %v2465_v62 = vld [vmem:[%s2981_s28 + $0x590] sm:$0xff]  ;;  %v1569_v59 = vmul.f32 %v2428_v60, %v4771_v48  ;;  %v2466_v37 = vld [vmem:[%s2981_s28 + $0x598] sm:$0xff]  ;;  %v2503_v49 = vld [vmem:[%s2981_s28 + $0x6c0] sm:$0xff] }
 0x176   : > { %v1756_v50 = vadd.f32 %v1755_v42, %v1708_v2  ;;  %v1899_v39 = vadd.f32 %v1898_v8, %v1851_v0  ;;  %v2429_v36 = vld [vmem:[%s2981_s28 + $0x470] sm:$0xff]  ;;  %v2430_v43 = vld [vmem:[%s2981_s28 + $0x478] sm:$0xff]  ;;  %v1712_v3 = vmul.f32 %v2465_v62, %v3987_v47  ;;  %v2683_v12 = vld [vmem:[%s2974_s26 + $0x220] sm:$0xff]  ;;  %v1713_v57 = vmul.f32 %v2466_v37, %v3998_v23 }
 0x177   : > { %v1472_v32 = vrot.slane %v1471_v33, 1  ;;  %v1614_v29 = vadd.f32 %v1613_v46, %v1566_v6  ;;  %v1855_v61 = vmul.f32 %v2683_v12, %v2502_v18  ;;  %v1570_v20 = vmul.f32 %v2429_v36, %v4772_v13  ;;  %v2467_v41 = vld [vmem:[%s2981_s28 + $0x5a0] sm:$0xff]  ;;  %v2684_v42 = vld [vmem:[%s2974_s26 + $0x228] sm:$0xff]  ;;  %v2685_v23 = vld [vmem:[%s2974_s26 + $0x230] sm:$0xff] }
 0x178   : > { %v1757_v26 = vadd.f32 %v1756_v50, %v1709_v11  ;;  %v1900_v22 = vadd.f32 %v1899_v39, %v1852_v1  ;;  %v2431_v34 = vld [vmem:[%s2981_s28 + $0x480] sm:$0xff]  ;;  %v1856_v47 = vmul.f32 %v2684_v42, %v2503_v49  ;;  %v1571_v1 = vmul.f32 %v2430_v43, %v4765_v27  ;;  %v2432_v46 = vld [vmem:[%s2981_s28 + $0x488] sm:$0xff]  ;;  %v2506_v39 = vld [vmem:[%s2981_s28 + $0x6d8] sm:$0xff] }
 0x179   : > { %v1473_v53 = vadd.f32 %v1472_v32, %v1471_v33  ;;  %v1615_v17 = vadd.f32 %v1614_v29, %v1567_v51  ;;  %v2468_v33 = vld [vmem:[%s2981_s28 + $0x5a8] sm:$0xff]  ;;  %v2505_v51 = vld [vmem:[%s2981_s28 + $0x6d0] sm:$0xff]  ;;  %v1714_v7 = vmul.f32 %v2467_v41, %v4008_v45  ;;  %v1857_v60 = vmul.f32 %v2685_v23, %v2504_v19  ;;  %v2686_v62 = vld [vmem:[%s2974_s26 + $0x238] sm:$0xff] }
 0x17a   : > { %v1758_v2 = vadd.f32 %v1757_v26, %v1710_v56  ;;  %v1901_v40 = vadd.f32 %v1900_v22, %v1853_v5  ;;  %v1572_v50 = vmul.f32 %v2431_v34, %v4130_v30  ;;  %v2469_v5 = vld [vmem:[%s2981_s28 + $0x5b0] sm:$0xff]  ;;  %v1858_v45 = vmul.f32 %v2686_v62, %v2505_v51  ;;  %v2507_v26 = vld [vmem:[%s2981_s28 + $0x6e0] sm:$0xff]  ;;  %v2508_v49 = vld [vmem:[%s2981_s28 + $0x6e8] sm:$0xff] }
 0x17b   : > { %v1474_v0 = vadd.f32 %v1473_v53, %v1321_v28  ;;  %v1616_v6 = vadd.f32 %v1615_v17, %v1568_v35  ;;  %v2433_v32 = vld [vmem:[%s2981_s28 + $0x490] sm:$0xff]  ;;  %v1715_v35 = vmul.f32 %v2468_v33, %v4018_v25  ;;  %v1573_v28 = vmul.f32 %v2432_v46, %v4141_v16  ;;  %v2687_v22 = vld [vmem:[%s2974_s26 + $0x240] sm:$0xff]  ;;  %v2474_v51 = vld [vmem:[%s2981_s28 + $0x5d8] sm:$0xff] }
 0x17c   : > { %v1759_v11 = vadd.f32 %v1758_v2, %v1711_v4  ;;  %v1902_v38 = vadd.f32 %v1901_v40, %v1854_v15  ;;  %v2470_v4 = vld [vmem:[%s2981_s28 + $0x5b8] sm:$0xff]  ;;  %v1716_v21 = vmul.f32 %v2469_v5, %v4027_v10  ;;  %v1859_v53 = vmul.f32 %v2687_v22, %v2506_v39  ;;  %v2471_v37 = vld [vmem:[%s2981_s28 + $0x5c0] sm:$0xff]  ;;  %v2688_v2 = vld [vmem:[%s2974_s26 + $0x248] sm:$0xff] }
 0x17d   : > { %1475 = vst [vmem:[#allocation2 + $0x9] sm:$0x1] %v1474_v0  ;;  %v1617_v8 = vadd.f32 %v1616_v6, %v1569_v59  ;;  %v1574_v59 = vmul.f32 %v2433_v32, %v4152_v52  ;;  %v1717_v43 = vmul.f32 %v2470_v4, %v4036_v44  ;;  %v1860_v12 = vmul.f32 %v2688_v2, %v2507_v26  ;;  %v2472_v40 = vld [vmem:[%s2981_s28 + $0x5c8] sm:$0xff]  ;;  %v2509_v0 = vld [vmem:[%s2981_s28 + $0x6f0] sm:$0xff]  ;;  %v2510_v44 = vld [vmem:[%s2981_s28 + $0x6f8] sm:$0xff] }
 0x17e   : > { %v1760_v54 = vadd.f32 %v1759_v11, %v1712_v3  ;;  %v1903_v56 = vadd.f32 %v1902_v38, %v1855_v61  ;;  %v2689_v41 = vld [vmem:[%s2974_s26 + $0x250] sm:$0xff]  ;;  %v1719_v42 = vmul.f32 %v2472_v40, %v4766_v9  ;;  %v2690_v38 = vld [vmem:[%s2974_s26 + $0x258] sm:$0xff]  ;;  %v2512_v9 = vld [vmem:[%s2981_s28 + $0x708] sm:$0xff] }
 0x17f   : > { %v1618_v24 = vadd.f32 %v1617_v8, %v1570_v20  ;;  %v1718_v20 = vmul.f32 %v2471_v37, %v4045_v55  ;;  %v1861_v19 = vmul.f32 %v2689_v41, %v2508_v49  ;;  %v2473_v11 = vld [vmem:[%s2981_s28 + $0x5d0] sm:$0xff]  ;;  %v2511_v55 = vld [vmem:[%s2981_s28 + $0x700] sm:$0xff]  ;;  %v2476_v62 = vld [vmem:[%s2981_s28 + $0x5e8] sm:$0xff] }
 0x180   : > { %v1761_v29 = vadd.f32 %v1760_v54, %v1713_v57  ;;  %v1904_v18 = vadd.f32 %v1903_v56, %v1856_v47  ;;  %v1720_v46 = vmul.f32 %v2473_v11, %v4767_v63  ;;  %v2691_v54 = vld [vmem:[%s2974_s26 + $0x260] sm:$0xff]  ;;  %v2692_v39 = vld [vmem:[%s2974_s26 + $0x268] sm:$0xff]  ;;  %v2478_v37 = vld [vmem:[%s2981_s28 + $0x5f8] sm:$0xff] }
 0x181   : > { %v1619_v36 = vadd.f32 %v1618_v24, %v1571_v1  ;;  %v1862_v1 = vmul.f32 %v2690_v38, %v2509_v0  ;;  %v1863_v23 = vmul.f32 %v2691_v54, %v2510_v44  ;;  %v1721_v24 = vmul.f32 %v2474_v51, %v4768_v14  ;;  %v2513_v63 = vld [vmem:[%s2981_s28 + $0x710] sm:$0xff]  ;;  %v2514_v14 = vld [vmem:[%s2981_s28 + $0x718] sm:$0xff]  ;;  %v2695_v2 = vld [vmem:[%s2974_s26 + $0x280] sm:$0xff] }
 0x182   : > { %v1762_v15 = vadd.f32 %v1761_v29, %v1714_v7  ;;  %v1905_v25 = vadd.f32 %v1904_v18, %v1857_v60  ;;  %v1864_v32 = vmul.f32 %v2692_v39, %v2511_v55  ;;  %v1476_v49 = vld [vmem:[#allocation2 + $0xa] sm:$0x1]  ;;  %v2516_v40 = vld [vmem:[%s2981_s28 + $0x728] sm:$0xff]  ;;  %v1725_v0 = vmul.f32 %v2478_v37, %v4772_v13 }
 0x183   : > { %v1620_v17 = vadd.f32 %v1619_v36, %v1572_v50  ;;  %v2475_v50 = vld [vmem:[%s2981_s28 + $0x5e0] sm:$0xff]  ;;  %v2482_v54 = vld [vmem:[%s2981_s28 + $0x618] sm:$0xff]  ;;  %v2524_v37 = vld [vmem:[%s2981_s28 + $0x768] sm:$0xff] }
 0x184   : > { %v1763_v3 = vadd.f32 %v1762_v15, %v1715_v35  ;;  %v1906_v10 = vadd.f32 %v1905_v25, %v1858_v45  ;;  %v1722_v45 = vmul.f32 %v2475_v50, %v4769_v31  ;;  %v1723_v15 = vmul.f32 %v2476_v62, %v4770_v58  ;;  %v2515_v31 = vld [vmem:[%s2981_s28 + $0x720] sm:$0xff] }
 0x185   : > { %v1621_v61 = vadd.f32 %v1620_v17, %v1573_v28  ;;  %v2693_v28 = vld [vmem:[%s2974_s26 + $0x270] sm:$0xff]  ;;  %v2698_v55 = vld [vmem:[%s2974_s26 + $0x298] sm:$0xff]  ;;  %v2699_v50 = vld [vmem:[%s2974_s26 + $0x2a0] sm:$0xff]  ;;  %v1729_v39 = vmul.f32 %v2482_v54, %v4152_v52 }
 0x186   : > { %v1764_v6 = vadd.f32 %v1763_v3, %v1716_v21  ;;  %v1907_v34 = vadd.f32 %v1906_v10, %v1859_v53  ;;  %v1865_v36 = vmul.f32 %v2693_v28, %v2512_v9  ;;  %v2477_v21 = vld [vmem:[%s2981_s28 + $0x5f0] sm:$0xff]  ;;  %v2694_v53 = vld [vmem:[%s2974_s26 + $0x278] sm:$0xff] }
 0x187   : > { %v1622_v57 = vadd.f32 %v1621_v61, %v1574_v59  ;;  %v1866_v25 = vmul.f32 %v2694_v53, %v2513_v63  ;;  %v2479_v61 = vld [vmem:[%s2981_s28 + $0x600] sm:$0xff]  ;;  %v2521_v63 = vld [vmem:[%s2981_s28 + $0x750] sm:$0xff] }
 0x188   : > { %v1765_v47 = vadd.f32 %v1764_v6, %v1717_v43  ;;  %v1908_v8 = vadd.f32 %v1907_v34, %v1860_v12  ;;  %v1724_v43 = vmul.f32 %v2477_v21, %v4771_v48  ;;  %v1867_v12 = vmul.f32 %v2695_v2, %v2514_v14  ;;  %v2696_v6 = vld [vmem:[%s2974_s26 + $0x288] sm:$0xff]  ;;  %v2702_v21 = vld [vmem:[%s2974_s26 + $0x2b8] sm:$0xff] }
 0x189   : > { %v1623_v33 = vrot.slane %v1622_v57, 4  ;;  %v1868_v41 = vmul.f32 %v2696_v6, %v2515_v31  ;;  %v2480_v48 = vld [vmem:[%s2981_s28 + $0x608] sm:$0xff]  ;;  %v1726_v11 = vmul.f32 %v2479_v61, %v4765_v27  ;;  %v1874_v14 = vmul.f32 %v2702_v21, %v2521_v63  ;;  %v2525_v2 = vld [vmem:[%s2981_s28 + $0x770] sm:$0xff] }
 0x18a   : > { %v1766_v7 = vadd.f32 %v1765_v47, %v1718_v20  ;;  %v1909_v60 = vadd.f32 %v1908_v8, %v1861_v19  ;;  %v2518_v8 = vld [vmem:[%s2981_s28 + $0x738] sm:$0xff] }
 0x18b   : > { %v1624_v56 = vadd.f32 %v1623_v33, %v1622_v57  ;;  %v2517_v57 = vld [vmem:[%s2981_s28 + $0x730] sm:$0xff]  ;;  %v1727_v33 = vmul.f32 %v2480_v48, %v4130_v30  ;;  %v1871_v9 = vmul.f32 %v2699_v50, %v2518_v8  ;;  %v2707_v48 = vld [vmem:[%s2974_s26 + $0x2e0] sm:$0xff] }
 0x18c   : > { %v1767_v5 = vadd.f32 %v1766_v7, %v1719_v42  ;;  %v1910_v35 = vadd.f32 %v1909_v60, %v1862_v1  ;;  %v2697_v42 = vld [vmem:[%s2974_s26 + $0x290] sm:$0xff] }
 0x18d   : > { %v1625_v29 = vrot.slane %v1624_v56, 2  ;;  %v1869_v47 = vmul.f32 %v2697_v42, %v2516_v40  ;;  %v2481_v1 = vld [vmem:[%s2981_s28 + $0x610] sm:$0xff]  ;;  %v2526_v40 = vld [vmem:[%s2981_s28 + $0x778] sm:$0xff]  ;;  %v2528_v42 = vld [vmem:[%s2981_s28 + $0x788] sm:$0xff] }
 0x18e   : > { %v1768_v18 = vadd.f32 %v1767_v5, %v1720_v46  ;;  %v1911_v4 = vadd.f32 %v1910_v35, %v1863_v23  ;;  %v1870_v46 = vmul.f32 %v2698_v55, %v2517_v57  ;;  %v2519_v23 = vld [vmem:[%s2981_s28 + $0x740] sm:$0xff]  ;;  %v1728_v60 = vmul.f32 %v2481_v1, %v4141_v16  ;;  %v2520_v5 = vld [vmem:[%s2981_s28 + $0x748] sm:$0xff]  ;;  %v2529_v8 = vld [vmem:[%s2981_s28 + $0x790] sm:$0xff] }
 0x18f   : > { %v1626_v26 = vadd.f32 %v1625_v29, %v1624_v56  ;;  %v2700_v35 = vld [vmem:[%s2974_s26 + $0x2a8] sm:$0xff]  ;;  %v1879_v57 = vmul.f32 %v2707_v48, %v2526_v40 }
 0x190   : > { %v1769_v22 = vadd.f32 %v1768_v18, %v1721_v24  ;;  %v1912_v59 = vadd.f32 %v1911_v4, %v1864_v32  ;;  %v1872_v29 = vmul.f32 %v2700_v35, %v2519_v23  ;;  %v2701_v18 = vld [vmem:[%s2974_s26 + $0x2b0] sm:$0xff]  ;;  %v2531_v23 = vld [vmem:[%s2981_s28 + $0x7a0] sm:$0xff] }
 0x191   : > { %v1627_v17 = vrot.slane %v1626_v26, 1  ;;  %v1873_v28 = vmul.f32 %v2701_v18, %v2520_v5  ;;  %v2522_v4 = vld [vmem:[%s2981_s28 + $0x758] sm:$0xff]  ;;  %v1884_v50 = vmul.f32 %v2531_v23, %v4152_v52  ;;  %v2533_v52 = vld [vmem:[#allocation8] ss:$0 sm:$0xff] (!%p2532_p0) }
 0x192   : > { %v1770_v3 = vadd.f32 %v1769_v22, %v1722_v45  ;;  %v1913_v10 = vadd.f32 %v1912_v59, %v1865_v36  ;;  %v2523_v22 = vld [vmem:[%s2981_s28 + $0x760] sm:$0xff]  ;;  %1961 = vbcast.lane.b32.xlu1 (!%p2532_p0), %v2533_v52, 256 }
 0x193   : > { %v1628_v58 = vadd.f32 %v1627_v17, %v1626_v26 }
 0x194   : > { %v1771_v20 = vadd.f32 %v1770_v3, %v1723_v15  ;;  %v1914_v19 = vadd.f32 %v1913_v10, %v1866_v25  ;;  %v2703_v25 = vld [vmem:[%s2974_s26 + $0x2c0] sm:$0xff]  ;;  %v2705_v10 = vld [vmem:[%s2974_s26 + $0x2d0] sm:$0xff] }
 0x195   : > { %v1629_v34 = vadd.f32 %v1628_v58, %v1476_v49  ;;  %v1875_v59 = vmul.f32 %v2703_v25, %v2522_v4  ;;  %v2704_v49 = vld [vmem:[%s2974_s26 + $0x2c8] sm:$0xff]  ;;  %v1877_v58 = vmul.f32 %v2705_v10, %v2524_v37 }
 0x196   : > { %v1772_v44 = vadd.f32 %v1771_v20, %v1724_v43  ;;  %v1915_v38 = vadd.f32 %v1914_v19, %v1867_v12  ;;  %v1876_v43 = vmul.f32 %v2704_v49, %v2523_v22  ;;  %v2706_v20 = vld [vmem:[%s2974_s26 + $0x2d8] sm:$0xff] }
 0x197   : > { %1630 = vst [vmem:[#allocation2 + $0xa] sm:$0x1] %v1629_v34  ;;  %v1878_v6 = vmul.f32 %v2706_v20, %v2525_v2  ;;  %v2527_v19 = vld [vmem:[%s2981_s28 + $0x780] sm:$0xff] }
 0x198   : > { %v1773_v51 = vadd.f32 %v1772_v44, %v1725_v0  ;;  %v1916_v7 = vadd.f32 %v1915_v38, %v1868_v41  ;;  %v1631_v44 = vld [vmem:[#allocation2 + $0xb] sm:$0x1]  ;;  %v1880_v38 = vmul.f32 %v2527_v19, %v4772_v13 }
 0x19a   : > { %v1774_v56 = vadd.f32 %v1773_v51, %v1726_v11  ;;  %v1917_v24 = vadd.f32 %v1916_v7, %v1869_v47  ;;  %v1881_v51 = vmul.f32 %v2528_v42, %v4765_v27  ;;  %v1882_v7 = vmul.f32 %v2529_v8, %v4130_v30  ;;  %v1945_v30 = vld [vmem:[#allocation2] sm:$0x1f] (!%p2532_p0) }
 0x19c   : > { %v1775_v32 = vadd.f32 %v1774_v56, %v1727_v33  ;;  %v1918_v62 = vadd.f32 %v1917_v24, %v1870_v46  ;;  %v2530_v46 = vld [vmem:[%s2981_s28 + $0x798] sm:$0xff] }
 0x19e   : > { %v1776_v45 = vadd.f32 %v1775_v32, %v1728_v60  ;;  %v1919_v36 = vadd.f32 %v1918_v62, %v1871_v9  ;;  %v1883_v60 = vmul.f32 %v2530_v46, %v4141_v16 }
 0x1a0   : > { %v1777_v26 = vadd.f32 %v1776_v45, %v1729_v39  ;;  %v1920_v15 = vadd.f32 %v1919_v36, %v1872_v29  ;;  %v1786_v29 = vld [vmem:[#allocation2 + $0xc] sm:$0x1]  ;;  %v1948_v45 = vsel (!%p2532_p0), %vm1947_vm0, %v1945_v30, 0.0 }
 0x1a1   : > { %1949 = vadd.xlane.f32.xlu0 (!%p2532_p0), %v1948_v45 }
 0x1a2   : > { %v1778_v53 = vrot.slane %v1777_v26, 4  ;;  %v1921_v17 = vadd.f32 %v1920_v15, %v1873_v28  ;;  %v2826_v28 = vmov (!%p2532_p0), 0   ;;  %v1974_v15 = vlaneseq (!%p2532_p0) }
 0x1a3   : > { %2708 = vset.pattern.permute.xlu1 (!%p2532_p0), %v2826_v28  ;;  %2709 = vset.pattern.permute.xlu0 (!%p2532_p0), %v2826_v28 }
 0x1a4   : > { %v1779_v31 = vadd.f32 %v1778_v53, %v1777_v26  ;;  %v1922_v3 = vadd.f32 %v1921_v17, %v1874_v14  ;;  %v1975_v22 = vand.u32 (!%p2532_p0), 127, %v1974_v15  ;;  %v1977_v53 = vshrl.u32 (!%p2532_p0), %v1974_v15, 7 }
 0x1a6   : > { %v1780_v12 = vrot.slane %v1779_v31, 2  ;;  %v1923_v61 = vadd.f32 %v1922_v3, %v1875_v59  ;;  %v1978_v25 = vsub.s32 (!%p2532_p0), %v1975_v22, %v1977_v53 }
 0x1a8   : > { %v1781_v0 = vadd.f32 %v1780_v12, %v1779_v31  ;;  %v1924_v41 = vadd.f32 %v1923_v61, %v1876_v43 }
 0x1aa   : > { %v1782_v34 = vrot.slane %v1781_v0, 1  ;;  %v1925_v11 = vadd.f32 %v1924_v41, %v1877_v58 }
 0x1ac   : > { %v1783_v47 = vadd.f32 %v1782_v34, %v1781_v0  ;;  %v1926_v1 = vadd.f32 %v1925_v11, %v1878_v6 }
 0x1ae   : > { %v1784_v33 = vadd.f32 %v1783_v47, %v1631_v44  ;;  %v1927_v55 = vadd.f32 %v1926_v1, %v1879_v57 }
 0x1b0   : > { %1785 = vst [vmem:[#allocation2 + $0xb] sm:$0x1] %v1784_v33  ;;  %v1928_v54 = vadd.f32 %v1927_v55, %v1880_v38 }
 0x1b2   : > { %v1929_v56 = vadd.f32 %v1928_v54, %v1881_v51 }
 0x1b4   : > { %v1930_v9 = vadd.f32 %v1929_v56, %v1882_v7 }
 0x1b6   : > { %v1931_v24 = vadd.f32 %v1930_v9, %v1883_v60 }
 0x1b8   : > { %v1932_v13 = vadd.f32 %v1931_v24, %v1884_v50 }
 0x1ba   : > { %v1933_v5 = vrot.slane %v1932_v13, 4 }
 0x1bc   : > { %v1934_v39 = vadd.f32 %v1933_v5, %v1932_v13 }
 0x1be   : > { %v1935_v32 = vrot.slane %v1934_v39, 2 }
 0x1c0   : > { %v1936_v35 = vadd.f32 %v1935_v32, %v1934_v39 }
 0x1c2   : > { %v1937_v27 = vrot.slane %v1936_v35, 1  ;;  %1944 = sbr.rel (%p2532_p0) target bundleno = 741 (0x2e5), region = 52 }
 0x1c4   : > { %v1938_v62 = vadd.f32 %v1937_v27, %v1936_v35 }
 0x1c6   : > { %v1939_v63 = vadd.f32 %v1938_v62, %v1786_v29 }
 0x1c8   : > { %1940 = vst [vmem:[#allocation2 + $0xc] sm:$0x1] %v1939_v63 }
 0x1cf   : > { %v1946_v16 = vld [vmem:[#allocation2 + $0x8] sm:$0x1f] }
 0x1d0   : > { %v1951_v18 = vsel %vm1947_vm0, %v1946_v16, 0.0 }
 0x1d1   : > { %1952 = vadd.xlane.f32.xlu0 %v1951_v18 }
 0x204   : > { %v1962_v36 = vpop.permute.xlu1 %1961 }
 0x22e   : > { %v1950_v4 = vpop.xlane.xlu0 %1949 }
 0x22f   : > { %v1964_v26 = vadd.f32 %v1962_v36, %v1950_v4 }
 0x231   : > { %1969 = vperm.xlu1 %2708, %v1964_v26  }
 0x25e   : > { %v1953_v21 = vpop.xlane.xlu0 %1952 }
 0x25f   : > { %v1965_v14 = vadd.f32 %v1962_v36, %v1953_v21 }
 0x261   : > { %1972 = vperm.xlu0 %2709, %v1965_v14  }
 0x2b0   : > { %v1970_v59 = vpop.permute.xlu1 %1969 }
 0x2b1   : > { %v1979_v37 = vrot.slane %v1970_v59, %v1978_v25 }
 0x2e0   : > { %v1973_v17 = vpop.permute.xlu0 %1972 }
 0x2e1   : > { %v1983_v31 = vrot.slane %v1973_v17, %v1978_v25 }
 0x2e3   : > { %v1985_v49 = vsel %vm1984_vm1, %v1983_v31, %v1979_v37 }
 0x2e4   : > { %1988 = vst.msk [vmem:[#allocation9] sm:$0x3] %vm1987_vm2, %v1985_v49 }
 0x2e5 PF: > { %p2576_p1 = scmp.eq.s32.totalorder %s2867_s16, 1  ;;  %s2827_s22 = smov [#allocation9]  }
 0x2e6   : > { %s1996_s23 = sshll.u32 %s2827_s22, 4  ;;  %s1997_s23 = int_to_ptr.vmem [resolvable:$true] %s1996_s23 }
 0x2e7   : > { %s2738_s4 = scalar_lea.vmem %s1997_s23, 32  ;;  %p2745_p7 = scmp.lt.s32.totalorder %s1997_s23, %s1997_s23 }
 0x2e8   : > { %p2739_p2 = scmp.ne.s32.totalorder %s1997_s23, %s2738_s4  ;;  %p2746_p11 = scmp.lt.s32.totalorder %s2738_s4, %s2738_s4 }
 0x2ea   : > { %p2740_p3 = pnand %p2739_p2, %p2576_p1  ;;  %p2747_p13 = por %p2746_p11, %p2745_p7 }
 0x2ec   : > { %p2741_p6 = pneg %p2740_p3 }
 0x2ee   : > { %p2748_p4 = pnand %p2747_p13, %p2741_p6 }
 0x2f0   : > { %2751 = shalt.err (!%p2748_p4)
}
 0x2f1   : > { %s2752_s5 = scalar_lea.hbm %s4496_s3, 32 }
 0x2f2   : > { %p2753_p5 = scmp.ne.s32.totalorder %s4496_s3, %s2752_s5  ;;  %p2758_p10 = scmp.lt.u32.totalorder %s2752_s5, %s4496_s3 }
 0x2f4   : > { %p2754_p8 = pnand %p2753_p5, %p2576_p1 }
 0x2f6   : > { %p2755_p9 = pneg %p2754_p8 }
 0x2f8   : > { %p2760_p12 = pnand %p2758_p10, %p2755_p9 }
 0x2fa   : > { %2763 = shalt.err (!%p2760_p12)
}
 0x2fb   : > { %2567 = dma.vmem_to_hbm [thread:$0]  (%p2576_p1), %s1997_s23, 32, %s4496_s3, [#allocation5]  }
 0x2fc   : > { %2793 = dma.done.wait (%p2576_p1), [#allocation5], 32  }
 0x2fd   : > { %2795 = vsyncadd (%p2576_p1), [#allocation5], 4294967264 }
 0x2fe PF: > { %p17_p0 = scmp.ge.s32.totalorder %s2870_s17, 4   ;;  %s4773_s12 = smov %s2802_s13 }
 0x2ff   : > { %s4774_s13 = smov %s2806_s14  ;;  %s4775_s14 = smov %s2880_s20 }
 0x300   : > { %s4776_s15 = smov %s2870_s17  ;;  %19 = sbr.rel (!%p17_p0) target bundleno = 6 (0x6), region = 110 }
 0x307   :  { %2009 = vsyncpa [#allocation4], 1 }
 0x308   :  { %2011 = vsyncpa [#allocation4 + $0x1], 1 }
 0x309   :  { %2012 = vsyncpa [#allocation7], 1 }
 0x30a   :  { %2014 = vsyncpa [#allocation7 + $0x1], 1 }
 0x30b   :  { %2015 = vsyncpa [#allocation5], 1 }
 0x30c   :  { %2017 = vsyncpa [#allocation5 + $0x1], 1 }

</bundles_post_ra>
